<compile_context>
chip_gen: v6e
topology: v6e:2x2x1
jax: 0.10.0
libtpu: 0.0.40
codegen_flags: <defaults>
</compile_context>

<pallas_src>
import functools

import numpy as np
import jax
import jax.numpy as jnp
from jax.experimental import pallas as pl
from jax.experimental.pallas import tpu as pltpu

EPS = 1e-5  # nn.BatchNorm2d default eps


def _round_up(x, m):
    return (x + m - 1) // m * m


def _vmem_limit_bytes():
    """VMEM limit from the actual chip (v5e/v6e: 128 MiB, v7x: 64 MiB) with headroom."""
    try:
        cap = int(pltpu.get_tpu_info().vmem_capacity_bytes)
    except Exception:
        cap = 64 << 20
    return max(32 << 20, min(cap * 3 // 4, 100 << 20))


# ---------------------------------------------------------------------------
# Pass 1: fused im2col + conv + per-image batch-stat partials (one image / grid step).
#
#   x_ref : (L, C)            bf16 padded NHWC image, (H, W) flattened
#   w_ref : (KH*KW, C, OCp)   bf16
#   m_ref : (ROWSp, 1)        f32 validity mask (1.0 for real output pixels)
#   y_ref : (ROWSp, OCp)      bf16 conv output (zero at masked rows)
#   s1/s2 : (8, OCp)          f32 per-image sum / sum-of-squares (row-replicated)
#
# Flat output row q maps to (oh, ow') = divmod(q, W + 2*pad); conv tap (i, j) is flat row
# q + i*(W + 2*pad) + j, i.e. a contiguous static window -> no patch matrix, no reshapes.
# ---------------------------------------------------------------------------
def _conv_stats_kernel(x_ref, w_ref, m_ref, y_ref, s1_ref, s2_ref, *, kh, kw, w_stride):
    rows_pad = y_ref.shape[0]
    acc = jnp.zeros(y_ref.shape, jnp.float32)
    for i in range(kh):
        for j in range(kw):
            xs = x_ref[pl.ds(i * w_stride + j, rows_pad), :]       # static shifted window
            acc = acc + jnp.dot(xs, w_ref[i * kw + j],
                                preferred_element_type=jnp.float32)
    acc = acc * m_ref[...]          # zero wrap-around columns / padded rows (keeps stats exact)
    y_ref[...] = acc.astype(y_ref.dtype)
    s1 = jnp.sum(acc, axis=0, keepdims=True)
    s2 = jnp.sum(acc * acc, axis=0, keepdims=True)
    s1_ref[...] = jnp.broadcast_to(s1, s1_ref.shape)
    s2_ref[...] = jnp.broadcast_to(s2, s2_ref.shape)


# ---------------------------------------------------------------------------
# Pass 2: global batch-norm affine + ReLU, written channel-major (in-kernel transpose).
# ---------------------------------------------------------------------------
def _bn_relu_kernel(y_ref, scale_ref, shift_ref, o_ref):
    y = y_ref[...].astype(jnp.float32)
    t = jnp.maximum(y * scale_ref[...] + shift_ref[...], 0.0)      # (ROWSp, OCp)
    o_ref[...] = t.T.astype(o_ref.dtype)                           # (OCp, ROWSp), XLU transpose


def basic_conv2d(x, weight, bias, gamma, beta, *, padding=1):
    """Forward pass of BasicConv2d (stride 1).

    x: (N, C, H, W) f32; weight: (OC, C, KH, KW); bias/gamma/beta: (OC,).
    Returns (N, OC, OH, OW) f32.  `bias` is accepted for API parity but unused:
    training-mode BatchNorm subtracts the per-channel mean, so it cancels exactly.
    """
    del bias
    n, c, h, w = x.shape
    oc, _, kh, kw = weight.shape
    p = padding

    oh = h + 2 * p - kh + 1
    ow = w + 2 * p - kw + 1
    wp = w + 2 * p                      # padded input width == flat-row stride
    hp = h + 2 * p
    rows = oh * wp                      # flat output rows (incl. kw-1 wrap columns per row)
    rows_pad = _round_up(rows, 128)     # lane-dense stores after the pass-2 transpose
    oc_pad = _round_up(oc, 128)         # lane-dense MXU output columns

    # Spatially padded NHWC bf16 input with (H, W) flattened; extra zero rows so the largest
    # shifted window stays in bounds.
    x_nhwc = jnp.transpose(x, (0, 2, 3, 1)).astype(jnp.bfloat16)
    x_sp = jnp.pad(x_nhwc, ((0, 0), (p, p), (p, p), (0, 0)))
    x_flat = x_sp.reshape(n, hp * wp, c)
    l_pad = _round_up(rows_pad + (kh - 1) * wp + (kw - 1), 8)
    x_flat = jnp.pad(x_flat, ((0, 0), (0, l_pad - hp * wp), (0, 0)))

    # Weight (OC, C, KH, KW) -> (KH*KW, C, OC_pad) bf16.
    w_flat = jnp.transpose(weight, (2, 3, 1, 0)).reshape(kh * kw, c, oc)
    w_flat = jnp.pad(w_flat, ((0, 0), (0, 0), (0, oc_pad - oc))).astype(jnp.bfloat16)

    # Validity mask over flat output rows (drops wrap-around columns and rows_pad padding).
    q = jnp.arange(rows_pad)
    mask = ((q < rows) & (q % wp < ow)).astype(jnp.float32).reshape(rows_pad, 1)

    vmem_limit = _vmem_limit_bytes()
    flops = 2 * n * kh * kw * rows_pad * c * oc_pad
    bytes_accessed = (x_flat.size * 2 + w_flat.size * 2 + mask.size * 4
                      + n * rows_pad * oc_pad * 2 + 2 * n * 8 * oc_pad * 4)

    y, s1, s2 = pl.pallas_call(
        functools.partial(_conv_stats_kernel, kh=kh, kw=kw, w_stride=wp),
        out_shape=(
            jax.ShapeDtypeStruct((n, rows_pad, oc_pad), jnp.bfloat16),   # conv output
            jax.ShapeDtypeStruct((n, 8, oc_pad), jnp.float32),           # per-image sum
            jax.ShapeDtypeStruct((n, 8, oc_pad), jnp.float32),           # per-image sum sq
        ),
        grid=(n,),
        in_specs=[
            pl.BlockSpec((None, l_pad, c), lambda i: (i, 0, 0)),
            pl.BlockSpec((kh * kw, c, oc_pad), lambda i: (0, 0, 0)),
            pl.BlockSpec((rows_pad, 1), lambda i: (0, 0)),
        ],
        out_specs=(
            pl.BlockSpec((None, rows_pad, oc_pad), lambda i: (i, 0, 0)),
            pl.BlockSpec((None, 8, oc_pad), lambda i: (i, 0, 0)),
            pl.BlockSpec((None, 8, oc_pad), lambda i: (i, 0, 0)),
        ),
        compiler_params=pltpu.CompilerParams(
            dimension_semantics=("parallel",),   # per-image stat partials -> race-free, 2 TCs on v7x
            vmem_limit_bytes=vmem_limit,
        ),
        cost_estimate=pl.CostEstimate(
            flops=flops, transcendentals=0, bytes_accessed=bytes_accessed),
    )(x_flat, w_flat, mask)

    # Finalize global (training-mode) batch statistics: tiny per-channel vectors.
    m_count = float(n * oh * ow)
    s1_tot = jnp.sum(s1[:, 0, :], axis=0)
    s2_tot = jnp.sum(s2[:, 0, :], axis=0)
    mean = s1_tot / m_count
    # Single-pass variance with f32 accumulators; a Welford merge would be safer when
    # |mean| >> std for a channel (acceptable here, documented contract).
    var = jnp.maximum(s2_tot / m_count - mean * mean, 0.0)
    inv_std = jax.lax.rsqrt(var + EPS)
    gamma_p = jnp.pad(gamma.astype(jnp.float32), (0, oc_pad - oc))
    beta_p = jnp.pad(beta.astype(jnp.float32), (0, oc_pad - oc))
    scale = (gamma_p * inv_std).reshape(1, oc_pad)     # padded channels: gamma=0 -> scale=0
    shift = (beta_p - mean * gamma_p * inv_std).reshape(1, oc_pad)

    out_cm = pl.pallas_call(
        _bn_relu_kernel,
        out_shape=jax.ShapeDtypeStruct((n, oc_pad, rows_pad), jnp.float32),
        grid=(n,),
        in_specs=[
            pl.BlockSpec((None, rows_pad, oc_pad), lambda i: (i, 0, 0)),
            pl.BlockSpec((1, oc_pad), lambda i: (0, 0)),
            pl.BlockSpec((1, oc_pad), lambda i: (0, 0)),
        ],
        out_specs=pl.BlockSpec((None, oc_pad, rows_pad), lambda i: (i, 0, 0)),
        compiler_params=pltpu.CompilerParams(
            dimension_semantics=("parallel",),
            vmem_limit_bytes=vmem_limit,
        ),
    )(y, scale, shift)

    # Already channel-major (NCHW order); just strip OC / spatial padding.
    out = out_cm[:, :oc, :rows].reshape(n, oc, oh, wp)[:, :, :, :ow]
    return out


def _reference(x, weight, bias, gamma, beta, padding):
    """Pure-JAX reference (conv + training-mode BN + ReLU) for correctness checking."""
    y = jax.lax.conv_general_dilated(
        x, weight, window_strides=(1, 1),
        padding=[(padding, padding), (padding, padding)],
        dimension_numbers=("NCHW", "OIHW", "NCHW"))
    y = y + bias.reshape(1, -1, 1, 1)
    mean = jnp.mean(y, axis=(0, 2, 3), keepdims=True)
    var = jnp.mean((y - mean) ** 2, axis=(0, 2, 3), keepdims=True)
    y = (y - mean) * jax.lax.rsqrt(var + EPS)
    y = y * gamma.reshape(1, -1, 1, 1) + beta.reshape(1, -1, 1, 1)
    return jnp.maximum(y, 0.0)


if __name__ == "__main__":
    key = jax.random.PRNGKey(0)
    k_x, k_w, k_b = jax.random.split(key, 3)

    N, C, H, W = 2, 4, 16, 16
    OC, KH, KW = 8, 3, 3
    PAD = 1

    x = jax.random.normal(k_x, (N, C, H, W), dtype=jnp.float32)

    fan_in = C * KH * KW
    weight = jax.random.normal(k_w, (OC, C, KH, KW), dtype=jnp.float32) / jnp.sqrt(fan_in)
    bias = jax.random.normal(k_b, (OC,), dtype=jnp.float32) * 0.1
    gamma = jnp.ones((OC,), dtype=jnp.float32)   # BN weight default init
    beta = jnp.zeros((OC,), dtype=jnp.float32)   # BN bias default init

    fwd = jax.jit(functools.partial(basic_conv2d, padding=PAD))
    out = jax.block_until_ready(fwd(x, weight, bias, gamma, beta))
    assert out.shape == (N, OC, H, W), out.shape

    ref = jax.block_until_ready(_reference(x, weight, bias, gamma, beta, PAD))
    np.testing.assert_allclose(np.asarray(out), np.asarray(ref), atol=5e-2, rtol=5e-2)

    print("KERNEL_OK")
</pallas_src>

<mosaic_0001>
module attributes {stable_mosaic.version = 11 : i64} {
  func.func @_conv_stats_kernel(%arg0: i32, %arg1: memref<1x424x4xbf16, #tpu.memory_space<vmem>>, %arg2: memref<9x4x128xbf16, #tpu.memory_space<vmem>>, %arg3: memref<384x1xf32, #tpu.memory_space<vmem>>, %arg4: memref<1x384x128xbf16, #tpu.memory_space<vmem>>, %arg5: memref<1x8x128xf32, #tpu.memory_space<vmem>>, %arg6: memref<1x8x128xf32, #tpu.memory_space<vmem>>) attributes {dimension_semantics = [#tpu.dimension_semantics<parallel>], iteration_bounds = array<i64: 2>, scalar_prefetch = 0 : i64, scratch_operands = 0 : i64, tpu.core_type = #tpu.core_type<tc>, window_params = [{transform_indices = @transform_0, window_bounds = array<i64: 1, 424, 4>}, {pipeline_mode = #tpu.pipeline_mode<synchronous>, transform_indices = @transform_1, window_bounds = array<i64: 9, 4, 128>}, {pipeline_mode = #tpu.pipeline_mode<synchronous>, transform_indices = @transform_2, window_bounds = array<i64: 384, 1>}, {transform_indices = @transform_3, window_bounds = array<i64: 1, 384, 128>}, {transform_indices = @transform_4, window_bounds = array<i64: 1, 8, 128>}, {transform_indices = @transform_5, window_bounds = array<i64: 1, 8, 128>}]} {
    %cst = arith.constant 0.000000e+00 : f32
    %0 = vector.broadcast %cst : f32 to vector<384x128xf32>
    %c0 = arith.constant 0 : index
    %c0_0 = arith.constant 0 : index
    %c0_1 = arith.constant 0 : index
    %1 = vector.load %arg1[%c0, %c0_0, %c0_1] : memref<1x424x4xbf16, #tpu.memory_space<vmem>>, vector<1x384x4xbf16>
    %2 = vector.shape_cast %1 : vector<1x384x4xbf16> to vector<384x4xbf16>
    %c0_2 = arith.constant 0 : index
    %c0_3 = arith.constant 0 : index
    %c0_4 = arith.constant 0 : index
    %3 = vector.load %arg2[%c0_2, %c0_3, %c0_4] : memref<9x4x128xbf16, #tpu.memory_space<vmem>>, vector<1x4x128xbf16>
    %4 = vector.shape_cast %3 : vector<1x4x128xbf16> to vector<4x128xbf16>
    %cst_5 = arith.constant dense<0.000000e+00> : vector<384x128xf32>
    %5 = tpu.matmul %2, %4, %cst_5 {dimension_numbers = #tpu.dot_dimension_numbers<[1], [0], [0], [1], [0, 0, 1, 1], [], []>} : vector<384x4xbf16>, vector<4x128xbf16>, vector<384x128xf32> -> vector<384x128xf32>
    %6 = arith.addf %0, %5 : vector<384x128xf32>
    %c0_6 = arith.constant 0 : index
    %c1 = arith.constant 1 : index
    %c0_7 = arith.constant 0 : index
    %7 = vector.load %arg1[%c0_6, %c1, %c0_7] : memref<1x424x4xbf16, #tpu.memory_space<vmem>>, vector<1x384x4xbf16>
    %8 = vector.shape_cast %7 : vector<1x384x4xbf16> to vector<384x4xbf16>
    %c1_8 = arith.constant 1 : index
    %c0_9 = arith.constant 0 : index
    %c0_10 = arith.constant 0 : index
    %9 = vector.load %arg2[%c1_8, %c0_9, %c0_10] : memref<9x4x128xbf16, #tpu.memory_space<vmem>>, vector<1x4x128xbf16>
    %10 = vector.shape_cast %9 : vector<1x4x128xbf16> to vector<4x128xbf16>
    %cst_11 = arith.constant dense<0.000000e+00> : vector<384x128xf32>
    %11 = tpu.matmul %8, %10, %cst_11 {dimension_numbers = #tpu.dot_dimension_numbers<[1], [0], [0], [1], [0, 0, 1, 1], [], []>} : vector<384x4xbf16>, vector<4x128xbf16>, vector<384x128xf32> -> vector<384x128xf32>
    %12 = arith.addf %6, %11 : vector<384x128xf32>
    %c0_12 = arith.constant 0 : index
    %c2 = arith.constant 2 : index
    %c0_13 = arith.constant 0 : index
    %13 = vector.load %arg1[%c0_12, %c2, %c0_13] : memref<1x424x4xbf16, #tpu.memory_space<vmem>>, vector<1x384x4xbf16>
    %14 = vector.shape_cast %13 : vector<1x384x4xbf16> to vector<384x4xbf16>
    %c2_14 = arith.constant 2 : index
    %c0_15 = arith.constant 0 : index
    %c0_16 = arith.constant 0 : index
    %15 = vector.load %arg2[%c2_14, %c0_15, %c0_16] : memref<9x4x128xbf16, #tpu.memory_space<vmem>>, vector<1x4x128xbf16>
    %16 = vector.shape_cast %15 : vector<1x4x128xbf16> to vector<4x128xbf16>
    %cst_17 = arith.constant dense<0.000000e+00> : vector<384x128xf32>
    %17 = tpu.matmul %14, %16, %cst_17 {dimension_numbers = #tpu.dot_dimension_numbers<[1], [0], [0], [1], [0, 0, 1, 1], [], []>} : vector<384x4xbf16>, vector<4x128xbf16>, vector<384x128xf32> -> vector<384x128xf32>
    %18 = arith.addf %12, %17 : vector<384x128xf32>
    %c0_18 = arith.constant 0 : index
    %c18 = arith.constant 18 : index
    %c0_19 = arith.constant 0 : index
    %19 = vector.load %arg1[%c0_18, %c18, %c0_19] : memref<1x424x4xbf16, #tpu.memory_space<vmem>>, vector<1x384x4xbf16>
    %20 = vector.shape_cast %19 : vector<1x384x4xbf16> to vector<384x4xbf16>
    %c3 = arith.constant 3 : index
    %c0_20 = arith.constant 0 : index
    %c0_21 = arith.constant 0 : index
    %21 = vector.load %arg2[%c3, %c0_20, %c0_21] : memref<9x4x128xbf16, #tpu.memory_space<vmem>>, vector<1x4x128xbf16>
    %22 = vector.shape_cast %21 : vector<1x4x128xbf16> to vector<4x128xbf16>
    %cst_22 = arith.constant dense<0.000000e+00> : vector<384x128xf32>
    %23 = tpu.matmul %20, %22, %cst_22 {dimension_numbers = #tpu.dot_dimension_numbers<[1], [0], [0], [1], [0, 0, 1, 1], [], []>} : vector<384x4xbf16>, vector<4x128xbf16>, vector<384x128xf32> -> vector<384x128xf32>
    %24 = arith.addf %18, %23 : vector<384x128xf32>
    %c0_23 = arith.constant 0 : index
    %c19 = arith.constant 19 : index
    %c0_24 = arith.constant 0 : index
    %25 = vector.load %arg1[%c0_23, %c19, %c0_24] : memref<1x424x4xbf16, #tpu.memory_space<vmem>>, vector<1x384x4xbf16>
    %26 = vector.shape_cast %25 : vector<1x384x4xbf16> to vector<384x4xbf16>
    %c4 = arith.constant 4 : index
    %c0_25 = arith.constant 0 : index
    %c0_26 = arith.constant 0 : index
    %27 = vector.load %arg2[%c4, %c0_25, %c0_26] : memref<9x4x128xbf16, #tpu.memory_space<vmem>>, vector<1x4x128xbf16>
    %28 = vector.shape_cast %27 : vector<1x4x128xbf16> to vector<4x128xbf16>
    %cst_27 = arith.constant dense<0.000000e+00> : vector<384x128xf32>
    %29 = tpu.matmul %26, %28, %cst_27 {dimension_numbers = #tpu.dot_dimension_numbers<[1], [0], [0], [1], [0, 0, 1, 1], [], []>} : vector<384x4xbf16>, vector<4x128xbf16>, vector<384x128xf32> -> vector<384x128xf32>
    %30 = arith.addf %24, %29 : vector<384x128xf32>
    %c0_28 = arith.constant 0 : index
    %c20 = arith.constant 20 : index
    %c0_29 = arith.constant 0 : index
    %31 = vector.load %arg1[%c0_28, %c20, %c0_29] : memref<1x424x4xbf16, #tpu.memory_space<vmem>>, vector<1x384x4xbf16>
    %32 = vector.shape_cast %31 : vector<1x384x4xbf16> to vector<384x4xbf16>
    %c5 = arith.constant 5 : index
    %c0_30 = arith.constant 0 : index
    %c0_31 = arith.constant 0 : index
    %33 = vector.load %arg2[%c5, %c0_30, %c0_31] : memref<9x4x128xbf16, #tpu.memory_space<vmem>>, vector<1x4x128xbf16>
    %34 = vector.shape_cast %33 : vector<1x4x128xbf16> to vector<4x128xbf16>
    %cst_32 = arith.constant dense<0.000000e+00> : vector<384x128xf32>
    %35 = tpu.matmul %32, %34, %cst_32 {dimension_numbers = #tpu.dot_dimension_numbers<[1], [0], [0], [1], [0, 0, 1, 1], [], []>} : vector<384x4xbf16>, vector<4x128xbf16>, vector<384x128xf32> -> vector<384x128xf32>
    %36 = arith.addf %30, %35 : vector<384x128xf32>
    %c0_33 = arith.constant 0 : index
    %c36 = arith.constant 36 : index
    %c0_34 = arith.constant 0 : index
    %37 = vector.load %arg1[%c0_33, %c36, %c0_34] : memref<1x424x4xbf16, #tpu.memory_space<vmem>>, vector<1x384x4xbf16>
    %38 = vector.shape_cast %37 : vector<1x384x4xbf16> to vector<384x4xbf16>
    %c6 = arith.constant 6 : index
    %c0_35 = arith.constant 0 : index
    %c0_36 = arith.constant 0 : index
    %39 = vector.load %arg2[%c6, %c0_35, %c0_36] : memref<9x4x128xbf16, #tpu.memory_space<vmem>>, vector<1x4x128xbf16>
    %40 = vector.shape_cast %39 : vector<1x4x128xbf16> to vector<4x128xbf16>
    %cst_37 = arith.constant dense<0.000000e+00> : vector<384x128xf32>
    %41 = tpu.matmul %38, %40, %cst_37 {dimension_numbers = #tpu.dot_dimension_numbers<[1], [0], [0], [1], [0, 0, 1, 1], [], []>} : vector<384x4xbf16>, vector<4x128xbf16>, vector<384x128xf32> -> vector<384x128xf32>
    %42 = arith.addf %36, %41 : vector<384x128xf32>
    %c0_38 = arith.constant 0 : index
    %c37 = arith.constant 37 : index
    %c0_39 = arith.constant 0 : index
    %43 = vector.load %arg1[%c0_38, %c37, %c0_39] : memref<1x424x4xbf16, #tpu.memory_space<vmem>>, vector<1x384x4xbf16>
    %44 = vector.shape_cast %43 : vector<1x384x4xbf16> to vector<384x4xbf16>
    %c7 = arith.constant 7 : index
    %c0_40 = arith.constant 0 : index
    %c0_41 = arith.constant 0 : index
    %45 = vector.load %arg2[%c7, %c0_40, %c0_41] : memref<9x4x128xbf16, #tpu.memory_space<vmem>>, vector<1x4x128xbf16>
    %46 = vector.shape_cast %45 : vector<1x4x128xbf16> to vector<4x128xbf16>
    %cst_42 = arith.constant dense<0.000000e+00> : vector<384x128xf32>
    %47 = tpu.matmul %44, %46, %cst_42 {dimension_numbers = #tpu.dot_dimension_numbers<[1], [0], [0], [1], [0, 0, 1, 1], [], []>} : vector<384x4xbf16>, vector<4x128xbf16>, vector<384x128xf32> -> vector<384x128xf32>
    %48 = arith.addf %42, %47 : vector<384x128xf32>
    %c0_43 = arith.constant 0 : index
    %c38 = arith.constant 38 : index
    %c0_44 = arith.constant 0 : index
    %49 = vector.load %arg1[%c0_43, %c38, %c0_44] : memref<1x424x4xbf16, #tpu.memory_space<vmem>>, vector<1x384x4xbf16>
    %50 = vector.shape_cast %49 : vector<1x384x4xbf16> to vector<384x4xbf16>
    %c8 = arith.constant 8 : index
    %c0_45 = arith.constant 0 : index
    %c0_46 = arith.constant 0 : index
    %51 = vector.load %arg2[%c8, %c0_45, %c0_46] : memref<9x4x128xbf16, #tpu.memory_space<vmem>>, vector<1x4x128xbf16>
    %52 = vector.shape_cast %51 : vector<1x4x128xbf16> to vector<4x128xbf16>
    %cst_47 = arith.constant dense<0.000000e+00> : vector<384x128xf32>
    %53 = tpu.matmul %50, %52, %cst_47 {dimension_numbers = #tpu.dot_dimension_numbers<[1], [0], [0], [1], [0, 0, 1, 1], [], []>} : vector<384x4xbf16>, vector<4x128xbf16>, vector<384x128xf32> -> vector<384x128xf32>
    %54 = arith.addf %48, %53 : vector<384x128xf32>
    %c0_48 = arith.constant 0 : index
    %c0_49 = arith.constant 0 : index
    %55 = vector.load %arg3[%c0_48, %c0_49] : memref<384x1xf32, #tpu.memory_space<vmem>>, vector<384x1xf32>
    %56 = vector.broadcast %55 : vector<384x1xf32> to vector<384x128xf32>
    %57 = arith.mulf %54, %56 : vector<384x128xf32>
    %58 = arith.truncf %57 : vector<384x128xf32> to vector<384x128xbf16>
    %c0_50 = arith.constant 0 : index
    %c0_51 = arith.constant 0 : index
    %c0_52 = arith.constant 0 : index
    %59 = vector.load %arg4[%c0_50, %c0_51, %c0_52] : memref<1x384x128xbf16, #tpu.memory_space<vmem>>, vector<1x384x128xbf16>
    %60 = vector.shape_cast %59 : vector<1x384x128xbf16> to vector<384x128xbf16>
    %61 = vector.shape_cast %58 : vector<384x128xbf16> to vector<1x384x128xbf16>
    tpu.vector_store %arg4[%c0_50, %c0_51, %c0_52], %61 {strides = array<i32>} : memref<1x384x128xbf16, #tpu.memory_space<vmem>>, vector<1x384x128xbf16>,
    %cst_53 = arith.constant dense<0.000000e+00> : vector<128xf32>
    %62 = vector.multi_reduction <add>, %57, %cst_53 [0] : vector<384x128xf32> to vector<128xf32>
    %63 = vector.shape_cast %62 : vector<128xf32> to vector<1x128xf32>
    %64 = arith.mulf %57, %57 : vector<384x128xf32>
    %cst_54 = arith.constant dense<0.000000e+00> : vector<128xf32>
    %65 = vector.multi_reduction <add>, %64, %cst_54 [0] : vector<384x128xf32> to vector<128xf32>
    %66 = vector.shape_cast %65 : vector<128xf32> to vector<1x128xf32>
    %67 = vector.shape_cast %63 : vector<1x128xf32> to vector<1x128xf32>
    %68 = vector.broadcast %67 : vector<1x128xf32> to vector<8x128xf32>
    %c0_55 = arith.constant 0 : index
    %c0_56 = arith.constant 0 : index
    %c0_57 = arith.constant 0 : index
    %69 = vector.load %arg5[%c0_55, %c0_56, %c0_57] : memref<1x8x128xf32, #tpu.memory_space<vmem>>, vector<1x8x128xf32>
    %70 = vector.shape_cast %69 : vector<1x8x128xf32> to vector<8x128xf32>
    %71 = vector.shape_cast %68 : vector<8x128xf32> to vector<1x8x128xf32>
    tpu.vector_store %arg5[%c0_55, %c0_56, %c0_57], %71 {strides = array<i32>} : memref<1x8x128xf32, #tpu.memory_space<vmem>>, vector<1x8x128xf32>,
    %72 = vector.shape_cast %66 : vector<1x128xf32> to vector<1x128xf32>
    %73 = vector.broadcast %72 : vector<1x128xf32> to vector<8x128xf32>
    %c0_58 = arith.constant 0 : index
    %c0_59 = arith.constant 0 : index
    %c0_60 = arith.constant 0 : index
    %74 = vector.load %arg6[%c0_58, %c0_59, %c0_60] : memref<1x8x128xf32, #tpu.memory_space<vmem>>, vector<1x8x128xf32>
    %75 = vector.shape_cast %74 : vector<1x8x128xf32> to vector<8x128xf32>
    %76 = vector.shape_cast %73 : vector<8x128xf32> to vector<1x8x128xf32>
    tpu.vector_store %arg6[%c0_58, %c0_59, %c0_60], %76 {strides = array<i32>} : memref<1x8x128xf32, #tpu.memory_space<vmem>>, vector<1x8x128xf32>,
    return
  }
  func.func @transform_0(%arg0: i32) -> (i32, i32, i32) {
    %c0_i32 = arith.constant 0 : i32
    %c0_i32_0 = arith.constant 0 : i32
    %c0_i32_1 = arith.constant 0 : i32
    return %arg0, %c0_i32, %c0_i32_0 : i32, i32, i32
  }
  func.func @transform_1(%arg0: i32) -> (i32, i32, i32) {
    %c0_i32 = arith.constant 0 : i32
    %c0_i32_0 = arith.constant 0 : i32
    %c0_i32_1 = arith.constant 0 : i32
    %c0_i32_2 = arith.constant 0 : i32
    return %c0_i32, %c0_i32_0, %c0_i32_1 : i32, i32, i32
  }
  func.func @transform_2(%arg0: i32) -> (i32, i32) {
    %c0_i32 = arith.constant 0 : i32
    %c0_i32_0 = arith.constant 0 : i32
    %c0_i32_1 = arith.constant 0 : i32
    return %c0_i32, %c0_i32_0 : i32, i32
  }
  func.func @transform_3(%arg0: i32) -> (i32, i32, i32) {
    %c0_i32 = arith.constant 0 : i32
    %c0_i32_0 = arith.constant 0 : i32
    %c0_i32_1 = arith.constant 0 : i32
    return %arg0, %c0_i32, %c0_i32_0 : i32, i32, i32
  }
  func.func @transform_4(%arg0: i32) -> (i32, i32, i32) {
    %c0_i32 = arith.constant 0 : i32
    %c0_i32_0 = arith.constant 0 : i32
    %c0_i32_1 = arith.constant 0 : i32
    return %arg0, %c0_i32, %c0_i32_0 : i32, i32, i32
  }
  func.func @transform_5(%arg0: i32) -> (i32, i32, i32) {
    %c0_i32 = arith.constant 0 : i32
    %c0_i32_0 = arith.constant 0 : i32
    %c0_i32_1 = arith.constant 0 : i32
    return %arg0, %c0_i32, %c0_i32_0 : i32, i32, i32
  }
}

module attributes {stable_mosaic.version = 11 : i64} {
  func.func @_bn_relu_kernel(%arg0: i32, %arg1: memref<1x384x128xbf16, #tpu.memory_space<vmem>>, %arg2: memref<1x128xf32, #tpu.memory_space<vmem>>, %arg3: memref<1x128xf32, #tpu.memory_space<vmem>>, %arg4: memref<1x128x384xf32, #tpu.memory_space<vmem>>) attributes {dimension_semantics = [#tpu.dimension_semantics<parallel>], iteration_bounds = array<i64: 2>, scalar_prefetch = 0 : i64, scratch_operands = 0 : i64, tpu.core_type = #tpu.core_type<tc>, window_params = [{transform_indices = @transform_0, window_bounds = array<i64: 1, 384, 128>}, {pipeline_mode = #tpu.pipeline_mode<synchronous>, transform_indices = @transform_1, window_bounds = array<i64: 1, 128>}, {pipeline_mode = #tpu.pipeline_mode<synchronous>, transform_indices = @transform_2, window_bounds = array<i64: 1, 128>}, {transform_indices = @transform_3, window_bounds = array<i64: 1, 128, 384>}]} {
    %c0 = arith.constant 0 : index
    %c0_0 = arith.constant 0 : index
    %c0_1 = arith.constant 0 : index
    %0 = vector.load %arg1[%c0, %c0_0, %c0_1] : memref<1x384x128xbf16, #tpu.memory_space<vmem>>, vector<1x384x128xbf16>
    %1 = vector.shape_cast %0 : vector<1x384x128xbf16> to vector<384x128xbf16>
    %2 = arith.extf %1 : vector<384x128xbf16> to vector<384x128xf32>
    %c0_2 = arith.constant 0 : index
    %c0_3 = arith.constant 0 : index
    %3 = vector.load %arg2[%c0_2, %c0_3] : memref<1x128xf32, #tpu.memory_space<vmem>>, vector<1x128xf32>
    %4 = vector.broadcast %3 : vector<1x128xf32> to vector<384x128xf32>
    %5 = arith.mulf %2, %4 : vector<384x128xf32>
    %c0_4 = arith.constant 0 : index
    %c0_5 = arith.constant 0 : index
    %6 = vector.load %arg3[%c0_4, %c0_5] : memref<1x128xf32, #tpu.memory_space<vmem>>, vector<1x128xf32>
    %7 = vector.broadcast %6 : vector<1x128xf32> to vector<384x128xf32>
    %8 = arith.addf %5, %7 : vector<384x128xf32>
    %cst = arith.constant 0.000000e+00 : f32
    %9 = vector.broadcast %cst : f32 to vector<384x128xf32>
    %10 = arith.maximumf %8, %9 : vector<384x128xf32>
    %11 = tpu.transpose %10, [1, 0] : vector<384x128xf32> -> vector<128x384xf32>
    %c0_6 = arith.constant 0 : index
    %c0_7 = arith.constant 0 : index
    %c0_8 = arith.constant 0 : index
    %12 = vector.load %arg4[%c0_6, %c0_7, %c0_8] : memref<1x128x384xf32, #tpu.memory_space<vmem>>, vector<1x128x384xf32>
    %13 = vector.shape_cast %12 : vector<1x128x384xf32> to vector<128x384xf32>
    %14 = vector.shape_cast %11 : vector<128x384xf32> to vector<1x128x384xf32>
    tpu.vector_store %arg4[%c0_6, %c0_7, %c0_8], %14 {strides = array<i32>} : memref<1x128x384xf32, #tpu.memory_space<vmem>>, vector<1x128x384xf32>,
    return
  }
  func.func @transform_0(%arg0: i32) -> (i32, i32, i32) {
    %c0_i32 = arith.constant 0 : i32
    %c0_i32_0 = arith.constant 0 : i32
    %c0_i32_1 = arith.constant 0 : i32
    return %arg0, %c0_i32, %c0_i32_0 : i32, i32, i32
  }
  func.func @transform_1(%arg0: i32) -> (i32, i32) {
    %c0_i32 = arith.constant 0 : i32
    %c0_i32_0 = arith.constant 0 : i32
    %c0_i32_1 = arith.constant 0 : i32
    return %c0_i32, %c0_i32_0 : i32, i32
  }
  func.func @transform_2(%arg0: i32) -> (i32, i32) {
    %c0_i32 = arith.constant 0 : i32
    %c0_i32_0 = arith.constant 0 : i32
    %c0_i32_1 = arith.constant 0 : i32
    return %c0_i32, %c0_i32_0 : i32, i32
  }
  func.func @transform_3(%arg0: i32) -> (i32, i32, i32) {
    %c0_i32 = arith.constant 0 : i32
    %c0_i32_0 = arith.constant 0 : i32
    %c0_i32_1 = arith.constant 0 : i32
    return %arg0, %c0_i32, %c0_i32_0 : i32, i32, i32
  }
}

</mosaic_0001>

<bundles_post_ra>
// kernel: basic_conv2d.3
= control target key start
LH: loop header
LB: loop body
LE: loop exit
PB: predicated region body
PF: predicated region fallthrough
CT: control target
= control target key end

     0   :  { %s792_s12 = smov 0   ;;  %s1063_s0 = inlined_call_operand.vmem [shape: bf16[2,384,128], index: 0, kind: input, shape index: {}]   ;;  %s1064_s1 = inlined_call_operand.vmem [shape: f32[1,128], index: 1, kind: input, shape index: {}]   ;;  %s1065_s2 = inlined_call_operand.vmem [shape: f32[1,128], index: 2, kind: input, shape index: {}]   ;;  %s1066_s3 = inlined_call_operand.vmem [shape: f32[2,128,384], index: 3, kind: output, shape index: {}]  }
   0x1 LB: > { %s624_s13 = sadd.s32 4294967295, %s770_s12   ;;  %p628_p0 = scmp.ge.s32.totalorder %s770_s12, 1  ;;  %s770_s12 = sphi %s792_s12, %s13_s12  }
   0x2   : > { %p137_p1 = scmp.lt.s32.totalorder %s770_s12, 3 }
   0x4   : > { %p138_p2 = pnand %p628_p0, %p137_p1 }
   0x5   : > { %p161_p3 = scmp.lt.s32.totalorder (!%p138_p2), %s624_s13, 1 }
   0x6   : > { %141 = sbr.rel (%p138_p2) target bundleno = 274 (0x112), region = 32 }
   0xb   : > { %s1068_s13 = smov (!%p161_p3, %s624_s13), 1  ;;  %v812_v1 = vld [vmem:[%s1064_s1] ss:$0 sm:$0xff] }
   0xc   : > { %s754_s14 = smul.u32 192, %s1068_s13  ;;  %v818_v6 = vld [vmem:[%s1065_s2] ss:$0 sm:$0xff] }
   0xd   : > { %s755_s22 = smul.u32 384, %s1068_s13 }
   0xe   : > { %s806_s17 = scalar_lea.vmem %s1063_s0, %s754_s14 }
   0xf   : > { %v636_v0 = vld [vmem:[%s806_s17] sm:$0xff]   ;;  %v731_v2 = vld [vmem:[%s806_s17 + $0x8] sm:$0xff]   ;;  %v732_v9 = vld [vmem:[%s806_s17 + $0x10] sm:$0xff]   ;;  %s1010_s25 = scalar_lea.vmem %s1066_s3, %s755_s22 }
  0x10   : > { %v637_v3 = vunpack.c.l.bf16 %v636_v0  ;;  %v638_v4 = vunpack.c.h.bf16 %v636_v0  ;;  %v641_v5 = vunpack.c.l.bf16 %v731_v2  ;;  %v642_v10 = vunpack.c.h.bf16 %v731_v2  ;;  %v733_v14 = vld [vmem:[%s806_s17 + $0x18] sm:$0xff]   ;;  %v738_v29 = vld [vmem:[%s806_s17 + $0x40] sm:$0xff]   ;;  %v739_v31 = vld [vmem:[%s806_s17 + $0x48] sm:$0xff]  }
  0x11   : > { %v645_v15 = vunpack.c.l.bf16 %v732_v9  ;;  %v646_v18 = vunpack.c.h.bf16 %v732_v9  ;;  %v649_v19 = vunpack.c.l.bf16 %v733_v14  ;;  %v650_v26 = vunpack.c.h.bf16 %v733_v14  ;;  %v746_v30 = vld [vmem:[%s806_s17 + $0x80] sm:$0xff]   ;;  %v747_v32 = vld [vmem:[%s806_s17 + $0x88] sm:$0xff]   ;;  %v740_v60 = vld [vmem:[%s806_s17 + $0x50] sm:$0xff]  }
  0x12   : > { %v274_v7 = vmul.f32 %v637_v3, %v812_v1  ;;  %v275_v8 = vmul.f32 %v638_v4, %v812_v1  ;;  %v276_v13 = vmul.f32 %v641_v5, %v812_v1  ;;  %v277_v17 = vmul.f32 %v642_v10, %v812_v1  ;;  %v734_v49 = vld [vmem:[%s806_s17 + $0x20] sm:$0xff]   ;;  %v748_v61 = vld [vmem:[%s806_s17 + $0x90] sm:$0xff]   ;;  %v735_v0 = vld [vmem:[%s806_s17 + $0x28] sm:$0xff]  }
  0x13   : > { %v278_v22 = vmul.f32 %v645_v15, %v812_v1  ;;  %v279_v24 = vmul.f32 %v646_v18, %v812_v1  ;;  %v280_v25 = vmul.f32 %v649_v19, %v812_v1  ;;  %v281_v36 = vmul.f32 %v650_v26, %v812_v1  ;;  %v749_v3 = vld [vmem:[%s806_s17 + $0x98] sm:$0xff]   ;;  %v882_v26 = vld [vmem:[%s806_s17 + $0x30] sm:$0xff]  }
  0x14   : > { %v329_v11 = vadd.f32 %v818_v6, %v274_v7  ;;  %v330_v12 = vadd.f32 %v818_v6, %v275_v8  ;;  %v331_v21 = vadd.f32 %v818_v6, %v276_v13  ;;  %v332_v23 = vadd.f32 %v818_v6, %v277_v17  ;;  %v741_v13 = vld [vmem:[%s806_s17 + $0x58] sm:$0xff]  }
  0x15   : > { %v333_v28 = vadd.f32 %v818_v6, %v278_v22  ;;  %v334_v34 = vadd.f32 %v818_v6, %v279_v24  ;;  %v840_v35 = vadd.f32 %v818_v6, %v280_v25  ;;  %v669_v37 = vunpack.c.l.bf16 %v738_v29 }
  0x16   : > { %v377_v16 = vmax.f32 %v329_v11, 0.0  ;;  %v378_v20 = vmax.f32 %v330_v12, 0.0  ;;  %v379_v27 = vmax.f32 %v331_v21, 0.0  ;;  %v380_v33 = vmax.f32 %v332_v23, 0.0 }
  0x17   : > { %v701_v38 = vunpack.c.l.bf16 %v746_v30  ;;  %v702_v39 = vunpack.c.h.bf16 %v746_v30  ;;  %v670_v40 = vunpack.c.h.bf16 %v738_v29  ;;  %v381_v41 = vmax.f32 %v333_v28, 0.0 }
  0x18   : > { %425 = vxpose.xlu0.b32.start [1/16] %v377_v16, 128  ;;  %v673_v42 = vunpack.c.l.bf16 %v739_v31  ;;  %v705_v43 = vunpack.c.l.bf16 %v747_v32  ;;  %v706_v44 = vunpack.c.h.bf16 %v747_v32  ;;  %v290_v45 = vmul.f32 %v669_v37, %v812_v1 }
  0x19   : > { %v306_v46 = vmul.f32 %v701_v38, %v812_v1  ;;  %v291_v47 = vmul.f32 %v670_v40, %v812_v1  ;;  %v307_v48 = vmul.f32 %v702_v39, %v812_v1  ;;  %v674_v52 = vunpack.c.h.bf16 %v739_v31  ;;  %v751_v39 = vld [vmem:[%s806_s17 + $0xa8] sm:$0xff]  }
  0x1a   : > { %v292_v50 = vmul.f32 %v673_v42, %v812_v1  ;;  %v308_v51 = vmul.f32 %v705_v43, %v812_v1  ;;  %v309_v53 = vmul.f32 %v706_v44, %v812_v1  ;;  %v345_v54 = vadd.f32 %v818_v6, %v290_v45 }
  0x1b   : > { %v853_v55 = vadd.f32 %v818_v6, %v306_v46  ;;  %v346_v56 = vadd.f32 %v818_v6, %v291_v47  ;;  %v857_v57 = vadd.f32 %v818_v6, %v307_v48  ;;  %v868_v62 = vadd.f32 %v818_v6, %v281_v36 }
  0x1c   : > { %426 = vxpose.xlu0.b32.cont [2/16] %v378_v20, 128  ;;  %v860_v58 = vadd.f32 %v818_v6, %v308_v51  ;;  %v863_v59 = vadd.f32 %v818_v6, %v309_v53  ;;  %v653_v63 = vunpack.c.l.bf16 %v734_v49  ;;  %v393_v2 = vmax.f32 %v345_v54, 0.0 }
  0x1d   : > { %v382_v4 = vmax.f32 %v334_v34, 0.0  ;;  %v383_v5 = vmax.f32 %v840_v35, 0.0  ;;  %v347_v7 = vadd.f32 %v818_v6, %v292_v50  ;;  %v293_v8 = vmul.f32 %v674_v52, %v812_v1  ;;  %v750_v35 = vld [vmem:[%s806_s17 + $0xa0] sm:$0xff]  }
  0x1e   : > { %457 = vxpose.xlu1.b32.start [1/16] %v393_v2, 128  ;;  %v394_v9 = vmax.f32 %v346_v56, 0.0  ;;  %v677_v10 = vunpack.c.l.bf16 %v740_v60  ;;  %v709_v11 = vunpack.c.l.bf16 %v748_v61  ;;  %v710_v12 = vunpack.c.h.bf16 %v748_v61  ;;  %v914_v50 = vld [vmem:[%s806_s17 + $0x60] sm:$0xff]   ;;  %v744_v2 = vld [vmem:[%s806_s17 + $0x70] sm:$0xff]  }
  0x1f   : > { %v654_v14 = vunpack.c.h.bf16 %v734_v49  ;;  %v657_v15 = vunpack.c.l.bf16 %v735_v0  ;;  %v713_v16 = vunpack.c.l.bf16 %v749_v3  ;;  %v714_v17 = vunpack.c.h.bf16 %v749_v3 }
  0x20   : > { %427 = vxpose.xlu0.b32.cont [3/16] %v379_v27, 128  ;;  %v282_v18 = vmul.f32 %v653_v63, %v812_v1  ;;  %v658_v19 = vunpack.c.h.bf16 %v735_v0  ;;  %v310_v20 = vmul.f32 %v709_v11, %v812_v1  ;;  %v311_v21 = vmul.f32 %v710_v12, %v812_v1  ;;  %v752_v12 = vld [vmem:[%s806_s17 + $0xb0] sm:$0xff]  }
  0x21   : > { %v678_v22 = vunpack.c.h.bf16 %v740_v60  ;;  %v681_v23 = vunpack.c.l.bf16 %v741_v13  ;;  %v312_v24 = vmul.f32 %v713_v16, %v812_v1  ;;  %v313_v25 = vmul.f32 %v714_v17, %v812_v1  ;;  %v745_v17 = vld [vmem:[%s806_s17 + $0x78] sm:$0xff]  }
  0x22   : > { %458 = vxpose.xlu1.b32.cont [2/16] %v394_v9, 128  ;;  %v395_v27 = vmax.f32 %v347_v7, 0.0  ;;  %v348_v28 = vadd.f32 %v818_v6, %v293_v8  ;;  %v294_v29 = vmul.f32 %v677_v10, %v812_v1  ;;  %v887_v30 = vadd.f32 %v818_v6, %v310_v20 }
  0x23   : > { %v283_v31 = vmul.f32 %v654_v14, %v812_v1  ;;  %v284_v32 = vmul.f32 %v657_v15, %v812_v1  ;;  %v895_v34 = vadd.f32 %v818_v6, %v312_v24  ;;  %v337_v36 = vadd.f32 %v818_v6, %v282_v18  ;;  %v753_v18 = vld [vmem:[%s806_s17 + $0xb8] sm:$0xff]  }
  0x24   : > { %428 = vxpose.xlu0.b32.cont [4/16] %v380_v33, 128  ;;  %v892_v33 = vadd.f32 %v818_v6, %v311_v21  ;;  %v682_v37 = vunpack.c.h.bf16 %v741_v13  ;;  %v900_v38 = vadd.f32 %v818_v6, %v313_v25  ;;  %v384_v40 = vmax.f32 %v868_v62, 0.0 }
  0x25   : > { %v295_v42 = vmul.f32 %v678_v22, %v812_v1  ;;  %v296_v43 = vmul.f32 %v681_v23, %v812_v1  ;;  %v285_v44 = vmul.f32 %v658_v19, %v812_v1  ;;  %v396_v45 = vmax.f32 %v348_v28, 0.0 }
  0x26   : > { %459 = vxpose.xlu1.b32.cont [3/16] %v395_v27, 128  ;;  %v349_v46 = vadd.f32 %v818_v6, %v294_v29  ;;  %v717_v47 = vunpack.c.l.bf16 %v750_v35  ;;  %v338_v48 = vadd.f32 %v818_v6, %v283_v31  ;;  %v911_v49 = vadd.f32 %v818_v6, %v284_v32 }
  0x27   : > { %v718_v51 = vunpack.c.h.bf16 %v750_v35  ;;  %v721_v52 = vunpack.c.l.bf16 %v751_v39  ;;  %v385_v53 = vmax.f32 %v337_v36, 0.0  ;;  %v297_v54 = vmul.f32 %v682_v37, %v812_v1 }
  0x28   : > { %429 = vxpose.xlu0.b32.cont [5/16] %v381_v41, 128  ;;  %v661_v41 = vunpack.c.l.bf16 %v882_v26  ;;  %v314_v56 = vmul.f32 %v717_v47, %v812_v1  ;;  %v722_v60 = vunpack.c.h.bf16 %v751_v39  ;;  %v350_v61 = vadd.f32 %v818_v6, %v295_v42 }
  0x29   : > { %v351_v62 = vadd.f32 %v818_v6, %v296_v43  ;;  %v315_v63 = vmul.f32 %v718_v51, %v812_v1  ;;  %v316_v0 = vmul.f32 %v721_v52, %v812_v1  ;;  %v397_v3 = vmax.f32 %v349_v46, 0.0  ;;  %v737_v43 = vld [vmem:[%s806_s17 + $0x38] sm:$0xff]  }
  0x2a   : > { %460 = vxpose.xlu1.b32.cont [4/16] %v396_v45, 128  ;;  %v317_v7 = vmul.f32 %v722_v60, %v812_v1  ;;  %v286_v8 = vmul.f32 %v661_v41, %v812_v1  ;;  %v662_v9 = vunpack.c.h.bf16 %v882_v26  ;;  %v386_v13 = vmax.f32 %v338_v48, 0.0  ;;  %v743_v48 = vld [vmem:[%s806_s17 + $0x68] sm:$0xff]  }
  0x2b   : > { %v931_v10 = vadd.f32 %v818_v6, %v315_v63  ;;  %v934_v11 = vadd.f32 %v818_v6, %v316_v0  ;;  %v340_v14 = vadd.f32 %v818_v6, %v285_v44  ;;  %v693_v16 = vunpack.c.l.bf16 %v744_v2 }
  0x2c   : > { %430 = vxpose.xlu0.b32.cont [6/16] %v382_v4, 128  ;;  %v685_v4 = vunpack.c.l.bf16 %v914_v50  ;;  %v939_v15 = vadd.f32 %v818_v6, %v317_v7  ;;  %v387_v19 = vmax.f32 %v911_v49, 0.0  ;;  %v398_v20 = vmax.f32 %v350_v61, 0.0 }
  0x2d   : > { %v399_v21 = vmax.f32 %v351_v62, 0.0  ;;  %v352_v22 = vadd.f32 %v818_v6, %v297_v54  ;;  %v302_v24 = vmul.f32 %v693_v16, %v812_v1  ;;  %v725_v25 = vunpack.c.l.bf16 %v752_v12 }
  0x2e   : > { %461 = vxpose.xlu1.b32.cont [5/16] %v397_v3, 128  ;;  %v298_v23 = vmul.f32 %v685_v4, %v812_v1  ;;  %v694_v26 = vunpack.c.h.bf16 %v744_v2  ;;  %v726_v27 = vunpack.c.h.bf16 %v752_v12  ;;  %v697_v28 = vunpack.c.l.bf16 %v745_v17 }
  0x2f   : > { %v729_v29 = vunpack.c.l.bf16 %v753_v18  ;;  %v698_v31 = vunpack.c.h.bf16 %v745_v17  ;;  %v948_v32 = vadd.f32 %v818_v6, %v302_v24  ;;  %v318_v35 = vmul.f32 %v725_v25, %v812_v1 }
  0x30   : > { %431 = vxpose.xlu0.b32.cont [7/16] %v383_v5, 128  ;;  %v925_v5 = vadd.f32 %v818_v6, %v314_v56  ;;  %v303_v36 = vmul.f32 %v694_v26, %v812_v1  ;;  %v730_v37 = vunpack.c.h.bf16 %v753_v18  ;;  %v319_v39 = vmul.f32 %v726_v27, %v812_v1 }
  0x31   : > { %v320_v41 = vmul.f32 %v729_v29, %v812_v1  ;;  %v305_v42 = vmul.f32 %v698_v31, %v812_v1  ;;  %v686_v44 = vunpack.c.h.bf16 %v914_v50  ;;  %v959_v45 = vadd.f32 %v818_v6, %v318_v35 }
  0x32   : > { %462 = vxpose.xlu1.b32.cont [6/16] %v398_v20, 128  ;;  %v358_v46 = vadd.f32 %v818_v6, %v303_v36  ;;  %v321_v47 = vmul.f32 %v730_v37, %v812_v1  ;;  %v965_v49 = vadd.f32 %v818_v6, %v319_v39  ;;  %v388_v54 = vmax.f32 %v340_v14, 0.0 }
  0x33   : > { %v969_v52 = vadd.f32 %v818_v6, %v320_v41  ;;  %v341_v56 = vadd.f32 %v818_v6, %v286_v8  ;;  %v287_v60 = vmul.f32 %v662_v9, %v812_v1  ;;  %v665_v61 = vunpack.c.l.bf16 %v737_v43 }
  0x34   : > { %432 = vxpose.xlu0.b32.cont [8/16] %v384_v40, 128  ;;  %v304_v40 = vmul.f32 %v697_v28, %v812_v1  ;;  %v973_v50 = vadd.f32 %v818_v6, %v321_v47  ;;  %v400_v62 = vmax.f32 %v352_v22, 0.0  ;;  %v353_v63 = vadd.f32 %v818_v6, %v298_v23 }
  0x35   : > { %v299_v0 = vmul.f32 %v686_v44, %v812_v1  ;;  %v689_v2 = vunpack.c.l.bf16 %v743_v48  ;;  %v389_v3 = vmax.f32 %v341_v56, 0.0  ;;  %v342_v4 = vadd.f32 %v818_v6, %v287_v60 }
  0x36   : > { %v359_v51 = vadd.f32 %v818_v6, %v304_v40  ;;  %463 = vxpose.xlu1.b32.cont [7/16] %v399_v21, 128  ;;  %v288_v7 = vmul.f32 %v665_v61, %v812_v1  ;;  %v666_v12 = vunpack.c.h.bf16 %v737_v43  ;;  %v401_v8 = vmax.f32 %v353_v63, 0.0 }
  0x37   : > { %v354_v9 = vadd.f32 %v818_v6, %v299_v0  ;;  %v690_v14 = vunpack.c.h.bf16 %v743_v48  ;;  %v390_v18 = vmax.f32 %v342_v4, 0.0  ;;  %v409_v28 = vmax.f32 %v853_v55, 0.0 }
  0x38   : > { %433 = vxpose.xlu0.b32.cont [9/16] %v385_v53, 128  ;;  %v360_v53 = vadd.f32 %v818_v6, %v305_v42  ;;  %v343_v16 = vadd.f32 %v818_v6, %v288_v7  ;;  %v289_v17 = vmul.f32 %v666_v12, %v812_v1  ;;  %v405_v29 = vmax.f32 %v948_v32, 0.0 }
  0x39   : > { %v301_v21 = vmul.f32 %v690_v14, %v812_v1  ;;  %v406_v31 = vmax.f32 %v358_v46, 0.0  ;;  %v411_v35 = vmax.f32 %v860_v58, 0.0  ;;  %v412_v36 = vmax.f32 %v863_v59, 0.0 }
  0x3a   : > { %464 = vxpose.xlu1.b32.cont [8/16] %v400_v62, 128  ;;  %v391_v22 = vmax.f32 %v343_v16, 0.0  ;;  %v344_v23 = vadd.f32 %v818_v6, %v289_v17  ;;  %v408_v37 = vmax.f32 %v360_v53, 0.0  ;;  %v413_v55 = vmax.f32 %v887_v30, 0.0 }
  0x3b   : > { %v356_v25 = vadd.f32 %v818_v6, %v301_v21  ;;  %v414_v32 = vmax.f32 %v892_v33, 0.0  ;;  %v416_v58 = vmax.f32 %v900_v38, 0.0  ;;  %v417_v39 = vmax.f32 %v925_v5, 0.0 }
  0x3c   : > { %434 = vxpose.xlu0.b32.cont [10/16] %v386_v13, 128  ;;  %v300_v13 = vmul.f32 %v689_v2, %v812_v1  ;;  %v392_v26 = vmax.f32 %v344_v23, 0.0  ;;  %v410_v1 = vmax.f32 %v857_v57, 0.0  ;;  %v415_v57 = vmax.f32 %v895_v34, 0.0 }
  0x3d   : > { %v404_v27 = vmax.f32 %v356_v25, 0.0  ;;  %v418_v59 = vmax.f32 %v931_v10, 0.0  ;;  %v419_v30 = vmax.f32 %v934_v11, 0.0  ;;  %v420_v40 = vmax.f32 %v939_v15, 0.0 }
  0x3e   : > { %465 = vxpose.xlu1.b32.cont [9/16] %v401_v8, 128  ;;  %v355_v20 = vadd.f32 %v818_v6, %v300_v13  ;;  %v407_v6 = vmax.f32 %v359_v51, 0.0  ;;  %v421_v33 = vmax.f32 %v959_v45, 0.0  ;;  %v422_v34 = vmax.f32 %v965_v49, 0.0 }
  0x3f   : > { %v423_v38 = vmax.f32 %v969_v52, 0.0  ;;  %v424_v5 = vmax.f32 %v973_v50, 0.0 }
  0x40   : > { %435 = vxpose.xlu0.b32.cont [11/16] %v387_v19, 128  ;;  %v402_v19 = vmax.f32 %v354_v9, 0.0  ;;  %v403_v24 = vmax.f32 %v355_v20, 0.0 }
  0x42   : > { %466 = vxpose.xlu1.b32.cont [10/16] %v402_v19, 128 }
  0x44   : > { %436 = vxpose.xlu0.b32.cont [12/16] %v388_v54, 128 }
  0x46   : > { %467 = vxpose.xlu1.b32.cont [11/16] %v403_v24, 128 }
  0x48   : > { %437 = vxpose.xlu0.b32.cont [13/16] %v389_v3, 128 }
  0x4a   : > { %468 = vxpose.xlu1.b32.cont [12/16] %v404_v27, 128 }
  0x4c   : > { %438 = vxpose.xlu0.b32.cont [14/16] %v390_v18, 128 }
  0x4e   : > { %469 = vxpose.xlu1.b32.cont [13/16] %v405_v29, 128 }
  0x50   : > { %439 = vxpose.xlu0.b32.cont [15/16] %v391_v22, 128 }
  0x52   : > { %470 = vxpose.xlu1.b32.cont [14/16] %v406_v31, 128 }
  0x54   : > { %440 = vxpose.xlu0.b32.end [16/16] %v392_v26, 128 }
  0x56   : > { %471 = vxpose.xlu1.b32.cont [15/16] %v407_v6, 128 }
  0x58   : > { %489 = vxpose.xlu0.b32.start [1/16] %v409_v28, 128 }
  0x5a   : > { %472 = vxpose.xlu1.b32.end [16/16] %v408_v37, 128 }
  0x5c   : > { %490 = vxpose.xlu0.b32.cont [2/16] %v410_v1, 128 }
  0x60   : > { %491 = vxpose.xlu0.b32.cont [3/16] %v411_v35, 128 }
  0x64   : > { %492 = vxpose.xlu0.b32.cont [4/16] %v412_v36, 128 }
  0x68   : > { %493 = vxpose.xlu0.b32.cont [5/16] %v413_v55, 128 }
  0x6c   : > { %494 = vxpose.xlu0.b32.cont [6/16] %v414_v32, 128 }
  0x70   : > { %495 = vxpose.xlu0.b32.cont [7/16] %v415_v57, 128 }
  0x74   : > { %496 = vxpose.xlu0.b32.cont [8/16] %v416_v58, 128 }
  0x78   : > { %497 = vxpose.xlu0.b32.cont [9/16] %v417_v39, 128 }
  0x7c   : > { %498 = vxpose.xlu0.b32.cont [10/16] %v418_v59, 128 }
  0x80   : > { %499 = vxpose.xlu0.b32.cont [11/16] %v419_v30, 128 }
  0x84   : > { %500 = vxpose.xlu0.b32.cont [12/16] %v420_v40, 128 }
  0x88   : > { %501 = vxpose.xlu0.b32.cont [13/16] %v421_v33, 128 }
  0x8c   : > { %502 = vxpose.xlu0.b32.cont [14/16] %v422_v34, 128 }
  0x90   : > { %503 = vxpose.xlu0.b32.cont [15/16] %v423_v38, 128 }
  0x94   : > { %504 = vxpose.xlu0.b32.end [16/16] %v424_v5, 128  ;;  %v441_v10 = vpop.trf.xlu0 }
  0x95   : > { %521 = vst [vmem:[%s1010_s25] sm:$0xff] %v441_v10 }
  0x98   : > { %v442_v11 = vpop.trf.xlu0 }
  0x99   : > { %524 = vst [vmem:[%s1010_s25 + $0x18] sm:$0xff] %v442_v11 }
  0x9a   : > { %v473_v43 = vpop.trf.xlu1 }
  0x9b   : > { %522 = vst [vmem:[%s1010_s25 + $0x8] sm:$0xff] %v473_v43 }
  0x9c   : > { %v443_v15 = vpop.trf.xlu0 }
  0x9d   : > { %527 = vst [vmem:[%s1010_s25 + $0x30] sm:$0xff] %v443_v15 }
  0x9e   : > { %v474_v45 = vpop.trf.xlu1 }
  0x9f   : > { %525 = vst [vmem:[%s1010_s25 + $0x20] sm:$0xff] %v474_v45 }
  0xa0   : > { %v444_v41 = vpop.trf.xlu0 }
  0xa1   : > { %530 = vst [vmem:[%s1010_s25 + $0x48] sm:$0xff] %v444_v41 }
  0xa2   : > { %v475_v47 = vpop.trf.xlu1 }
  0xa3   : > { %528 = vst [vmem:[%s1010_s25 + $0x38] sm:$0xff] %v475_v47 }
  0xa4   : > { %v445_v42 = vpop.trf.xlu0 }
  0xa5   : > { %533 = vst [vmem:[%s1010_s25 + $0x60] sm:$0xff] %v445_v42 }
  0xa6   : > { %v476_v49 = vpop.trf.xlu1 }
  0xa7   : > { %531 = vst [vmem:[%s1010_s25 + $0x50] sm:$0xff] %v476_v49 }
  0xa8   : > { %v446_v44 = vpop.trf.xlu0 }
  0xa9   : > { %536 = vst [vmem:[%s1010_s25 + $0x78] sm:$0xff] %v446_v44 }
  0xaa   : > { %v477_v52 = vpop.trf.xlu1 }
  0xab   : > { %534 = vst [vmem:[%s1010_s25 + $0x68] sm:$0xff] %v477_v52 }
  0xac   : > { %v447_v46 = vpop.trf.xlu0 }
  0xad   : > { %539 = vst [vmem:[%s1010_s25 + $0x90] sm:$0xff] %v447_v46 }
  0xae   : > { %v478_v50 = vpop.trf.xlu1 }
  0xaf   : > { %537 = vst [vmem:[%s1010_s25 + $0x80] sm:$0xff] %v478_v50 }
  0xb0   : > { %v448_v48 = vpop.trf.xlu0 }
  0xb1   : > { %542 = vst [vmem:[%s1010_s25 + $0xa8] sm:$0xff] %v448_v48 }
  0xb2   : > { %v479_v56 = vpop.trf.xlu1 }
  0xb3   : > { %540 = vst [vmem:[%s1010_s25 + $0x98] sm:$0xff] %v479_v56 }
  0xb4   : > { %v449_v51 = vpop.trf.xlu0 }
  0xb5   : > { %545 = vst [vmem:[%s1010_s25 + $0xc0] sm:$0xff] %v449_v51 }
  0xb6   : > { %v480_v61 = vpop.trf.xlu1 }
  0xb7   : > { %543 = vst [vmem:[%s1010_s25 + $0xb0] sm:$0xff] %v480_v61 }
  0xb8   : > { %v450_v53 = vpop.trf.xlu0 }
  0xb9   : > { %548 = vst [vmem:[%s1010_s25 + $0xd8] sm:$0xff] %v450_v53 }
  0xba   : > { %v481_v63 = vpop.trf.xlu1 }
  0xbb   : > { %546 = vst [vmem:[%s1010_s25 + $0xc8] sm:$0xff] %v481_v63 }
  0xbc   : > { %v451_v54 = vpop.trf.xlu0 }
  0xbd   : > { %551 = vst [vmem:[%s1010_s25 + $0xf0] sm:$0xff] %v451_v54 }
  0xbe   : > { %v482_v2 = vpop.trf.xlu1 }
  0xbf   : > { %549 = vst [vmem:[%s1010_s25 + $0xe0] sm:$0xff] %v482_v2 }
  0xc0   : > { %v452_v60 = vpop.trf.xlu0 }
  0xc1   : > { %554 = vst [vmem:[%s1010_s25 + $0x108] sm:$0xff] %v452_v60 }
  0xc2   : > { %v483_v4 = vpop.trf.xlu1 }
  0xc3   : > { %552 = vst [vmem:[%s1010_s25 + $0xf8] sm:$0xff] %v483_v4 }
  0xc4   : > { %v453_v62 = vpop.trf.xlu0 }
  0xc5   : > { %557 = vst [vmem:[%s1010_s25 + $0x120] sm:$0xff] %v453_v62 }
  0xc6   : > { %v484_v12 = vpop.trf.xlu1 }
  0xc7   : > { %555 = vst [vmem:[%s1010_s25 + $0x110] sm:$0xff] %v484_v12 }
  0xc8   : > { %v454_v0 = vpop.trf.xlu0 }
  0xc9   : > { %560 = vst [vmem:[%s1010_s25 + $0x138] sm:$0xff] %v454_v0 }
  0xca   : > { %v485_v9 = vpop.trf.xlu1 }
  0xcb   : > { %558 = vst [vmem:[%s1010_s25 + $0x128] sm:$0xff] %v485_v9 }
  0xcc   : > { %v455_v3 = vpop.trf.xlu0 }
  0xcd   : > { %563 = vst [vmem:[%s1010_s25 + $0x150] sm:$0xff] %v455_v3 }
  0xce   : > { %v486_v14 = vpop.trf.xlu1 }
  0xcf   : > { %561 = vst [vmem:[%s1010_s25 + $0x140] sm:$0xff] %v486_v14 }
  0xd0   : > { %v456_v7 = vpop.trf.xlu0 }
  0xd1   : > { %566 = vst [vmem:[%s1010_s25 + $0x168] sm:$0xff] %v456_v7 }
  0xd2   : > { %v487_v17 = vpop.trf.xlu1 }
  0xd3   : > { %564 = vst [vmem:[%s1010_s25 + $0x158] sm:$0xff] %v487_v17 }
  0xd4   : > { %v505_v8 = vpop.trf.xlu0 }
  0xd5   : > { %523 = vst [vmem:[%s1010_s25 + $0x10] sm:$0xff] %v505_v8 }
  0xd6   : > { %v488_v19 = vpop.trf.xlu1 }
  0xd7   : > { %567 = vst [vmem:[%s1010_s25 + $0x170] sm:$0xff] %v488_v19 }
  0xd8   : > { %v506_v13 = vpop.trf.xlu0 }
  0xd9   : > { %526 = vst [vmem:[%s1010_s25 + $0x28] sm:$0xff] %v506_v13 }
  0xdc   : > { %v507_v16 = vpop.trf.xlu0 }
  0xdd   : > { %529 = vst [vmem:[%s1010_s25 + $0x40] sm:$0xff] %v507_v16 }
  0xe0   : > { %v508_v18 = vpop.trf.xlu0 }
  0xe1   : > { %532 = vst [vmem:[%s1010_s25 + $0x58] sm:$0xff] %v508_v18 }
  0xe4   : > { %v509_v20 = vpop.trf.xlu0 }
  0xe5   : > { %535 = vst [vmem:[%s1010_s25 + $0x70] sm:$0xff] %v509_v20 }
  0xe8   : > { %v510_v21 = vpop.trf.xlu0 }
  0xe9   : > { %538 = vst [vmem:[%s1010_s25 + $0x88] sm:$0xff] %v510_v21 }
  0xec   : > { %v511_v22 = vpop.trf.xlu0 }
  0xed   : > { %541 = vst [vmem:[%s1010_s25 + $0xa0] sm:$0xff] %v511_v22 }
  0xf0   : > { %v512_v23 = vpop.trf.xlu0 }
  0xf1   : > { %544 = vst [vmem:[%s1010_s25 + $0xb8] sm:$0xff] %v512_v23 }
  0xf4   : > { %v513_v24 = vpop.trf.xlu0 }
  0xf5   : > { %547 = vst [vmem:[%s1010_s25 + $0xd0] sm:$0xff] %v513_v24 }
  0xf8   : > { %v514_v25 = vpop.trf.xlu0 }
  0xf9   : > { %550 = vst [vmem:[%s1010_s25 + $0xe8] sm:$0xff] %v514_v25 }
  0xfc   : > { %v515_v26 = vpop.trf.xlu0 }
  0xfd   : > { %553 = vst [vmem:[%s1010_s25 + $0x100] sm:$0xff] %v515_v26 }
 0x100   : > { %v516_v27 = vpop.trf.xlu0 }
 0x101   : > { %556 = vst [vmem:[%s1010_s25 + $0x118] sm:$0xff] %v516_v27 }
 0x104   : > { %v517_v28 = vpop.trf.xlu0 }
 0x105   : > { %559 = vst [vmem:[%s1010_s25 + $0x130] sm:$0xff] %v517_v28 }
 0x108   : > { %v518_v29 = vpop.trf.xlu0 }
 0x109   : > { %562 = vst [vmem:[%s1010_s25 + $0x148] sm:$0xff] %v518_v29 }
 0x10c   : > { %v519_v1 = vpop.trf.xlu0 }
 0x10d   : > { %565 = vst [vmem:[%s1010_s25 + $0x160] sm:$0xff] %v519_v1 }
 0x110   : > { %v520_v31 = vpop.trf.xlu0 }
 0x111   : > { %568 = vst [vmem:[%s1010_s25 + $0x178] sm:$0xff] %v520_v31 }
 0x112 PF: > { %s13_s12 = sadd.s32 1, %s770_s12  }
 0x113   : > { %p10_p4 = scmp.ge.s32.totalorder %s13_s12, 4  }
 0x115   :  { %12 = sbr.rel (!%p10_p4) target bundleno = 1 (0x1), region = 62 }

// kernel: basic_conv2d.2
= control target key start
LH: loop header
LB: loop body
LE: loop exit
PB: predicated region body
PF: predicated region fallthrough
CT: control target
= control target key end

     0   :  { %s6931_s18 = smov 0   ;;  %s8831_s0 = inlined_call_operand.vmem [shape: bf16[2,424,4], index: 0, kind: input, shape index: {}]   ;;  %s8832_s1 = inlined_call_operand.vmem [shape: bf16[9,4,128], index: 1, kind: input, shape index: {}]   ;;  %s8833_s2 = inlined_call_operand.vmem [shape: f32[384,1], index: 2, kind: input, shape index: {}]   ;;  %s8834_s3 = inlined_call_operand.vmem [shape: bf16[2,384,128], index: 3, kind: output, shape index: {0}]   ;;  %s8835_s4 = inlined_call_operand.vmem [shape: f32[2,8,128], index: 4, kind: output, shape index: {1}]   ;;  %s8836_s5 = inlined_call_operand.vmem [shape: f32[2,8,128], index: 5, kind: output, shape index: {2}]  }
   0x1 LB: > { %s5558_s19 = sadd.s32 4294967295, %s6898_s18   ;;  %p5562_p0 = scmp.ge.s32.totalorder %s6898_s18, 1  ;;  %s6898_s18 = sphi %s6931_s18, %s16_s18  }
   0x2   : > { %p192_p1 = scmp.lt.s32.totalorder %s6898_s18, 3 }
   0x4   : > { %p193_p2 = pnand %p5562_p0, %p192_p1 }
   0x6   : > { %196 = sbr.rel (%p193_p2) target bundleno = 677 (0x2a5), region = 32 }
   0xb   : > { %v5567_v0 = vld [vmem:[%s8832_s1 + $0x2] sm:$0x3]  ;;  %vm692_vm0 = vcmask 1041408   ;;  %p228_p3 = scmp.lt.s32.totalorder %s5558_s19, 1  ;;  %v295_v2 = vld [vmem:[%s8832_s1] sm:$0x3] }
   0xc   : > { %6790 = vmatprep.subr.msk.bf16.mxu1 %vm692_vm0, %v5567_v0  ;;  %6789 = vmatprep.subr.msk.bf16.mxu0 %vm692_vm0, %v5567_v0  ;;  %v694_v1 = vsel %vm692_vm0, %v5567_v0, 0  ;;  %v5641_v3 = vld [vmem:[%s8832_s1 + $0x4] sm:$0x3]  ;;  %vm422_vm1 = vsmask.f32 7424  ;;  %vm619_vm2 = vcmask 31744  }
   0xd   : > { %6788 = vmatpush3.bf16.msra.mxu1 %v694_v1  ;;  %6338 = vmatpush3.bf16.msra.mxu0 %v694_v1  ;;  %s9051_s19 = smov (!%p228_p3, %s5558_s19), 1  ;;  %v970_v8 = vsel %vm692_vm0, %v295_v2, 0  ;;  %v1326_v16 = vsel %vm692_vm0, %v5641_v3, 0  ;;  %v7004_v33 = vld [vmem:[%s8832_s1 + $0x8] sm:$0x3]  ;;  %vm1203_vm3 = vcmask 1046528  }
   0xe   : > { %6791 = vmatprep.subr.msk.bf16.mxu1 %vm692_vm0, %v295_v2  ;;  %6792 = vmatprep.subr.msk.bf16.mxu0 %vm692_vm0, %v5641_v3  ;;  %s6799_s26 = smul.u32 212, %s9051_s19  ;;  %v7024_v45 = vld [vmem:[%s8832_s1 + $0x6] sm:$0x3]  ;;  %vm2178_vm4 = vsmask.f32 6400  ;;  %vm2757_vm5 = vcmask 1045504  }
   0xf   : > { %vm4311_vm6 = vcmask 1044480   ;;  %vm3732_vm7 = vsmask.f32 5376  ;;  %s5565_s6 = sshll.u32 %s9051_s19, 3 }
  0x10   : > { %s6959_s29 = scalar_lea.vmem %s8831_s0, %s6799_s26  ;;  %s241_s9 = scalar_lea.vmem %s8835_s4, %s5565_s6 }
  0x11   : > { %v247_v4 = vld [vmem:[%s6959_s29] sm:$0xf]  ;;  %v6963_v5 = vld [vmem:[%s6959_s29 + $0x4] sm:$0xf]  ;;  %v6969_v7 = vld [vmem:[%s6959_s29 + $0x8] sm:$0xff]   ;;  %s245_s12 = scalar_lea.vmem %s8836_s5, %s5565_s6 }
  0x12   : > { %v6966_v6 = vcombine.low %v247_v4, %v6963_v5  ;;  %v431_v11 = vshll.u32 %v6969_v7, 16  ;;  %v435_v12 = vshrl.u32 %v6969_v7, 16  ;;  %v6977_v13 = vld [vmem:[%s6959_s29 + $0x60] sm:$0xff]   ;;  %v6980_v14 = vld [vmem:[%s6959_s29 + $0x68] sm:$0xff]   ;;  %v6983_v15 = vld [vmem:[%s6959_s29 + $0x10] sm:$0xff]  }
  0x13   : > { %v519_v19 = vshll.u32 %v6977_v13, 16  ;;  %v523_v20 = vshrl.u32 %v6977_v13, 16  ;;  %v527_v21 = vshll.u32 %v6980_v14, 16  ;;  %v531_v22 = vshrl.u32 %v6980_v14, 16  ;;  %v6992_v24 = vld [vmem:[%s6959_s29 + $0x70] sm:$0xff]   ;;  %v6997_v28 = vld [vmem:[%s6959_s29 + $0x18] sm:$0xff]  }
  0x14   : > { %v424_v9 = vshrl.u32 %v6966_v6, 16  ;;  %v426_v10 = vshll.u32 %v6966_v6, 16  ;;  %v433_v18 = vrot.slane %v431_v11, 1  ;;  %v439_v23 = vshll.u32 %v6983_v15, 16  ;;  %v7010_v37 = vld [vmem:[%s6959_s29 + $0x78] sm:$0xff]   ;;  %v7014_v39 = vld [vmem:[%s6959_s29 + $0x20] sm:$0xff]  }
  0x15   : > { %v6994_v27 = vrot.slane %v519_v19, 1  ;;  %v529_v29 = vrot.slane %v527_v21, 1  ;;  %v535_v31 = vshll.u32 %v6992_v24, 16  ;;  %v443_v32 = vshrl.u32 %v6983_v15, 16  ;;  %v7019_v44 = vld [vmem:[%s6959_s29 + $0x80] sm:$0xff]   ;;  %v7031_v50 = vld [vmem:[%s6959_s29 + $0x28] sm:$0xff]  }
  0x16   : > { %v428_v17 = vrot.slane %v426_v10, 1  ;;  %v437_v26 = vor.u32 %v435_v12, %v433_v18  ;;  %v441_v30 = vrot.slane %v439_v23, 1  ;;  %v447_v36 = vshll.u32 %v6997_v28, 16  ;;  %v7046_v62 = vld [vmem:[%s6959_s29 + $0x88] sm:$0xff]   ;;  %v7056_v10 = vld [vmem:[%s6959_s29 + $0x30] sm:$0xff]   ;;  %v7068_v23 = vld [vmem:[%s6959_s29 + $0x38] sm:$0xff]  }
  0x17   : > { %v525_v35 = vor.u32 %v523_v20, %v6994_v27  ;;  %v539_v38 = vshrl.u32 %v6992_v24, 16  ;;  %v533_v40 = vor.u32 %v531_v22, %v529_v29  ;;  %v537_v42 = vrot.slane %v535_v31, 1  ;;  %v7059_v11 = vld [vmem:[%s6959_s29 + $0x90] sm:$0xff]  }
  0x18   : > { %v429_v25 = vor.u32 %v428_v17, %v424_v9  ;;  %v442_v41 = vsel %vm422_vm1, %v437_v26, %v441_v30  ;;  %v445_v43 = vor.u32 %v443_v32, %v441_v30  ;;  %v449_v47 = vrot.slane %v447_v36, 1  ;;  %v7073_v26 = vld [vmem:[%s6959_s29 + $0x98] sm:$0xff]  }
  0x19   : > { %v530_v46 = vsel %vm422_vm1, %v525_v35, %v529_v29  ;;  %v543_v48 = vshll.u32 %v7010_v37, 16  ;;  %v451_v49 = vshrl.u32 %v6997_v28, 16  ;;  %v538_v51 = vsel %vm422_vm1, %v533_v40, %v537_v42  ;;  %v7085_v40 = vld [vmem:[%s6959_s29 + $0xa0] sm:$0xff]  }
  0x1a   : > { %v434_v34 = vsel %vm422_vm1, %v429_v25, %v433_v18  ;;  %6363 = vmatprep.mubr.msk.bf16.mxu1 %vm619_vm2, %v530_v46  ;;  %v541_v52 = vor.u32 %v539_v38, %v537_v42  ;;  %v455_v53 = vshll.u32 %v7014_v39, 16  ;;  %v547_v54 = vshrl.u32 %v7010_v37, 16  ;;  %v7082_v38 = vld [vmem:[%s6959_s29 + $0x40] sm:$0xff]  }
  0x1b   : > { %6339 = vmatprep.mubr.msk.bf16.mxu0 %vm619_vm2, %v434_v34  ;;  %6364 = vmatmul.mubr.msk.bf16.vlgmr.msra.gmra.mxu1 %vm619_vm2, %v538_v51  ;;  %v450_v55 = vsel %vm422_vm1, %v445_v43, %v449_v47  ;;  %v545_v56 = vrot.slane %v543_v48, 1  ;;  %v453_v57 = vor.u32 %v451_v49, %v449_v47  ;;  %v551_v58 = vshll.u32 %v7019_v44, 16  ;;  %v7089_v43 = vld [vmem:[%s6959_s29 + $0x48] sm:$0xff]  }
  0x1c   : > { %6340 = vmatmul.mubr.msk.bf16.vlgmr.msra.gmra.mxu0 %vm619_vm2, %v442_v41  ;;  %6388 = vmatpush3.bf16.msra.mxu1 %v970_v8  ;;  %v457_v59 = vrot.slane %v455_v53, 1  ;;  %v459_v60 = vshrl.u32 %v7014_v39, 16  ;;  %v463_v61 = vshll.u32 %v7031_v50, 16  ;;  %v555_v2 = vshrl.u32 %v7019_v44, 16  ;;  %v7093_v51 = vld [vmem:[%s6959_s29 + $0xa8] sm:$0xff]  }
  0x1d   : > { %6438 = vmatpush3.bf16.msra.mxu0 %v1326_v16  ;;  %6343 = vmatprep.mubr.msk.bf16.mxu0 %vm619_vm2, %v450_v55  ;;  %v546_v63 = vsel %vm422_vm1, %v541_v52, %v545_v56  ;;  %v549_v0 = vor.u32 %v547_v54, %v545_v56  ;;  %v553_v1 = vrot.slane %v551_v58, 1  ;;  %v559_v9 = vshll.u32 %v7046_v62, 16 }
  0x1e   : > { %6794 = vmatprep.subr.msk.bf16.mxu0 %vm692_vm0, %v7004_v33  ;;  %6793 = vmatprep.subr.msk.bf16.mxu1 %vm692_vm0, %v7024_v45  ;;  %v458_v3 = vsel %vm422_vm1, %v453_v57, %v457_v59  ;;  %v461_v4 = vor.u32 %v459_v60, %v457_v59  ;;  %v465_v8 = vrot.slane %v463_v61, 1  ;;  %v467_v17 = vshrl.u32 %v7031_v50, 16  ;;  %v7105_v61 = vld [vmem:[%s6959_s29 + $0x50] sm:$0xff]  }
  0x1f   : > { %6367 = vmatprep.mubr.msk.bf16.mxu1 %vm619_vm2, %v546_v63  ;;  %v554_v12 = vsel %vm422_vm1, %v549_v0, %v553_v1  ;;  %v557_v16 = vor.u32 %v555_v2, %v553_v1  ;;  %v563_v18 = vshrl.u32 %v7046_v62, 16  ;;  %v561_v20 = vrot.slane %v559_v9, 1  ;;  %v7113_v9 = vld [vmem:[%s6959_s29 + $0xb0] sm:$0xff]  }
  0x20   : > { %v466_v19 = vsel %vm422_vm1, %v461_v4, %v465_v8  ;;  %v471_v21 = vshll.u32 %v7056_v10, 16  ;;  %v567_v22 = vshll.u32 %v7059_v11, 16  ;;  %v475_v25 = vshrl.u32 %v7056_v10, 16 }
  0x21   : > { %v562_v29 = vsel %vm422_vm1, %v557_v16, %v561_v20  ;;  %v469_v30 = vor.u32 %v467_v17, %v465_v8  ;;  %v479_v34 = vshll.u32 %v7068_v23, 16  ;;  %v571_v35 = vshrl.u32 %v7059_v11, 16 }
  0x22   : > { %v473_v31 = vrot.slane %v471_v21, 1  ;;  %v569_v32 = vrot.slane %v567_v22, 1  ;;  %v575_v36 = vshll.u32 %v7073_v26, 16  ;;  %v565_v41 = vor.u32 %v563_v18, %v561_v20  ;;  %v7121_v20 = vld [vmem:[%s6959_s29 + $0xb8] sm:$0xff]  }
  0x23   : > { %6368 = vmatmul.mubr.msk.bf16.gmra.mxu1 %vm619_vm2, %v554_v12  ;;  %v481_v46 = vrot.slane %v479_v34, 1  ;;  %v487_v49 = vshll.u32 %v7082_v38, 16  ;;  %v483_v53 = vshrl.u32 %v7068_v23, 16  ;;  %v583_v54 = vshll.u32 %v7085_v40, 16  ;;  %v7116_v12 = vld [vmem:[%s6959_s29 + $0x58] sm:$0xff]  }
  0x24   : > { %6344 = vmatmul.mubr.msk.bf16.gmra.mxu0 %vm619_vm2, %v458_v3  ;;  %6371 = vmatprep.mubr.msk.bf16.mxu1 %vm619_vm2, %v562_v29  ;;  %v477_v42 = vor.u32 %v475_v25, %v473_v31  ;;  %v573_v47 = vor.u32 %v571_v35, %v569_v32  ;;  %v577_v48 = vrot.slane %v575_v36, 1  ;;  %v474_v52 = vsel %vm422_vm1, %v469_v30, %v473_v31 }
  0x25   : > { %6347 = vmatprep.mubr.msk.bf16.mxu0 %vm619_vm2, %v466_v19  ;;  %v491_v56 = vshrl.u32 %v7082_v38, 16  ;;  %v495_v57 = vshll.u32 %v7089_v43, 16  ;;  %v570_v58 = vsel %vm422_vm1, %v565_v41, %v569_v32  ;;  %v579_v59 = vshrl.u32 %v7073_v26, 16 }
  0x26   : > { %v482_v55 = vsel %vm422_vm1, %v477_v42, %v481_v46  ;;  %v587_v60 = vshrl.u32 %v7085_v40, 16  ;;  %v578_v63 = vsel %vm422_vm1, %v573_v47, %v577_v48  ;;  %v489_v0 = vrot.slane %v487_v49, 1 }
  0x27   : > { %v591_v1 = vshll.u32 %v7093_v51, 16  ;;  %v485_v2 = vor.u32 %v483_v53, %v481_v46  ;;  %v585_v3 = vrot.slane %v583_v54, 1  ;;  %v497_v8 = vrot.slane %v495_v57, 1  ;;  %v1197_v54 = vld [vmem:[%s6959_s29] sm:$0xe] }
  0x28   : > { %v493_v4 = vor.u32 %v491_v56, %v489_v0  ;;  %v581_v16 = vor.u32 %v579_v59, %v577_v48  ;;  %v503_v17 = vshll.u32 %v7105_v61, 16  ;;  %v499_v22 = vshrl.u32 %v7089_v43, 16 }
  0x29   : > { %v589_v18 = vor.u32 %v587_v60, %v585_v3  ;;  %v593_v19 = vrot.slane %v591_v1, 1  ;;  %v490_v21 = vsel %vm422_vm1, %v485_v2, %v489_v0  ;;  %v599_v29 = vshll.u32 %v7113_v9, 16 }
  0x2a   : > { %v498_v25 = vsel %vm422_vm1, %v493_v4, %v497_v8  ;;  %v507_v30 = vshrl.u32 %v7105_v61, 16  ;;  %v511_v31 = vshll.u32 %v7116_v12, 16  ;;  %v586_v32 = vsel %vm422_vm1, %v581_v16, %v585_v3 }
  0x2b   : > { %6372 = vmatmul.mubr.msk.bf16.gmra.mxu1 %vm619_vm2, %v570_v58  ;;  %v505_v34 = vrot.slane %v503_v17, 1  ;;  %v595_v35 = vshrl.u32 %v7093_v51, 16  ;;  %v594_v36 = vsel %vm422_vm1, %v589_v18, %v593_v19  ;;  %v603_v41 = vshrl.u32 %v7113_v9, 16 }
  0x2c   : > { %6348 = vmatmul.mubr.msk.bf16.gmra.mxu0 %vm619_vm2, %v474_v52  ;;  %6375 = vmatprep.mubr.msk.bf16.mxu1 %vm619_vm2, %v578_v63  ;;  %v607_v42 = vshll.u32 %v7121_v20, 16  ;;  %v501_v46 = vor.u32 %v499_v22, %v497_v8  ;;  %v601_v47 = vrot.slane %v599_v29, 1  ;;  %v513_v49 = vrot.slane %v511_v31, 1  ;;  %v7138_v52 = vld [vmem:[%s6959_s29 + $0xc0] ss:$0 sps:$4 sm:$0x11]  }
  0x2d   : > { %6351 = vmatprep.mubr.msk.bf16.mxu0 %vm619_vm2, %v482_v55  ;;  %v509_v48 = vor.u32 %v507_v30, %v505_v34  ;;  %v597_v53 = vor.u32 %v595_v35, %v593_v19  ;;  %v515_v58 = vshrl.u32 %v7116_v12, 16  ;;  %v5642_v60 = vcombine.low %v1197_v54, %v6963_v5  ;;  %v7173_v30 = vld [vmem:[%s8832_s1 + $0xc] sm:$0x3] }
  0x2e   : > { %v605_v55 = vor.u32 %v603_v41, %v601_v47  ;;  %v609_v56 = vrot.slane %v607_v42, 1  ;;  %v506_v57 = vsel %vm422_vm1, %v501_v46, %v505_v34  ;;  %v611_v0 = vshrl.u32 %v7121_v20, 16 }
  0x2f   : > { %v514_v59 = vsel %vm422_vm1, %v509_v48, %v513_v49  ;;  %v602_v63 = vsel %vm422_vm1, %v597_v53, %v601_v47  ;;  %v615_v1 = vshll.u32 %v7138_v52, 16  ;;  %v517_v3 = vor.u32 %v515_v58, %v513_v49 }
  0x30   : > { %v610_v2 = vsel %vm422_vm1, %v605_v55, %v609_v56  ;;  %v1204_v4 = vrot.slane %v5642_v60, 1  ;;  %v1205_v8 = vrot.slane %v6969_v7, 1  ;;  %v613_v5 = vor.u32 %v611_v0, %v609_v56  ;;  %v1601_v60 = vld [vmem:[%s6959_s29 + $0x8] sm:$0xe] }
  0x31   : > { %v617_v16 = vrot.slane %v615_v1, 1  ;;  %v522_v17 = vsel %vm422_vm1, %v517_v3, %v6994_v27  ;;  %v1209_v22 = vrot.slane %v6997_v28, 1  ;;  %v2476_v27 = vsel %vm692_vm0, %v7004_v33, 0  ;;  %v7183_v33 = vld [vmem:[%s8832_s1 + $0xa] sm:$0x3] }
  0x32   : > { %v1206_v18 = vsel %vm1203_vm3, %v1204_v4, %v1205_v8  ;;  %v1897_v31 = vsel %vm692_vm0, %v7024_v45, 0  ;;  %v1217_v35 = vrot.slane %v7068_v23, 1  ;;  %v1219_v41 = vrot.slane %v7082_v38, 1 }
  0x33   : > { %6376 = vmatmul.mubr.msk.bf16.gmra.mxu1 %vm619_vm2, %v586_v32  ;;  %v618_v19 = vsel %vm422_vm1, %v613_v5, %v617_v16  ;;  %v1213_v32 = vrot.slane %v7031_v50, 1  ;;  %v1223_v46 = vrot.slane %v7105_v61, 1  ;;  %v1227_v48 = vrot.slane %v6977_v13, 1 }
  0x34   : > { %6352 = vmatmul.mubr.msk.bf16.gmra.mxu0 %vm619_vm2, %v490_v21  ;;  %6379 = vmatprep.mubr.msk.bf16.mxu1 %vm619_vm2, %v594_v36  ;;  %v1207_v21 = vrot.slane %v6983_v15, 1  ;;  %v1231_v53 = vrot.slane %v6992_v24, 1  ;;  %v1235_v55 = vrot.slane %v7019_v44, 1 }
  0x35   : > { %6355 = vmatprep.mubr.msk.bf16.mxu0 %vm619_vm2, %v498_v25 }
  0x36   : > { %v1208_v25 = vsel %vm1203_vm3, %v1205_v8, %v1207_v21  ;;  %v1210_v29 = vsel %vm1203_vm3, %v1207_v21, %v1209_v22 }
  0x3b   : > { %6380 = vmatmul.mubr.msk.bf16.gmra.mxu1 %vm619_vm2, %v602_v63 }
  0x3c   : > { %6356 = vmatmul.mubr.msk.bf16.gmra.mxu0 %vm619_vm2, %v506_v57  ;;  %6383 = vmatprep.mubr.msk.bf16.mxu1 %vm619_vm2, %v610_v2  ;;  %v1239_v57 = vrot.slane %v7059_v11, 1  ;;  %v7282_v2 = vld [vmem:[%s6959_s29 + $0x10] sm:$0xff]  }
  0x3d   : > { %6359 = vmatprep.mubr.msk.bf16.mxu0 %vm619_vm2, %v514_v59  ;;  %v1243_v59 = vrot.slane %v7085_v40, 1  ;;  %v2188_v8 = vshrl.u32 %v7282_v2, 16  ;;  %v2191_v5 = vshll.u32 %v7282_v2, 16 }
  0x43   : > { %6384 = vmatmul.mubr.msk.bf16.gmra.mxu1 %vm619_vm2, %v618_v19 }
  0x44   : > { %6360 = vmatmul.mubr.msk.bf16.gmra.mxu0 %vm619_vm2, %v522_v17  ;;  %6389 = vmatprep.mubr.msk.bf16.mxu1 %vm619_vm2, %v6966_v6  ;;  %v1211_v6 = vrot.slane %v7014_v39, 1 }
  0x45   : > { %6439 = vmatprep.mubr.msk.bf16.mxu0 %vm619_vm2, %v1206_v18  ;;  %v7297_v18 = vld [vmem:[%s6959_s29 + $0x18] sm:$0xff]  }
  0x46   : > { %v1212_v45 = vsel %vm1203_vm3, %v1209_v22, %v1211_v6  ;;  %v1214_v34 = vsel %vm1203_vm3, %v1211_v6, %v1213_v32  ;;  %v2190_v22 = vrot.slane %v2188_v8, 1 }
  0x4b   : > { %6390 = vmatmul.mubr.msk.bf16.vlgmr.msra.gmra.mxu1 %vm619_vm2, %v6969_v7  ;;  %v1215_v7 = vrot.slane %v7056_v10, 1 }
  0x4c   : > { %6440 = vmatmul.mubr.msk.bf16.vlgmr.msra.gmra.mxu0 %vm619_vm2, %v1208_v25  ;;  %6488 = vmatpush3.bf16.msra.mxu1 %v1897_v31  ;;  %v2193_v25 = vrot.slane %v2191_v5, 2 }
  0x4d   : > { %6538 = vmatpush3.bf16.msra.mxu0 %v2476_v27  ;;  %6443 = vmatprep.mubr.msk.bf16.mxu0 %vm619_vm2, %v1210_v29  ;;  %v1218_v36 = vsel %vm1203_vm3, %v1215_v7, %v1217_v35  ;;  %v1251_v27 = vrot.slane %v7138_v52, 1  ;;  %v2200_v29 = vshll.u32 %v7297_v18, 16  ;;  %v1776_v52 = vrot.slane %v7282_v2, 1 }
  0x4e   : > { %6796 = vmatprep.subr.msk.bf16.mxu0 %vm692_vm0, %v7173_v30  ;;  %6393 = vmatprep.mubr.msk.bf16.mxu1 %vm619_vm2, %v6983_v15  ;;  %v1216_v15 = vsel %vm1203_vm3, %v1213_v32, %v1215_v7  ;;  %v2194_v6 = vor.u32 %v2193_v25, %v2190_v22 }
  0x4f   : > { %6795 = vmatprep.subr.msk.bf16.mxu1 %vm692_vm0, %v7183_v33 }
  0x53   : > { %6394 = vmatmul.mubr.msk.bf16.gmra.mxu1 %vm619_vm2, %v6997_v28  ;;  %v1221_v28 = vrot.slane %v7089_v43, 1 }
  0x54   : > { %6444 = vmatmul.mubr.msk.bf16.gmra.mxu0 %vm619_vm2, %v1212_v45  ;;  %6397 = vmatprep.mubr.msk.bf16.mxu1 %vm619_vm2, %v7014_v39  ;;  %v1220_v39 = vsel %vm1203_vm3, %v1217_v35, %v1219_v41 }
  0x55   : > { %6447 = vmatprep.mubr.msk.bf16.mxu0 %vm619_vm2, %v1214_v34  ;;  %v1222_v42 = vsel %vm1203_vm3, %v1219_v41, %v1221_v28 }
  0x5b   : > { %6398 = vmatmul.mubr.msk.bf16.gmra.mxu1 %vm619_vm2, %v7031_v50  ;;  %v1225_v50 = vrot.slane %v7116_v12, 1 }
  0x5c   : > { %6448 = vmatmul.mubr.msk.bf16.gmra.mxu0 %vm619_vm2, %v1216_v15  ;;  %6401 = vmatprep.mubr.msk.bf16.mxu1 %vm619_vm2, %v7056_v10  ;;  %v1224_v10 = vsel %vm1203_vm3, %v1221_v28, %v1223_v46  ;;  %v2202_v15 = vrot.slane %v2200_v29, 2 }
  0x5d   : > { %6451 = vmatprep.mubr.msk.bf16.mxu0 %vm619_vm2, %v1218_v36  ;;  %v1226_v47 = vsel %vm1203_vm3, %v1223_v46, %v1225_v50  ;;  %v7316_v36 = vld [vmem:[%s6959_s29 + $0x28] sm:$0xff]  }
  0x5e   : > { %v2215_v46 = vshrl.u32 %v7316_v36, 16 }
  0x63   : > { %6402 = vmatmul.mubr.msk.bf16.gmra.mxu1 %vm619_vm2, %v7068_v23  ;;  %v1229_v23 = vrot.slane %v6980_v14, 1 }
  0x64   : > { %6452 = vmatmul.mubr.msk.bf16.gmra.mxu0 %vm619_vm2, %v1220_v39  ;;  %6405 = vmatprep.mubr.msk.bf16.mxu1 %vm619_vm2, %v7082_v38  ;;  %v1228_v38 = vsel %vm1203_vm3, %v1225_v50, %v1227_v48  ;;  %v7320_v39 = vld [vmem:[%s6959_s29 + $0x30] sm:$0xff]   ;;  %v2218_v50 = vshll.u32 %v7316_v36, 16 }
  0x65   : > { %6455 = vmatprep.mubr.msk.bf16.mxu0 %vm619_vm2, %v1222_v42  ;;  %v1230_v49 = vsel %vm1203_vm3, %v1227_v48, %v1229_v23  ;;  %v2227_v48 = vshll.u32 %v7320_v39, 16 }
  0x6b   : > { %6406 = vmatmul.mubr.msk.bf16.gmra.mxu1 %vm619_vm2, %v7089_v43  ;;  %v1233_v43 = vrot.slane %v7010_v37, 1 }
  0x6c   : > { %6456 = vmatmul.mubr.msk.bf16.gmra.mxu0 %vm619_vm2, %v1224_v10  ;;  %6409 = vmatprep.mubr.msk.bf16.mxu1 %vm619_vm2, %v7105_v61  ;;  %v1232_v61 = vsel %vm1203_vm3, %v1229_v23, %v1231_v53  ;;  %v1778_v23 = vrot.slane %v7297_v18, 1 }
  0x6d   : > { %6459 = vmatprep.mubr.msk.bf16.mxu0 %vm619_vm2, %v1226_v47  ;;  %v1234_v54 = vsel %vm1203_vm3, %v1231_v53, %v1233_v43  ;;  %v2224_v47 = vshrl.u32 %v7320_v39, 16  ;;  %v2217_v53 = vrot.slane %v2215_v46, 1 }
  0x73   : > { %6410 = vmatmul.mubr.msk.bf16.gmra.mxu1 %vm619_vm2, %v7116_v12  ;;  %v1237_v12 = vrot.slane %v7046_v62, 1 }
  0x74   : > { %6460 = vmatmul.mubr.msk.bf16.gmra.mxu0 %vm619_vm2, %v1228_v38  ;;  %6413 = vmatprep.mubr.msk.bf16.mxu1 %vm619_vm2, %v6977_v13  ;;  %v1236_v13 = vsel %vm1203_vm3, %v1233_v43, %v1235_v55  ;;  %v2220_v43 = vrot.slane %v2218_v50, 2 }
  0x75   : > { %6463 = vmatprep.mubr.msk.bf16.mxu0 %vm619_vm2, %v1230_v49  ;;  %v1238_v56 = vsel %vm1203_vm3, %v1235_v55, %v1237_v12  ;;  %v2226_v55 = vrot.slane %v2224_v47, 1 }
  0x7b   : > { %6414 = vmatmul.mubr.msk.bf16.gmra.mxu1 %vm619_vm2, %v6980_v14  ;;  %v1241_v14 = vrot.slane %v7073_v26, 1 }
  0x7c   : > { %6464 = vmatmul.mubr.msk.bf16.gmra.mxu0 %vm619_vm2, %v1232_v61  ;;  %6417 = vmatprep.mubr.msk.bf16.mxu1 %vm619_vm2, %v6992_v24  ;;  %v1240_v24 = vsel %vm1203_vm3, %v1237_v12, %v1239_v57  ;;  %v7336_v61 = vld [vmem:[%s6959_s29 + $0x38] sm:$0xff]   ;;  %v2229_v12 = vrot.slane %v2227_v48, 2 }
  0x7d   : > { %6467 = vmatprep.mubr.msk.bf16.mxu0 %vm619_vm2, %v1234_v54  ;;  %v1242_v58 = vsel %vm1203_vm3, %v1239_v57, %v1241_v14  ;;  %v1244_v63 = vsel %vm1203_vm3, %v1241_v14, %v1243_v59  ;;  %v7348_v57 = vld [vmem:[%s8832_s1 + $0x10] sm:$0x3]  ;;  %v2880_v14 = vsel %vm692_vm0, %v7183_v33, 0 }
  0x83   : > { %6418 = vmatmul.mubr.msk.bf16.gmra.mxu1 %vm619_vm2, %v7010_v37  ;;  %v1245_v37 = vrot.slane %v7093_v51, 1 }
  0x84   : > { %6468 = vmatmul.mubr.msk.bf16.gmra.mxu0 %vm619_vm2, %v1236_v13  ;;  %6421 = vmatprep.mubr.msk.bf16.mxu1 %vm619_vm2, %v7019_v44  ;;  %v7276_v44 = vld [vmem:[%s6959_s29 + $0xc] sm:$0xf]  ;;  %v7342_v13 = vld [vmem:[%s6959_s29 + $0x40] sm:$0xff]  }
  0x85   : > { %6471 = vmatprep.mubr.msk.bf16.mxu0 %vm619_vm2, %v1238_v56  ;;  %v1246_v0 = vsel %vm1203_vm3, %v1243_v59, %v1245_v37  ;;  %v5668_v1 = vcombine.low %v1601_v60, %v7276_v44  ;;  %v1779_v56 = vsel %vm1203_vm3, %v1776_v52, %v1778_v23  ;;  %v2236_v59 = vshll.u32 %v7336_v61, 16 }
  0x86   : > { %v2230_v60 = vor.u32 %v2229_v12, %v2226_v55  ;;  %v2242_v33 = vshrl.u32 %v7342_v13, 16 }
  0x87   : > { %v2180_v3 = vshrl.u32 %v5668_v1, 16  ;;  %v2183_v4 = vshll.u32 %v5668_v1, 16  ;;  %v1775_v34 = vrot.slane %v5668_v1, 1  ;;  %v1784_v1 = vrot.slane %v7320_v39, 1 }
  0x88   : > { %v2244_v5 = vrot.slane %v2242_v33, 1 }
  0x89   : > { %v2182_v19 = vrot.slane %v2180_v3, 1  ;;  %v2185_v21 = vrot.slane %v2183_v4, 2  ;;  %v2238_v3 = vrot.slane %v2236_v59, 2  ;;  %v7374_v4 = vld [vmem:[%s6959_s29 + $0x48] sm:$0xff]  }
  0x8a   : > { %v2251_v25 = vshrl.u32 %v7374_v4, 16 }
  0x8b   : > { %6422 = vmatmul.mubr.msk.bf16.gmra.mxu1 %vm619_vm2, %v7046_v62  ;;  %v1247_v62 = vrot.slane %v7113_v9, 1  ;;  %v2186_v31 = vor.u32 %v2185_v21, %v2182_v19 }
  0x8c   : > { %6472 = vmatmul.mubr.msk.bf16.gmra.mxu0 %vm619_vm2, %v1240_v24  ;;  %6425 = vmatprep.mubr.msk.bf16.mxu1 %vm619_vm2, %v7059_v11  ;;  %v1249_v11 = vrot.slane %v7121_v20, 1  ;;  %v2221_v24 = vor.u32 %v2220_v43, %v2217_v53 }
  0x8d   : > { %6475 = vmatprep.mubr.msk.bf16.mxu0 %vm619_vm2, %v1242_v58  ;;  %v1248_v16 = vsel %vm1203_vm3, %v1245_v37, %v1247_v62  ;;  %v2233_v58 = vshrl.u32 %v7336_v61, 16  ;;  %v7360_v37 = vld [vmem:[%s8832_s1 + $0xe] sm:$0x3] }
  0x8e   : > { %v1250_v17 = vsel %vm1203_vm3, %v1247_v62, %v1249_v11  ;;  %v1252_v7 = vsel %vm1203_vm3, %v1249_v11, %v1251_v27  ;;  %v2231_v8 = vsel %vm2178_vm4, %v2221_v24, %v2230_v60  ;;  %v2254_v27 = vshll.u32 %v7374_v4, 16 }
  0x8f   : > { %v2235_v11 = vrot.slane %v2233_v58, 1 }
  0x91   : > { %v2239_v22 = vor.u32 %v2238_v3, %v2235_v11 }
  0x93   : > { %6426 = vmatmul.mubr.msk.bf16.gmra.mxu1 %vm619_vm2, %v7073_v26  ;;  %v7300_v26 = vld [vmem:[%s6959_s29 + $0x20] sm:$0xff]  }
  0x94   : > { %6476 = vmatmul.mubr.msk.bf16.gmra.mxu0 %vm619_vm2, %v1244_v63  ;;  %6429 = vmatprep.mubr.msk.bf16.mxu1 %vm619_vm2, %v7085_v40  ;;  %v2197_v40 = vshrl.u32 %v7297_v18, 16  ;;  %v2206_v32 = vshrl.u32 %v7300_v26, 16  ;;  %v2209_v45 = vshll.u32 %v7300_v26, 16  ;;  %v1780_v38 = vrot.slane %v7300_v26, 1 }
  0x95   : > { %6479 = vmatprep.mubr.msk.bf16.mxu0 %vm619_vm2, %v1246_v0  ;;  %v2245_v63 = vshll.u32 %v7342_v13, 16  ;;  %v1782_v0 = vrot.slane %v7316_v36, 1 }
  0x96   : > { %v2199_v35 = vrot.slane %v2197_v40, 1  ;;  %v2208_v41 = vrot.slane %v2206_v32, 1  ;;  %v2211_v28 = vrot.slane %v2209_v45, 2  ;;  %v1788_v32 = vrot.slane %v7342_v13, 1 }
  0x97   : > { %v1783_v19 = vsel %vm1203_vm3, %v1780_v38, %v1782_v0  ;;  %v1785_v21 = vsel %vm1203_vm3, %v1782_v0, %v1784_v1  ;;  %v2240_v45 = vsel %vm2178_vm4, %v2230_v60, %v2239_v22 }
  0x98   : > { %v2203_v42 = vor.u32 %v2202_v15, %v2199_v35  ;;  %v2212_v10 = vor.u32 %v2211_v28, %v2208_v41  ;;  %v7398_v41 = vld [vmem:[%s6959_s29 + $0x60] sm:$0xff]  }
  0x99   : > { %v2278_v47 = vshrl.u32 %v7398_v41, 16  ;;  %v2281_v48 = vshll.u32 %v7398_v41, 16 }
  0x9a   : > { %v2204_v49 = vsel %vm2178_vm4, %v2194_v6, %v2203_v42  ;;  %v2213_v54 = vsel %vm2178_vm4, %v2203_v42, %v2212_v10  ;;  %v2222_v62 = vsel %vm2178_vm4, %v2212_v10, %v2221_v24 }
  0x9b   : > { %6430 = vmatmul.mubr.msk.bf16.gmra.mxu1 %vm619_vm2, %v7093_v51  ;;  %v2195_v51 = vsel %vm2178_vm4, %v2186_v31, %v2194_v6  ;;  %v1786_v6 = vrot.slane %v7336_v61, 1  ;;  %v2280_v55 = vrot.slane %v2278_v47, 1  ;;  %v2283_v12 = vrot.slane %v2281_v48, 2 }
  0x9c   : > { %6480 = vmatmul.mubr.msk.bf16.gmra.mxu0 %vm619_vm2, %v1248_v16  ;;  %6433 = vmatprep.mubr.msk.bf16.mxu1 %vm619_vm2, %v7113_v9  ;;  %v1777_v9 = vsel %vm1203_vm3, %v1775_v34, %v1776_v52  ;;  %v2247_v16 = vrot.slane %v2245_v63, 2  ;;  %v2253_v34 = vrot.slane %v2251_v25, 1  ;;  %v2256_v52 = vrot.slane %v2254_v27, 2 }
  0x9d   : > { %6483 = vmatprep.mubr.msk.bf16.mxu0 %vm619_vm2, %v1250_v17  ;;  %v7378_v17 = vld [vmem:[%s6959_s29 + $0x50] sm:$0xff]   ;;  %v1787_v28 = vsel %vm1203_vm3, %v1784_v1, %v1786_v6  ;;  %v2284_v60 = vor.u32 %v2283_v12, %v2280_v55  ;;  %v1796_v1 = vrot.slane %v7398_v41, 1 }
  0x9e   : > { %v2248_v40 = vor.u32 %v2247_v16, %v2244_v5  ;;  %v2260_v29 = vshrl.u32 %v7378_v17, 16  ;;  %v2263_v31 = vshll.u32 %v7378_v17, 16  ;;  %v2257_v42 = vor.u32 %v2256_v52, %v2253_v34 }
  0xa0   : > { %v2249_v35 = vsel %vm2178_vm4, %v2239_v22, %v2248_v40  ;;  %v2262_v15 = vrot.slane %v2260_v29, 1 }
  0xa3   : > { %6434 = vmatmul.mubr.msk.bf16.gmra.mxu1 %vm619_vm2, %v7121_v20  ;;  %v3451_v20 = vsel %vm692_vm0, %v7173_v30, 0  ;;  %v1781_v30 = vsel %vm1203_vm3, %v1778_v23, %v1780_v38  ;;  %v1790_v23 = vrot.slane %v7374_v4, 1  ;;  %v1792_v38 = vrot.slane %v7378_v17, 1 }
  0xa4   : > { %6484 = vmatmul.mubr.msk.bf16.gmra.mxu0 %vm619_vm2, %v1252_v7  ;;  %6489 = vmatprep.mubr.msk.bf16.mxu1 %vm619_vm2, %v1777_v9  ;;  %v7394_v7 = vld [vmem:[%s6959_s29 + $0x58] sm:$0xff]   ;;  %v1789_v9 = vsel %vm1203_vm3, %v1786_v6, %v1788_v32 }
  0xa5   : > { %6539 = vmatprep.mubr.msk.bf16.mxu0 %vm619_vm2, %v2195_v51  ;;  %v2265_v51 = vrot.slane %v2263_v31, 2  ;;  %v2269_v46 = vshrl.u32 %v7394_v7, 16  ;;  %v2272_v50 = vshll.u32 %v7394_v7, 16  ;;  %v1794_v0 = vrot.slane %v7394_v7, 1 }
  0xa7   : > { %v2266_v10 = vor.u32 %v2265_v51, %v2262_v15  ;;  %v2271_v53 = vrot.slane %v2269_v46, 1  ;;  %v2274_v43 = vrot.slane %v2272_v50, 2  ;;  %v1795_v22 = vsel %vm1203_vm3, %v1792_v38, %v1794_v0  ;;  %v7454_v51 = vld [vmem:[%s6959_s29 + $0x88] sm:$0xff]   ;;  %v7458_v46 = vld [vmem:[%s6959_s29 + $0x90] sm:$0xff]  }
  0xa8   : > { %v1797_v25 = vsel %vm1203_vm3, %v1794_v0, %v1796_v1  ;;  %v2323_v48 = vshrl.u32 %v7454_v51, 16 }
  0xa9   : > { %v2275_v24 = vor.u32 %v2274_v43, %v2271_v53  ;;  %v2335_v53 = vshll.u32 %v7458_v46, 16 }
  0xaa   : > { %v2325_v12 = vrot.slane %v2323_v48, 1 }
  0xab   : > { %6490 = vmatmul.mubr.msk.bf16.vlgmr.msra.gmra.mxu1 %vm619_vm2, %v1779_v56  ;;  %v7418_v56 = vld [vmem:[%s6959_s29 + $0x70] sm:$0xff]   ;;  %v2285_v5 = vsel %vm2178_vm4, %v2275_v24, %v2284_v60 }
  0xac   : > { %6540 = vmatmul.mubr.msk.bf16.vlgmr.msra.gmra.mxu0 %vm619_vm2, %v2204_v49  ;;  %6588 = vmatpush3.bf16.msra.mxu1 %v2880_v14  ;;  %v2258_v49 = vsel %vm2178_vm4, %v2248_v40, %v2257_v42  ;;  %v1791_v14 = vsel %vm1203_vm3, %v1788_v32, %v1790_v23  ;;  %v2296_v33 = vshrl.u32 %v7418_v56, 16  ;;  %v2299_v63 = vshll.u32 %v7418_v56, 16 }
  0xad   : > { %6638 = vmatpush3.bf16.msra.mxu0 %v3451_v20  ;;  %6543 = vmatprep.mubr.msk.bf16.mxu0 %vm619_vm2, %v2213_v54  ;;  %v7414_v20 = vld [vmem:[%s6959_s29 + $0x68] sm:$0xff]   ;;  %v2267_v54 = vsel %vm2178_vm4, %v2257_v42, %v2266_v10  ;;  %v1800_v34 = vrot.slane %v7418_v56, 1 }
  0xae   : > { %6798 = vmatprep.subr.msk.bf16.mxu0 %vm692_vm0, %v7348_v57  ;;  %6493 = vmatprep.mubr.msk.bf16.mxu1 %vm619_vm2, %v1781_v30  ;;  %v1793_v30 = vsel %vm1203_vm3, %v1790_v23, %v1792_v38  ;;  %v2287_v58 = vshrl.u32 %v7414_v20, 16  ;;  %v2290_v59 = vshll.u32 %v7414_v20, 16  ;;  %v2298_v16 = vrot.slane %v2296_v33, 1 }
  0xaf   : > { %6797 = vmatprep.subr.msk.bf16.mxu1 %vm692_vm0, %v7360_v37  ;;  %v2326_v23 = vshll.u32 %v7454_v51, 16 }
  0xb0   : > { %v2289_v11 = vrot.slane %v2287_v58, 1  ;;  %v2292_v3 = vrot.slane %v2290_v59, 2  ;;  %v2337_v59 = vrot.slane %v2335_v53, 2  ;;  %v4712_v53 = vld [vmem:[%s8833_s2 + $0x18] sm:$0xff] }
  0xb2   : > { %v2293_v27 = vor.u32 %v2292_v3, %v2289_v11 }
  0xb3   : > { %6494 = vmatmul.mubr.msk.bf16.gmra.mxu1 %vm619_vm2, %v1783_v19  ;;  %v2301_v19 = vrot.slane %v2299_v63, 2 }
  0xb4   : > { %6544 = vmatmul.mubr.msk.bf16.gmra.mxu0 %vm619_vm2, %v2222_v62  ;;  %6497 = vmatprep.mubr.msk.bf16.mxu1 %vm619_vm2, %v1785_v21  ;;  %v2276_v62 = vsel %vm2178_vm4, %v2266_v10, %v2275_v24  ;;  %v7438_v21 = vld [vmem:[%s6959_s29 + $0x80] sm:$0xff]   ;;  %v2294_v52 = vsel %vm2178_vm4, %v2284_v60, %v2293_v27 }
  0xb5   : > { %6547 = vmatprep.mubr.msk.bf16.mxu0 %vm619_vm2, %v2231_v8  ;;  %v7434_v8 = vld [vmem:[%s6959_s29 + $0x78] sm:$0xff]   ;;  %v2302_v31 = vor.u32 %v2301_v19, %v2298_v16  ;;  %v2314_v6 = vshrl.u32 %v7438_v21, 16  ;;  %v2317_v32 = vshll.u32 %v7438_v21, 16  ;;  %v7478_v60 = vld [vmem:[%s6959_s29 + $0xa0] sm:$0xff]  }
  0xb6   : > { %v2305_v40 = vshrl.u32 %v7434_v8, 16  ;;  %v2308_v29 = vshll.u32 %v7434_v8, 16  ;;  %v1802_v43 = vrot.slane %v7434_v8, 1  ;;  %8868 = vst [vmem:[#allocation2_spill] sm:$0xff] %v7478_v60 }
  0xb7   : > { %v2319_v42 = vrot.slane %v2317_v32, 2  ;;  %v4711_v32 = vld [vmem:[%s8833_s2 + $0x10] sm:$0xff] }
  0xb8   : > { %v2310_v15 = vrot.slane %v2308_v29, 2  ;;  %v1803_v33 = vsel %vm1203_vm3, %v1800_v34, %v1802_v43 }
  0xbb   : > { %6498 = vmatmul.mubr.msk.bf16.gmra.mxu1 %vm619_vm2, %v1787_v28  ;;  %v2303_v28 = vsel %vm2178_vm4, %v2293_v27, %v2302_v31  ;;  %v2353_v27 = vshll.u32 %v7478_v60, 16 }
  0xbc   : > { %6548 = vmatmul.mubr.msk.bf16.gmra.mxu0 %vm619_vm2, %v2240_v45  ;;  %6501 = vmatprep.mubr.msk.bf16.mxu1 %vm619_vm2, %v1789_v9  ;;  %v1798_v45 = vrot.slane %v7414_v20, 1  ;;  %v2316_v9 = vrot.slane %v2314_v6, 1  ;;  %v1808_v6 = vrot.slane %v7458_v46, 1 }
  0xbd   : > { %6551 = vmatprep.mubr.msk.bf16.mxu0 %vm619_vm2, %v2249_v35  ;;  %v2307_v35 = vrot.slane %v2305_v40, 1  ;;  %v1806_v40 = vrot.slane %v7454_v51, 1 }
  0xbe   : > { %v1799_v50 = vsel %vm1203_vm3, %v1796_v1, %v1798_v45  ;;  %v1801_v10 = vsel %vm1203_vm3, %v1798_v45, %v1800_v34  ;;  %v2320_v38 = vor.u32 %v2319_v42, %v2316_v9  ;;  %v6900_v1 = vmov 0   ;;  %v4710_v45 = vld [vmem:[%s8833_s2 + $0x8] sm:$0xff] }
  0xbf   : > { %v2311_v47 = vor.u32 %v2310_v15, %v2307_v35  ;;  %6810 = vset.pattern.permute.xlu0 %v6900_v1  ;;  %6811 = vset.pattern.permute.xlu1 %v6900_v1  ;;  %v7513_v15 = vld [vmem:[%s6959_s29 + $0xa8] sm:$0xff]  }
  0xc0   : > { %8869 = vst [vmem:[#allocation3_spill] sm:$0xff] %v7513_v15  ;;  %4769 = vperm.xlu1 %6811, %v4711_v32   ;;  %v7561_v32 = vld [vmem:[%s6959_s29 + $0xb8] sm:$0xff]  }
  0xc1   : > { %v2312_v55 = vsel %vm2178_vm4, %v2302_v31, %v2311_v47  ;;  %v2321_v24 = vsel %vm2178_vm4, %v2311_v47, %v2320_v38  ;;  %v7521_v47 = vld [vmem:[%s6959_s29 + $0xb0] sm:$0xff]   ;;  %8872 = vst [vmem:[#allocation6_spill] sm:$0xff] %v7561_v32 }
  0xc2   : > { %8870 = vst [vmem:[#allocation4_spill] sm:$0xff] %v7521_v47 }
  0xc3   : > { %6502 = vmatmul.mubr.msk.bf16.gmra.mxu1 %vm619_vm2, %v1791_v14  ;;  %v2328_v14 = vrot.slane %v2326_v23, 2 }
  0xc4   : > { %6552 = vmatmul.mubr.msk.bf16.gmra.mxu0 %vm619_vm2, %v2258_v49  ;;  %6505 = vmatprep.mubr.msk.bf16.mxu1 %vm619_vm2, %v1793_v30  ;;  %v2332_v49 = vshrl.u32 %v7458_v46, 16  ;;  %v7474_v30 = vld [vmem:[%s6959_s29 + $0x98] sm:$0xff]  }
  0xc5   : > { %6555 = vmatprep.mubr.msk.bf16.mxu0 %vm619_vm2, %v2267_v54  ;;  %v1804_v54 = vrot.slane %v7438_v21, 1  ;;  %v2329_v11 = vor.u32 %v2328_v14, %v2325_v12  ;;  %v2341_v3 = vshrl.u32 %v7474_v30, 16  ;;  %v2362_v12 = vshll.u32 %v7513_v15, 16  ;;  %4774 = vperm.xlu1 %6811, %v4712_v53   ;;  %v4716_v53 = vld [vmem:[%s8833_s2 + $0x38] sm:$0xff] }
  0xc6   : > { %v2334_v58 = vrot.slane %v2332_v49, 1  ;;  %v1809_v49 = vsel %vm1203_vm3, %v1806_v40, %v1808_v6 }
  0xc7   : > { %v1805_v0 = vsel %vm1203_vm3, %v1802_v43, %v1804_v54  ;;  %v2330_v34 = vsel %vm2178_vm4, %v2320_v38, %v2329_v11  ;;  %v1807_v48 = vsel %vm1203_vm3, %v1804_v54, %v1806_v40  ;;  %v4713_v43 = vld [vmem:[%s8833_s2 + $0x20] sm:$0xff]  ;;  %v2359_v54 = vshrl.u32 %v7513_v15, 16 }
  0xc8   : > { %v2364_v40 = vrot.slane %v2362_v12, 2 }
  0xcb   : > { %6506 = vmatmul.mubr.msk.bf16.gmra.mxu1 %vm619_vm2, %v1795_v22  ;;  %v2338_v22 = vor.u32 %v2337_v59, %v2334_v58  ;;  %v2368_v59 = vshrl.u32 %v7521_v47, 16 }
  0xcc   : > { %6556 = vmatmul.mubr.msk.bf16.gmra.mxu0 %vm619_vm2, %v2276_v62  ;;  %6509 = vmatprep.mubr.msk.bf16.mxu1 %vm619_vm2, %v1797_v25  ;;  %v4709_v62 = vld [vmem:[%s8833_s2] sm:$0xff]  ;;  %v2350_v25 = vshrl.u32 %v7478_v60, 16 }
  0xcd   : > { %6559 = vmatprep.mubr.msk.bf16.mxu0 %vm619_vm2, %v2285_v5  ;;  %v2344_v5 = vshll.u32 %v7474_v30, 16  ;;  %4759 = vperm.xlu0 %6810, %v4709_v62   ;;  %v2339_v42 = vsel %vm2178_vm4, %v2329_v11, %v2338_v22  ;;  %v1812_v11 = vrot.slane %v7478_v60, 1  ;;  %v6862_v60 = vld [vmem:[%s6959_s29 + $0xc8] ss:$0 sps:$4 sm:$0x11]  }
  0xcf   : > { %v2346_v35 = vrot.slane %v2344_v5, 2  ;;  %v4715_v5 = vld [vmem:[%s8833_s2 + $0x30] sm:$0xff] }
  0xd1   : > { %4764 = vperm.xlu0 %6810, %v4710_v45  }
  0xd3   : > { %6510 = vmatmul.mubr.msk.bf16.gmra.mxu1 %vm619_vm2, %v1799_v50  ;;  %v2352_v50 = vrot.slane %v2350_v25, 1 }
  0xd4   : > { %6560 = vmatmul.mubr.msk.bf16.gmra.mxu0 %vm619_vm2, %v2294_v52  ;;  %6513 = vmatprep.mubr.msk.bf16.mxu1 %vm619_vm2, %v1801_v10  ;;  %v2343_v52 = vrot.slane %v2341_v3, 1  ;;  %v2355_v10 = vrot.slane %v2353_v27, 2  ;;  %v4714_v3 = vld [vmem:[%s8833_s2 + $0x28] sm:$0xff]  ;;  %v2361_v27 = vrot.slane %v2359_v54, 1  ;;  %v2380_v54 = vshll.u32 %v7561_v32, 16 }
  0xd5   : > { %6563 = vmatprep.mubr.msk.bf16.mxu0 %vm619_vm2, %v2303_v28  ;;  %4779 = vperm.xlu0 %6810, %v4713_v43   ;;  %v4717_v43 = vld [vmem:[%s8833_s2 + $0x40] sm:$0xff] }
  0xd6   : > { %v2356_v58 = vor.u32 %v2355_v10, %v2352_v50  ;;  %4784 = vperm.xlu1 %6811, %v4714_v3   ;;  %v7569_v50 = vld [vmem:[%s6959_s29 + $0xc0] sm:$0xff]  }
  0xd7   : > { %8874 = vst [vmem:[#allocation8_spill] sm:$0xff] %v7569_v50  ;;  %v2389_v3 = vshll.u32 %v7569_v50, 16 }
  0xd9   : > { %4789 = vperm.xlu0 %6810, %v4715_v5   ;;  %v1814_v5 = vrot.slane %v7513_v15, 1 }
  0xda   : > { %4794 = vperm.xlu1 %6811, %v4716_v53   ;;  %v7609_v53 = vld [vmem:[%s6959_s29 + $0xc8] ss:$0 sps:$4 sm:$0x33]  }
  0xdb   : > { %v7491_v16 = vpop.f32.mrf.mxu1  ;;  %6514 = vmatmul.mubr.msk.bf16.gmra.mxu1 %vm619_vm2, %v1803_v33  ;;  %v2371_v33 = vshll.u32 %v7521_v47, 16  ;;  %8878 = vst [vmem:[#allocation12_spill] sm:$0xff] %v7609_v53 }
  0xdc   : > { %v7481_v63 = vpop.f32.mrf.mxu0  ;;  %6564 = vmatmul.mubr.msk.bf16.gmra.mxu0 %vm619_vm2, %v2312_v55  ;;  %6517 = vmatprep.mubr.msk.bf16.mxu1 %vm619_vm2, %v1805_v0  ;;  %v2347_v55 = vor.u32 %v2346_v35, %v2343_v52  ;;  %v1810_v0 = vrot.slane %v7474_v30, 1  ;;  %v2370_v35 = vrot.slane %v2368_v59, 1 }
  0xdd   : > { %6567 = vmatprep.mubr.msk.bf16.mxu0 %vm619_vm2, %v2321_v24  ;;  %v7500_v29 = vpop.f32.mrf.mxu1  ;;  %4799 = vperm.xlu0 %6810, %v4717_v43  }
  0xde   : > { %v7494_v19 = vpop.f32.mrf.mxu0  ;;  %v2348_v25 = vsel %vm2178_vm4, %v2338_v22, %v2347_v55  ;;  %v2357_v52 = vsel %vm2178_vm4, %v2347_v55, %v2356_v58  ;;  %v1811_v10 = vsel %vm1203_vm3, %v1808_v6, %v1810_v0  ;;  %v2365_v55 = vor.u32 %v2364_v40, %v2361_v27 }
  0xdf   : > { %v7515_v28 = vpop.f32.mrf.mxu1  ;;  %v2377_v6 = vshrl.u32 %v7561_v32, 16  ;;  %v1816_v40 = vrot.slane %v7521_v47, 1 }
  0xe0   : > { %v7502_v31 = vpop.f32.mrf.mxu0 }
  0xe1   : > { %v7524_v23 = vpop.f32.mrf.mxu1 }
  0xe2   : > { %v7517_v9 = vpop.f32.mrf.mxu0 }
  0xe3   : > { %v7539_v14 = vpop.f32.mrf.mxu1  ;;  %6518 = vmatmul.mubr.msk.bf16.gmra.mxu1 %vm619_vm2, %v1807_v48 }
  0xe4   : > { %v7526_v38 = vpop.f32.mrf.mxu0  ;;  %6568 = vmatmul.mubr.msk.bf16.gmra.mxu0 %vm619_vm2, %v2330_v34  ;;  %6521 = vmatprep.mubr.msk.bf16.mxu1 %vm619_vm2, %v1809_v49  ;;  %v1813_v49 = vsel %vm1203_vm3, %v1810_v0, %v1812_v11  ;;  %v2386_v0 = vshrl.u32 %v7569_v50, 16 }
  0xe5   : > { %6571 = vmatprep.mubr.msk.bf16.mxu0 %vm619_vm2, %v2339_v42  ;;  %v7548_v1 = vpop.f32.mrf.mxu1  ;;  %v2373_v42 = vrot.slane %v2371_v33, 2 }
  0xe6   : > { %v7542_v24 = vpop.f32.mrf.mxu0  ;;  %8871 = vst [vmem:[#allocation5_spill] sm:$0xff] %v7548_v1  ;;  %v2388_v15 = vrot.slane %v2386_v0, 1  ;;  %v2398_v0 = vshll.u32 %v7609_v53, 16 }
  0xe7   : > { %v7563_v45 = vpop.f32.mrf.mxu1  ;;  %v2374_v33 = vor.u32 %v2373_v42, %v2370_v35  ;;  %v4719_v35 = vld [vmem:[%s8833_s2 + $0x50] sm:$0xff]  ;;  %v2366_v42 = vsel %vm2178_vm4, %v2356_v58, %v2365_v55  ;;  %v1817_v58 = vsel %vm1203_vm3, %v1814_v5, %v1816_v40 }
  0xe8   : > { %v7550_v62 = vpop.f32.mrf.mxu0  ;;  %8873 = vst [vmem:[#allocation7_spill] sm:$0xff] %v7563_v45  ;;  %4809 = vperm.xlu0 %6810, %v4719_v35   ;;  %v1818_v35 = vrot.slane %v7561_v32, 1 }
  0xe9   : > { %v7572_v48 = vpop.f32.mrf.mxu1  ;;  %v2375_v47 = vsel %vm2178_vm4, %v2365_v55, %v2374_v33  ;;  %v4721_v55 = vld [vmem:[%s8833_s2 + $0x60] sm:$0xff] }
  0xea   : > { %v7565_v34 = vpop.f32.mrf.mxu0  ;;  %8875 = vst [vmem:[#allocation9_spill] sm:$0xff] %v7572_v48  ;;  %v1815_v48 = vsel %vm1203_vm3, %v1812_v11, %v1814_v5 }
  0xeb   : > { %v7587_v12 = vpop.f32.mrf.mxu1  ;;  %6522 = vmatmul.mubr.msk.bf16.gmra.mxu1 %vm619_vm2, %v1811_v10  ;;  %v2379_v10 = vrot.slane %v2377_v6, 1  ;;  %v4720_v6 = vld [vmem:[%s8833_s2 + $0x58] sm:$0xff] }
  0xec   : > { %v7574_v22 = vpop.f32.mrf.mxu0  ;;  %6572 = vmatmul.mubr.msk.bf16.gmra.mxu0 %vm619_vm2, %v2348_v25  ;;  %8876 = vst [vmem:[#allocation10_spill] sm:$0xff] %v7587_v12  ;;  %6525 = vmatprep.mubr.msk.bf16.mxu1 %vm619_vm2, %v1813_v49  ;;  %v2382_v49 = vrot.slane %v2380_v54, 2  ;;  %v2391_v12 = vrot.slane %v2389_v3, 2  ;;  %v2395_v54 = vshrl.u32 %v7609_v53, 16  ;;  %v2751_v53 = vld [vmem:[%s6959_s29 + $0x8] sm:$0xc] }
  0xed   : > { %6575 = vmatprep.mubr.msk.bf16.mxu0 %vm619_vm2, %v2357_v52  ;;  %v7596_v25 = vpop.f32.mrf.mxu1  ;;  %v4718_v52 = vld [vmem:[%s8833_s2 + $0x48] sm:$0xff]  ;;  %4819 = vperm.xlu0 %6810, %v4721_v55   ;;  %v2400_v55 = vrot.slane %v2398_v0, 2 }
  0xee   : > { %v7590_v59 = vpop.f32.mrf.mxu0  ;;  %8877 = vst [vmem:[#allocation11_spill] sm:$0xff] %v7596_v25  ;;  %4804 = vperm.xlu1 %6811, %v4718_v52   ;;  %v2383_v11 = vor.u32 %v2382_v49, %v2379_v10  ;;  %v2392_v52 = vor.u32 %v2391_v12, %v2388_v15  ;;  %v4722_v15 = vld [vmem:[%s8833_s2 + $0x68] sm:$0xff]  ;;  %v4723_v12 = vld [vmem:[%s8833_s2 + $0x70] sm:$0xff] }
  0xef   : > { %v7611_v43 = vpop.f32.mrf.mxu1 }
  0xf0   : > { %v7598_v27 = vpop.f32.mrf.mxu0  ;;  %8879 = vst [vmem:[#allocation13_spill] sm:$0xff] %v7611_v43  ;;  %v1819_v43 = vsel %vm1203_vm3, %v1816_v40, %v1818_v35 }
  0xf1   : > { %v7617_v45 = vpop.f32.mrf.mxu1  ;;  %4829 = vperm.xlu0 %6810, %v4723_v12  }
  0xf2   : > { %v7613_v25 = vpop.f32.mrf.mxu0  ;;  %8880 = vst [vmem:[#allocation14_spill] sm:$0xff] %v7617_v45  ;;  %4814 = vperm.xlu1 %6811, %v4720_v6   ;;  %v2397_v6 = vrot.slane %v2395_v54, 1  ;;  %v7665_v45 = vld [vmem:[%s6959_s29 + $0x18] sm:$0xff]  }
  0xf3   : > { %v7632_v3 = vpop.f32.mrf.mxu1  ;;  %6526 = vmatmul.mubr.msk.bf16.gmra.mxu1 %vm619_vm2, %v1815_v48  ;;  %v1820_v48 = vrot.slane %v7569_v50, 1  ;;  %v2393_v50 = vsel %vm2178_vm4, %v2383_v11, %v2392_v52  ;;  %8885 = vst [vmem:[#allocation19_spill] sm:$0xff] %v7665_v45 }
  0xf4   : > { %v7619_v1 = vpop.f32.mrf.mxu0  ;;  %6576 = vmatmul.mubr.msk.bf16.gmra.mxu0 %vm619_vm2, %v2366_v42  ;;  %8881 = vst [vmem:[#allocation15_spill] sm:$0xff] %v7632_v3  ;;  %6529 = vmatprep.mubr.msk.bf16.mxu1 %vm619_vm2, %v1817_v58  ;;  %v7641_v42 = vld [vmem:[%s6959_s29 + $0x14] sm:$0xf]  ;;  %v2384_v58 = vsel %vm2178_vm4, %v2374_v33, %v2383_v11  ;;  %v4724_v11 = vld [vmem:[%s8833_s2 + $0x78] sm:$0xff]  ;;  %v2401_v40 = vor.u32 %v2400_v55, %v2397_v6 }
  0xf5   : > { %6579 = vmatprep.mubr.msk.bf16.mxu0 %vm619_vm2, %v2375_v47  ;;  %v3155_v47 = vld [vmem:[%s6959_s29 + $0x10] sm:$0xc]  ;;  %8882 = vst [vmem:[#allocation16_spill] sm:$0xff] %v7641_v42  ;;  %v7643_v10 = vpop.f32.mrf.mxu1  ;;  %v1821_v0 = vsel %vm1203_vm3, %v1818_v35, %v1820_v48 }
  0xf6   : > { %v7635_v5 = vpop.f32.mrf.mxu0  ;;  %8883 = vst [vmem:[#allocation17_spill] sm:$0xff] %v7643_v10  ;;  %4824 = vperm.xlu1 %6811, %v4722_v15   ;;  %v7662_v3 = vcombine.low %v3155_v47, %v7641_v42  ;;  %v5744_v15 = vcombine.low %v2751_v53, %v7276_v44  ;;  %v4725_v47 = vld [vmem:[%s8833_s2 + $0x80] sm:$0xff]  ;;  %v3330_v53 = vrot.slane %v7665_v45, 2 }
  0xf7   : > { %v7656_v10 = vpop.f32.mrf.mxu1  ;;  %4839 = vperm.xlu0 %6810, %v4725_v47   ;;  %v4727_v47 = vld [vmem:[%s8833_s2 + $0x90] sm:$0xff] }
  0xf8   : > { %v7645_v49 = vpop.f32.mrf.mxu0  ;;  %8884 = vst [vmem:[#allocation18_spill] sm:$0xff] %v7656_v10  ;;  %v3329_v44 = vrot.slane %v7662_v3, 2  ;;  %v2758_v55 = vrot.slane %v5744_v15, 2 }
  0xf9   : > { %v7669_v33 = vpop.f32.mrf.mxu1 }
  0xfa   : > { %v7658_v32 = vpop.f32.mrf.mxu0  ;;  %8886 = vst [vmem:[#allocation20_spill] sm:$0xff] %v7669_v33  ;;  %4834 = vperm.xlu1 %6811, %v4724_v11   ;;  %v2759_v11 = vrot.slane %v7282_v2, 2  ;;  %v3331_v15 = vsel %vm2757_vm5, %v3329_v44, %v3330_v53  ;;  %v7712_v2 = vld [vmem:[%s6959_s29 + $0x28] sm:$0xff]   ;;  %v4729_v44 = vld [vmem:[%s8833_s2 + $0xa0] sm:$0xff] }
  0xfb   : > { %v7683_v12 = vpop.f32.mrf.mxu1  ;;  %6530 = vmatmul.mubr.msk.bf16.gmra.mxu1 %vm619_vm2, %v1819_v43  ;;  %v4726_v43 = vld [vmem:[%s8833_s2 + $0x88] sm:$0xff]  ;;  %8891 = vst [vmem:[#allocation25_spill] sm:$0xff] %v7712_v2  ;;  %4849 = vperm.xlu0 %6810, %v4727_v47  }
  0xfc   : > { %v7671_v54 = vpop.f32.mrf.mxu0  ;;  %6580 = vmatmul.mubr.msk.bf16.gmra.mxu0 %vm619_vm2, %v2384_v58  ;;  %8887 = vst [vmem:[#allocation21_spill] sm:$0xff] %v7683_v12  ;;  %6533 = vmatprep.mubr.msk.bf16.mxu1 %vm619_vm2, %v1821_v0  ;;  %v1822_v58 = vrot.slane %v6862_v60, 1  ;;  %v2402_v12 = vsel %vm2178_vm4, %v2392_v52, %v2401_v40  ;;  %v7704_v0 = vld [vmem:[%s6959_s29 + $0x20] sm:$0xff]   ;;  %v2760_v52 = vsel %vm2757_vm5, %v2758_v55, %v2759_v11  ;;  %v4728_v40 = vld [vmem:[%s8833_s2 + $0x98] sm:$0xff]  ;;  %v3334_v55 = vrot.slane %v7712_v2, 2 }
  0xfd   : > { %6583 = vmatprep.mubr.msk.bf16.mxu0 %vm619_vm2, %v2393_v50  ;;  %v7691_v50 = vpop.f32.mrf.mxu1  ;;  %8889 = vst [vmem:[#allocation23_spill] sm:$0xff] %v7704_v0 }
  0xfe   : > { %v7686_v35 = vpop.f32.mrf.mxu0  ;;  %8888 = vst [vmem:[#allocation22_spill] sm:$0xff] %v7691_v50  ;;  %4844 = vperm.xlu1 %6811, %v4726_v43   ;;  %v1823_v33 = vsel %vm1203_vm3, %v1820_v48, %v1822_v58  ;;  %v3332_v48 = vrot.slane %v7704_v0, 2  ;;  %v2761_v43 = vrot.slane %v7297_v18, 2 }
  0xff   : > { %v7706_v60 = vpop.f32.mrf.mxu1  ;;  %4859 = vperm.xlu0 %6810, %v4729_v44  }
 0x100   : > { %v7693_v6 = vpop.f32.mrf.mxu0  ;;  %8890 = vst [vmem:[#allocation24_spill] sm:$0xff] %v7706_v60  ;;  %v3333_v44 = vsel %vm2757_vm5, %v3330_v53, %v3332_v48  ;;  %v7760_v60 = vld [vmem:[%s6959_s29 + $0x38] sm:$0xff]   ;;  %v2762_v2 = vsel %vm2757_vm5, %v2759_v11, %v2761_v43  ;;  %v4733_v11 = vld [vmem:[%s8833_s2 + $0xc0] sm:$0xff] }
 0x101   : > { %v7715_v10 = vpop.f32.mrf.mxu1  ;;  %8897 = vst [vmem:[#allocation31_spill] sm:$0xff] %v7760_v60 }
 0x102   : > { %v7708_v50 = vpop.f32.mrf.mxu0  ;;  %8892 = vst [vmem:[#allocation26_spill] sm:$0xff] %v7715_v10  ;;  %4854 = vperm.xlu1 %6811, %v4728_v40   ;;  %v2763_v40 = vrot.slane %v7300_v26, 2  ;;  %v7750_v10 = vld [vmem:[%s6959_s29 + $0x30] sm:$0xff]   ;;  %v4434_v26 = vsel %vm692_vm0, %v7348_v57, 0  ;;  %v4732_v57 = vld [vmem:[%s8833_s2 + $0xb8] sm:$0xff] }
 0x103   : > { %v7729_v58 = vpop.f32.mrf.mxu1  ;;  %6534 = vmatmul.mubr.msk.bf16.gmra.mxu1 %vm619_vm2, %v1823_v33  ;;  %v4730_v33 = vld [vmem:[%s8833_s2 + $0xa8] sm:$0xff]  ;;  %8895 = vst [vmem:[#allocation29_spill] sm:$0xff] %v7750_v10 }
 0x104   : > { %v7717_v42 = vpop.f32.mrf.mxu0  ;;  %6584 = vmatmul.mubr.msk.bf16.gmra.mxu0 %vm619_vm2, %v2402_v12  ;;  %8893 = vst [vmem:[#allocation27_spill] sm:$0xff] %v7729_v58  ;;  %6589 = vmatprep.mubr.msk.bf16.mxu1 %vm619_vm2, %v2760_v52  ;;  %v4731_v58 = vld [vmem:[%s8833_s2 + $0xb0] sm:$0xff] }
 0x105   : > { %6639 = vmatprep.mubr.msk.bf16.mxu0 %vm619_vm2, %v3331_v15  ;;  %v7737_v47 = vpop.f32.mrf.mxu1  ;;  %4869 = vperm.xlu0 %6810, %v4731_v58  }
 0x106   : > { %v7732_v12 = vpop.f32.mrf.mxu0  ;;  %8894 = vst [vmem:[#allocation28_spill] sm:$0xff] %v7737_v47  ;;  %4864 = vperm.xlu1 %6811, %v4730_v33   ;;  %v3335_v47 = vsel %vm2757_vm5, %v3332_v48, %v3334_v55  ;;  %v4030_v33 = vsel %vm692_vm0, %v7360_v37, 0  ;;  %v3336_v48 = vrot.slane %v7750_v10, 2  ;;  %v2767_v10 = vrot.slane %v7320_v39, 2 }
 0x107   : > { %v7752_v18 = vpop.f32.mrf.mxu1 }
 0x108   : > { %v7739_v15 = vpop.f32.mrf.mxu0  ;;  %8896 = vst [vmem:[#allocation30_spill] sm:$0xff] %v7752_v18  ;;  %v2764_v18 = vsel %vm2757_vm5, %v2761_v43, %v2763_v40  ;;  %v3338_v43 = vrot.slane %v7760_v60, 2 }
 0x109   : > { %v7763_v0 = vpop.f32.mrf.mxu1  ;;  %4879 = vperm.xlu0 %6810, %v4733_v11   ;;  %v7798_v11 = vld [vmem:[%s6959_s29 + $0x48] sm:$0xff]  }
 0x10a   : > { %v7754_v52 = vpop.f32.mrf.mxu0  ;;  %8898 = vst [vmem:[#allocation32_spill] sm:$0xff] %v7763_v0  ;;  %4874 = vperm.xlu1 %6811, %v4732_v57   ;;  %v3339_v39 = vsel %vm2757_vm5, %v3336_v48, %v3338_v43 }
 0x10b   : > { %v6391_v58 = vpop.f32.mrf.mxu1  ;;  %6590 = vmatmul.mubr.msk.bf16.vlgmr.msra.gmra.mxu1 %vm619_vm2, %v2762_v2  ;;  %v4734_v2 = vld [vmem:[%s8833_s2 + $0xc8] sm:$0xff] }
 0x10c   : > { %v6441_v53 = vpop.f32.mrf.mxu0  ;;  %6640 = vmatmul.mubr.msk.bf16.vlgmr.msra.gmra.mxu0 %vm619_vm2, %v3333_v44  ;;  %v1015_v44 = vadd.f32 %v6391_v58, %v7481_v63  ;;  %6688 = vmatpush3.bf16.msra.mxu1 %v4030_v33  ;;  %v3337_v63 = vsel %vm2757_vm5, %v3334_v55, %v3336_v48  ;;  %v7791_v33 = vld [vmem:[%s6959_s29 + $0x40] sm:$0xff]   ;;  %v4736_v48 = vld [vmem:[%s8833_s2 + $0xd8] sm:$0xff] }
 0x10d   : > { %6738 = vmatpush3.bf16.msra.mxu0 %v4434_v26  ;;  %6643 = vmatprep.mubr.msk.bf16.mxu0 %vm619_vm2, %v3335_v47  ;;  %v2765_v47 = vrot.slane %v7316_v36, 2  ;;  %v1006_v26 = vpop.f32.mrf.mxu1  ;;  %v4735_v36 = vld [vmem:[%s8833_s2 + $0xd0] sm:$0xff] }
 0x10e   : > { %v1362_v37 = vpop.f32.mrf.mxu0  ;;  %6593 = vmatprep.mubr.msk.bf16.mxu1 %vm619_vm2, %v2764_v18  ;;  %v7786_v45 = vadd.f32 %v6441_v53, %v1015_v44  ;;  %v1007_v57 = vadd.f32 %v1006_v26, %v7494_v19  ;;  %4884 = vperm.xlu1 %6811, %v4734_v2  }
 0x10f   : > { %v6392_v18 = vpop.f32.mrf.mxu1  ;;  %v2766_v19 = vsel %vm2757_vm5, %v2763_v40, %v2765_v47  ;;  %v2768_v26 = vsel %vm2757_vm5, %v2765_v47, %v2767_v10  ;;  %4889 = vperm.xlu0 %6810, %v4735_v36   ;;  %v4737_v40 = vld [vmem:[%s8833_s2 + $0xe0] sm:$0xff] }
 0x110   : > { %v6442_v0 = vpop.f32.mrf.mxu0  ;;  %8899 = vst [vmem:[#allocation33_spill] sm:$0xff] %v7786_v45  ;;  %v7800_v60 = vadd.f32 %v1362_v37, %v1007_v57  ;;  %v1018_v53 = vadd.f32 %v6392_v18, %v7502_v31  ;;  %v3340_v31 = vrot.slane %v7791_v33, 2  ;;  %v3342_v57 = vrot.slane %v7798_v11, 2 }
 0x111   : > { %v1009_v55 = vpop.f32.mrf.mxu1 }
 0x112   : > { %v1365_v58 = vpop.f32.mrf.mxu0  ;;  %v7809_v45 = vadd.f32 %v6442_v0, %v1018_v53  ;;  %v1010_v37 = vadd.f32 %v1009_v55, %v7517_v9  ;;  %4894 = vperm.xlu1 %6811, %v4736_v48   ;;  %v4738_v53 = vld [vmem:[%s8833_s2 + $0xe8] sm:$0xff]  ;;  %v7833_v55 = vld [vmem:[%s6959_s29 + $0x50] sm:$0xff]  }
 0x113   : > { %v6395_v2 = vpop.f32.mrf.mxu1  ;;  %6594 = vmatmul.mubr.msk.bf16.gmra.mxu1 %vm619_vm2, %v2766_v19  ;;  %4899 = vperm.xlu0 %6810, %v4737_v40  }
 0x114   : > { %v6445_v44 = vpop.f32.mrf.mxu0  ;;  %6644 = vmatmul.mubr.msk.bf16.gmra.mxu0 %vm619_vm2, %v3337_v63  ;;  %v7819_v0 = vadd.f32 %v1365_v58, %v1010_v37  ;;  %v1031_v9 = vadd.f32 %v6395_v2, %v7526_v38  ;;  %6597 = vmatprep.mubr.msk.bf16.mxu1 %vm619_vm2, %v2768_v26  ;;  %v2769_v63 = vrot.slane %v7336_v61, 2  ;;  %v3341_v38 = vsel %vm2757_vm5, %v3338_v43, %v3340_v31  ;;  %v4739_v61 = vld [vmem:[%s8833_s2 + $0xf0] sm:$0xff]  ;;  %v7840_v37 = vld [vmem:[%s6959_s29 + $0x58] sm:$0xff]  }
 0x115   : > { %6647 = vmatprep.mubr.msk.bf16.mxu0 %vm619_vm2, %v3339_v39  ;;  %v1022_v36 = vpop.f32.mrf.mxu1  ;;  %v2771_v39 = vrot.slane %v7342_v13, 2  ;;  %v3343_v13 = vsel %vm2757_vm5, %v3340_v31, %v3342_v57  ;;  %v4740_v31 = vld [vmem:[%s8833_s2 + $0xf8] sm:$0xff] }
 0x116   : > { %v1378_v47 = vpop.f32.mrf.mxu0  ;;  %v7828_v19 = vadd.f32 %v6445_v44, %v1031_v9  ;;  %v1023_v58 = vadd.f32 %v1022_v36, %v7542_v24  ;;  %4904 = vperm.xlu1 %6811, %v4738_v53   ;;  %v2770_v24 = vsel %vm2757_vm5, %v2767_v10, %v2769_v63  ;;  %v4741_v10 = vld [vmem:[%s8833_s2 + $0x100] sm:$0xff] }
 0x117   : > { %v6396_v26 = vpop.f32.mrf.mxu1  ;;  %v2772_v9 = vsel %vm2757_vm5, %v2769_v63, %v2771_v39  ;;  %4909 = vperm.xlu0 %6810, %v4739_v61  }
 0x118   : > { %v6446_v18 = vpop.f32.mrf.mxu0  ;;  %v7842_v40 = vadd.f32 %v1378_v47, %v1023_v58  ;;  %v1034_v44 = vadd.f32 %v6396_v26, %v7550_v62  ;;  %v3344_v62 = vrot.slane %v7833_v55, 2  ;;  %v3346_v58 = vrot.slane %v7840_v37, 2 }
 0x119   : > { %v1025_v43 = vpop.f32.mrf.mxu1 }
 0x11a   : > { %v1381_v48 = vpop.f32.mrf.mxu0  ;;  %v7851_v36 = vadd.f32 %v6446_v18, %v1034_v44  ;;  %v1026_v47 = vadd.f32 %v1025_v43, %v7565_v34  ;;  %4914 = vperm.xlu1 %6811, %v4740_v31   ;;  %v4742_v44 = vld [vmem:[%s8833_s2 + $0x108] sm:$0xff]  ;;  %v7875_v43 = vld [vmem:[%s6959_s29 + $0x60] sm:$0xff]  }
 0x11b   : > { %v6399_v53 = vpop.f32.mrf.mxu1  ;;  %6598 = vmatmul.mubr.msk.bf16.gmra.mxu1 %vm619_vm2, %v2770_v24  ;;  %4919 = vperm.xlu0 %6810, %v4741_v10  }
 0x11c   : > { %v6449_v2 = vpop.f32.mrf.mxu0  ;;  %6648 = vmatmul.mubr.msk.bf16.gmra.mxu0 %vm619_vm2, %v3341_v38  ;;  %v7861_v18 = vadd.f32 %v1381_v48, %v1026_v47  ;;  %v1047_v34 = vadd.f32 %v6399_v53, %v7574_v22  ;;  %6601 = vmatprep.mubr.msk.bf16.mxu1 %vm619_vm2, %v2772_v9  ;;  %v2773_v38 = vrot.slane %v7374_v4, 2  ;;  %v3345_v22 = vsel %vm2757_vm5, %v3342_v57, %v3344_v62  ;;  %v4743_v4 = vld [vmem:[%s8833_s2 + $0x110] sm:$0xff]  ;;  %v7882_v47 = vld [vmem:[%s6959_s29 + $0x68] sm:$0xff]  }
 0x11d   : > { %6651 = vmatprep.mubr.msk.bf16.mxu0 %vm619_vm2, %v3343_v13  ;;  %v1038_v61 = vpop.f32.mrf.mxu1  ;;  %v2775_v13 = vrot.slane %v7378_v17, 2  ;;  %v3347_v17 = vsel %vm2757_vm5, %v3344_v62, %v3346_v58  ;;  %v4744_v62 = vld [vmem:[%s8833_s2 + $0x118] sm:$0xff] }
 0x11e   : > { %v1394_v63 = vpop.f32.mrf.mxu0  ;;  %v7870_v24 = vadd.f32 %v6449_v2, %v1047_v34  ;;  %v1039_v48 = vadd.f32 %v1038_v61, %v7590_v59  ;;  %4924 = vperm.xlu1 %6811, %v4742_v44   ;;  %v2774_v59 = vsel %vm2757_vm5, %v2771_v39, %v2773_v38  ;;  %v4745_v39 = vld [vmem:[%s8833_s2 + $0x120] sm:$0xff] }
 0x11f   : > { %v6400_v9 = vpop.f32.mrf.mxu1  ;;  %v2776_v34 = vsel %vm2757_vm5, %v2773_v38, %v2775_v13  ;;  %4929 = vperm.xlu0 %6810, %v4743_v4  }
 0x120   : > { %v6450_v26 = vpop.f32.mrf.mxu0  ;;  %v7884_v10 = vadd.f32 %v1394_v63, %v1039_v48  ;;  %v1050_v2 = vadd.f32 %v6400_v9, %v7598_v27  ;;  %v3348_v27 = vrot.slane %v7875_v43, 2  ;;  %v3350_v48 = vrot.slane %v7882_v47, 2 }
 0x121   : > { %v1041_v57 = vpop.f32.mrf.mxu1 }
 0x122   : > { %v1397_v31 = vpop.f32.mrf.mxu0  ;;  %v7893_v61 = vadd.f32 %v6450_v26, %v1050_v2  ;;  %v1042_v63 = vadd.f32 %v1041_v57, %v7613_v25  ;;  %4934 = vperm.xlu1 %6811, %v4744_v62   ;;  %v4746_v2 = vld [vmem:[%s8833_s2 + $0x128] sm:$0xff]  ;;  %v7917_v57 = vld [vmem:[%s6959_s29 + $0x70] sm:$0xff]  }
 0x123   : > { %v6403_v44 = vpop.f32.mrf.mxu1  ;;  %6602 = vmatmul.mubr.msk.bf16.gmra.mxu1 %vm619_vm2, %v2774_v59  ;;  %4939 = vperm.xlu0 %6810, %v4745_v39  }
 0x124   : > { %v6453_v53 = vpop.f32.mrf.mxu0  ;;  %6652 = vmatmul.mubr.msk.bf16.gmra.mxu0 %vm619_vm2, %v3345_v22  ;;  %v7903_v26 = vadd.f32 %v1397_v31, %v1042_v63  ;;  %v1063_v25 = vadd.f32 %v6403_v44, %v7619_v1  ;;  %6605 = vmatprep.mubr.msk.bf16.mxu1 %vm619_vm2, %v2776_v34  ;;  %v2777_v22 = vrot.slane %v7394_v7, 2  ;;  %v3349_v1 = vsel %vm2757_vm5, %v3346_v58, %v3348_v27  ;;  %v4747_v7 = vld [vmem:[%s8833_s2 + $0x130] sm:$0xff]  ;;  %v7924_v63 = vld [vmem:[%s6959_s29 + $0x78] sm:$0xff]  }
 0x125   : > { %6655 = vmatprep.mubr.msk.bf16.mxu0 %vm619_vm2, %v3347_v17  ;;  %v1054_v4 = vpop.f32.mrf.mxu1  ;;  %v2779_v17 = vrot.slane %v7398_v41, 2  ;;  %v3351_v41 = vsel %vm2757_vm5, %v3348_v27, %v3350_v48  ;;  %v4748_v27 = vld [vmem:[%s8833_s2 + $0x138] sm:$0xff] }
 0x126   : > { %v1410_v38 = vpop.f32.mrf.mxu0  ;;  %v7912_v59 = vadd.f32 %v6453_v53, %v1063_v25  ;;  %v1055_v31 = vadd.f32 %v1054_v4, %v7635_v5  ;;  %4944 = vperm.xlu1 %6811, %v4746_v2   ;;  %v2778_v5 = vsel %vm2757_vm5, %v2775_v13, %v2777_v22  ;;  %v4749_v13 = vld [vmem:[%s8833_s2 + $0x140] sm:$0xff] }
 0x127   : > { %v6404_v34 = vpop.f32.mrf.mxu1  ;;  %v2780_v25 = vsel %vm2757_vm5, %v2777_v22, %v2779_v17  ;;  %4949 = vperm.xlu0 %6810, %v4747_v7  }
 0x128   : > { %v6454_v9 = vpop.f32.mrf.mxu0  ;;  %v7926_v39 = vadd.f32 %v1410_v38, %v1055_v31  ;;  %v1066_v53 = vadd.f32 %v6404_v34, %v7645_v49  ;;  %v3352_v49 = vrot.slane %v7917_v57, 2  ;;  %v3354_v31 = vrot.slane %v7924_v63, 2 }
 0x129   : > { %v1057_v58 = vpop.f32.mrf.mxu1 }
 0x12a   : > { %v1413_v62 = vpop.f32.mrf.mxu0  ;;  %v7935_v4 = vadd.f32 %v6454_v9, %v1066_v53  ;;  %v1058_v38 = vadd.f32 %v1057_v58, %v7658_v32  ;;  %4954 = vperm.xlu1 %6811, %v4748_v27   ;;  %v4750_v53 = vld [vmem:[%s8833_s2 + $0x148] sm:$0xff]  ;;  %v7959_v58 = vld [vmem:[%s6959_s29 + $0x80] sm:$0xff]  }
 0x12b   : > { %v6407_v2 = vpop.f32.mrf.mxu1  ;;  %6606 = vmatmul.mubr.msk.bf16.gmra.mxu1 %vm619_vm2, %v2778_v5  ;;  %4959 = vperm.xlu0 %6810, %v4749_v13  }
 0x12c   : > { %v6457_v44 = vpop.f32.mrf.mxu0  ;;  %6656 = vmatmul.mubr.msk.bf16.gmra.mxu0 %vm619_vm2, %v3349_v1  ;;  %v7945_v9 = vadd.f32 %v1413_v62, %v1058_v38  ;;  %v1079_v32 = vadd.f32 %v6407_v2, %v7671_v54  ;;  %6609 = vmatprep.mubr.msk.bf16.mxu1 %vm619_vm2, %v2780_v25  ;;  %v2781_v1 = vrot.slane %v7414_v20, 2  ;;  %v3353_v54 = vsel %vm2757_vm5, %v3350_v48, %v3352_v49  ;;  %v4751_v20 = vld [vmem:[%s8833_s2 + $0x150] sm:$0xff]  ;;  %v7966_v38 = vld [vmem:[%s6959_s29 + $0x88] sm:$0xff]  }
 0x12d   : > { %6659 = vmatprep.mubr.msk.bf16.mxu0 %vm619_vm2, %v3351_v41  ;;  %v1070_v7 = vpop.f32.mrf.mxu1  ;;  %v2783_v41 = vrot.slane %v7418_v56, 2  ;;  %v3355_v56 = vsel %vm2757_vm5, %v3352_v49, %v3354_v31  ;;  %v4752_v49 = vld [vmem:[%s8833_s2 + $0x158] sm:$0xff] }
 0x12e   : > { %v1426_v22 = vpop.f32.mrf.mxu0  ;;  %v7954_v5 = vadd.f32 %v6457_v44, %v1079_v32  ;;  %v1071_v62 = vadd.f32 %v1070_v7, %v7686_v35  ;;  %4964 = vperm.xlu1 %6811, %v4750_v53   ;;  %v2782_v35 = vsel %vm2757_vm5, %v2779_v17, %v2781_v1  ;;  %v4753_v17 = vld [vmem:[%s8833_s2 + $0x160] sm:$0xff] }
 0x12f   : > { %v6408_v25 = vpop.f32.mrf.mxu1  ;;  %v2784_v32 = vsel %vm2757_vm5, %v2781_v1, %v2783_v41  ;;  %4969 = vperm.xlu0 %6810, %v4751_v20  }
 0x130   : > { %v6458_v34 = vpop.f32.mrf.mxu0  ;;  %v7968_v13 = vadd.f32 %v1426_v22, %v1071_v62  ;;  %v1082_v44 = vadd.f32 %v6408_v25, %v7693_v6  ;;  %v3356_v6 = vrot.slane %v7959_v58, 2  ;;  %v3358_v62 = vrot.slane %v7966_v38, 2 }
 0x131   : > { %v1073_v48 = vpop.f32.mrf.mxu1 }
 0x132   : > { %v1429_v27 = vpop.f32.mrf.mxu0  ;;  %v7977_v7 = vadd.f32 %v6458_v34, %v1082_v44  ;;  %v1074_v22 = vadd.f32 %v1073_v48, %v7708_v50  ;;  %4974 = vperm.xlu1 %6811, %v4752_v49   ;;  %v4754_v44 = vld [vmem:[%s8833_s2 + $0x168] sm:$0xff]  ;;  %v8001_v48 = vld [vmem:[%s6959_s29 + $0x90] sm:$0xff]  }
 0x133   : > { %v6411_v53 = vpop.f32.mrf.mxu1  ;;  %6610 = vmatmul.mubr.msk.bf16.gmra.mxu1 %vm619_vm2, %v2782_v35  ;;  %4979 = vperm.xlu0 %6810, %v4753_v17  }
 0x134   : > { %v6461_v2 = vpop.f32.mrf.mxu0  ;;  %6660 = vmatmul.mubr.msk.bf16.gmra.mxu0 %vm619_vm2, %v3353_v54  ;;  %v7987_v34 = vadd.f32 %v1429_v27, %v1074_v22  ;;  %v1095_v50 = vadd.f32 %v6411_v53, %v7717_v42  ;;  %6613 = vmatprep.mubr.msk.bf16.mxu1 %vm619_vm2, %v2784_v32  ;;  %v2785_v54 = vrot.slane %v7434_v8, 2  ;;  %v3357_v42 = vsel %vm2757_vm5, %v3354_v31, %v3356_v6  ;;  %v4755_v8 = vld [vmem:[%s8833_s2 + $0x170] sm:$0xff]  ;;  %v8008_v22 = vld [vmem:[%s6959_s29 + $0x98] sm:$0xff]  }
 0x135   : > { %6663 = vmatprep.mubr.msk.bf16.mxu0 %vm619_vm2, %v3355_v56  ;;  %v1086_v20 = vpop.f32.mrf.mxu1  ;;  %v2787_v56 = vrot.slane %v7438_v21, 2  ;;  %v3359_v21 = vsel %vm2757_vm5, %v3356_v6, %v3358_v62  ;;  %8900 = vst [vmem:[#allocation34_spill] sm:$0xff] %v8008_v22  ;;  %v4756_v6 = vld [vmem:[%s8833_s2 + $0x178] sm:$0xff] }
 0x136   : > { %v1442_v1 = vpop.f32.mrf.mxu0  ;;  %v7996_v35 = vadd.f32 %v6461_v2, %v1095_v50  ;;  %v1087_v27 = vadd.f32 %v1086_v20, %v7732_v12  ;;  %4984 = vperm.xlu1 %6811, %v4754_v44   ;;  %v2786_v12 = vsel %vm2757_vm5, %v2783_v41, %v2785_v54 }
 0x137   : > { %v6412_v32 = vpop.f32.mrf.mxu1  ;;  %v2788_v50 = vsel %vm2757_vm5, %v2785_v54, %v2787_v56  ;;  %4989 = vperm.xlu0 %6810, %v4755_v8   ;;  %v3362_v54 = vrot.slane %v8008_v22, 2 }
 0x138   : > { %v6462_v25 = vpop.f32.mrf.mxu0  ;;  %v8010_v17 = vadd.f32 %v1442_v1, %v1087_v27  ;;  %v1098_v2 = vadd.f32 %v6412_v32, %v7739_v15  ;;  %v3360_v15 = vrot.slane %v8001_v48, 2  ;;  %v2791_v32 = vrot.slane %v7458_v46, 2 }
 0x139   : > { %v1089_v31 = vpop.f32.mrf.mxu1 }
 0x13a   : > { %v1445_v49 = vpop.f32.mrf.mxu0  ;;  %8901 = vst [vmem:[#allocation35_spill] sm:$0xff] %v8010_v17  ;;  %v8019_v20 = vadd.f32 %v6462_v25, %v1098_v2  ;;  %v1090_v1 = vadd.f32 %v1089_v31, %v7754_v52  ;;  %4994 = vperm.xlu1 %6811, %v4756_v6   ;;  %v2789_v52 = vrot.slane %v7454_v51, 2  ;;  %v8037_v31 = vld [vmem:[%s6959_s29 + $0xa0] sm:$0xff]  }
 0x13b   : > { %v6415_v41 = vpop.f32.mrf.mxu1  ;;  %6614 = vmatmul.mubr.msk.bf16.gmra.mxu1 %vm619_vm2, %v2786_v12  ;;  %v3361_v12 = vsel %vm2757_vm5, %v3358_v62, %v3360_v15  ;;  %8905 = vst [vmem:[#allocation39_spill] sm:$0xff] %v8037_v31 }
 0x13c   : > { %v6465_v53 = vpop.f32.mrf.mxu0  ;;  %6664 = vmatmul.mubr.msk.bf16.gmra.mxu0 %vm619_vm2, %v3357_v42  ;;  %8902 = vst [vmem:[#allocation36_spill] sm:$0xff] %v8019_v20  ;;  %v8026_v27 = vadd.f32 %v1445_v49, %v1090_v1  ;;  %v1111_v25 = vadd.f32 %v6415_v41, %v7491_v16  ;;  %6617 = vmatprep.mubr.msk.bf16.mxu1 %vm619_vm2, %v2788_v50  ;;  %v8041_v1 = vld [vmem:[%s6959_s29 + $0xa8] sm:$0xff]  }
 0x13d   : > { %6667 = vmatprep.mubr.msk.bf16.mxu0 %vm619_vm2, %v3359_v21  ;;  %v1102_v42 = vpop.f32.mrf.mxu1  ;;  %v3363_v16 = vsel %vm2757_vm5, %v3360_v15, %v3362_v54  ;;  %8906 = vst [vmem:[#allocation40_spill] sm:$0xff] %v8041_v1  ;;  %v2790_v46 = vsel %vm2757_vm5, %v2787_v56, %v2789_v52  ;;  %v3364_v15 = vrot.slane %v8037_v31, 2  ;;  %v3366_v56 = vrot.slane %v8041_v1, 2  ;;  %v8938_v1 = vld [vmem:[#allocation16_spill] sm:$0xff] }
 0x13e   : > { %v1458_v44 = vpop.f32.mrf.mxu0  ;;  %8903 = vst [vmem:[#allocation37_spill] sm:$0xff] %v8026_v27  ;;  %v8032_v21 = vadd.f32 %v6465_v53, %v1111_v25  ;;  %v1103_v2 = vadd.f32 %v1102_v42, %v7500_v29  ;;  %v2792_v29 = vsel %vm2757_vm5, %v2789_v52, %v2791_v32 }
 0x13f   : > { %v6416_v49 = vpop.f32.mrf.mxu1 }
 0x140   : > { %v6466_v8 = vpop.f32.mrf.mxu0  ;;  %8904 = vst [vmem:[#allocation38_spill] sm:$0xff] %v8032_v21  ;;  %v8043_v50 = vadd.f32 %v1458_v44, %v1103_v2  ;;  %v1114_v51 = vadd.f32 %v6416_v49, %v7515_v28 }
 0x141   : > { %v1105_v53 = vpop.f32.mrf.mxu1 }
 0x142   : > { %v1461_v6 = vpop.f32.mrf.mxu0  ;;  %8907 = vst [vmem:[#allocation41_spill] sm:$0xff] %v8043_v50  ;;  %v8049_v62 = vadd.f32 %v6466_v8, %v1114_v51  ;;  %v1106_v25 = vadd.f32 %v1105_v53, %v7524_v23  ;;  %v2793_v23 = vrot.slane %v7474_v30, 2  ;;  %v8912_v51 = vld [vmem:[#allocation5_spill] sm:$0xff]  ;;  %v3365_v53 = vsel %vm2757_vm5, %v3362_v54, %v3364_v15  ;;  %v8916_v30 = vld [vmem:[#allocation7_spill] sm:$0xff]  ;;  %v8097_v50 = vld [vmem:[%s6959_s29 + $0xc0] sm:$0xff]  }
 0x143   : > { %v6419_v44 = vpop.f32.mrf.mxu1  ;;  %6618 = vmatmul.mubr.msk.bf16.gmra.mxu1 %vm619_vm2, %v2790_v46 }
 0x144   : > { %v6469_v41 = vpop.f32.mrf.mxu0  ;;  %6668 = vmatmul.mubr.msk.bf16.gmra.mxu0 %vm619_vm2, %v3361_v12  ;;  %8908 = vst [vmem:[#allocation42_spill] sm:$0xff] %v8049_v62  ;;  %v8056_v42 = vadd.f32 %v1461_v6, %v1106_v25  ;;  %v1127_v52 = vadd.f32 %v6419_v44, %v7539_v14  ;;  %6621 = vmatprep.mubr.msk.bf16.mxu1 %vm619_vm2, %v2792_v29  ;;  %v8910_v12 = vld [vmem:[#allocation2_spill] sm:$0xff]  ;;  %v8067_v62 = vld [vmem:[%s6959_s29 + $0xb0] sm:$0xff]   ;;  %v8071_v44 = vld [vmem:[%s6959_s29 + $0xb8] sm:$0xff]  }
 0x145   : > { %6671 = vmatprep.mubr.msk.bf16.mxu0 %vm619_vm2, %v3363_v16  ;;  %v1118_v8 = vpop.f32.mrf.mxu1  ;;  %v2795_v49 = vrot.slane %v8910_v12, 2  ;;  %8913 = vst [vmem:[#allocation5_spill] sm:$0xff] %v8067_v62  ;;  %v3367_v14 = vsel %vm2757_vm5, %v3364_v15, %v3366_v56  ;;  %8914 = vst [vmem:[#allocation44_spill] sm:$0xff] %v8071_v44  ;;  %v2794_v12 = vsel %vm2757_vm5, %v2791_v32, %v2793_v23  ;;  %v3368_v15 = vrot.slane %v8067_v62, 2 }
 0x146   : > { %v1474_v28 = vpop.f32.mrf.mxu0  ;;  %8909 = vst [vmem:[#allocation43_spill] sm:$0xff] %v8056_v42  ;;  %v8062_v16 = vadd.f32 %v6469_v41, %v1127_v52  ;;  %v1119_v46 = vadd.f32 %v1118_v8, %v8912_v51  ;;  %v8918_v51 = vld [vmem:[#allocation9_spill] sm:$0xff]  ;;  %v3370_v32 = vrot.slane %v8071_v44, 2 }
 0x147   : > { %v6420_v6 = vpop.f32.mrf.mxu1  ;;  %v2796_v54 = vsel %vm2757_vm5, %v2793_v23, %v2795_v49  ;;  %v3369_v62 = vsel %vm2757_vm5, %v3366_v56, %v3368_v15 }
 0x148   : > { %v6470_v2 = vpop.f32.mrf.mxu0  ;;  %8911 = vst [vmem:[#allocation2_spill] sm:$0xff] %v8062_v16  ;;  %v8073_v29 = vadd.f32 %v1474_v28, %v1119_v46  ;;  %v1130_v42 = vadd.f32 %v6420_v6, %v8916_v30 }
 0x149   : > { %v1121_v41 = vpop.f32.mrf.mxu1 }
 0x14a   : > { %v1477_v25 = vpop.f32.mrf.mxu0  ;;  %8915 = vst [vmem:[#allocation45_spill] sm:$0xff] %v8073_v29  ;;  %v8079_v8 = vadd.f32 %v6470_v2, %v1130_v42  ;;  %v1122_v16 = vadd.f32 %v1121_v41, %v8918_v51  ;;  %v8921_v42 = vld [vmem:[#allocation3_spill] sm:$0xff]  ;;  %v8922_v41 = vld [vmem:[#allocation4_spill] sm:$0xff] }
 0x14b   : > { %v6423_v28 = vpop.f32.mrf.mxu1  ;;  %6622 = vmatmul.mubr.msk.bf16.gmra.mxu1 %vm619_vm2, %v2794_v12  ;;  %v2797_v2 = vrot.slane %v8921_v42, 2  ;;  %v2799_v51 = vrot.slane %v8922_v41, 2  ;;  %v8924_v29 = vld [vmem:[#allocation11_spill] sm:$0xff]  ;;  %8925 = vst [vmem:[#allocation3_spill] sm:$0xff] %v8097_v50  ;;  %v8928_v42 = vld [vmem:[#allocation13_spill] sm:$0xff] }
 0x14c   : > { %v6473_v52 = vpop.f32.mrf.mxu0  ;;  %6672 = vmatmul.mubr.msk.bf16.gmra.mxu0 %vm619_vm2, %v3365_v53  ;;  %8917 = vst [vmem:[#allocation7_spill] sm:$0xff] %v8079_v8  ;;  %v8086_v6 = vadd.f32 %v1477_v25, %v1122_v16  ;;  %v8920_v53 = vld [vmem:[#allocation10_spill] sm:$0xff]  ;;  %6625 = vmatprep.mubr.msk.bf16.mxu1 %vm619_vm2, %v2796_v54 }
 0x14d   : > { %6675 = vmatprep.mubr.msk.bf16.mxu0 %vm619_vm2, %v3367_v14  ;;  %v1143_v23 = vadd.f32 %v6423_v28, %v8920_v53  ;;  %v1134_v30 = vpop.f32.mrf.mxu1  ;;  %v3371_v28 = vsel %vm2757_vm5, %v3368_v15, %v3370_v32  ;;  %v8101_v53 = vld [vmem:[%s6959_s29 + $0xc8] sm:$0xff]   ;;  %v2798_v41 = vsel %vm2757_vm5, %v2795_v49, %v2797_v2  ;;  %v2800_v56 = vsel %vm2757_vm5, %v2797_v2, %v2799_v51 }
 0x14e   : > { %v1490_v46 = vpop.f32.mrf.mxu0  ;;  %8919 = vst [vmem:[#allocation9_spill] sm:$0xff] %v8086_v6  ;;  %v1135_v12 = vadd.f32 %v1134_v30, %v8924_v29  ;;  %8926 = vst [vmem:[#allocation4_spill] sm:$0xff] %v8101_v53  ;;  %v8930_v30 = vld [vmem:[#allocation14_spill] sm:$0xff]  ;;  %v3372_v15 = vrot.slane %v8097_v50, 2  ;;  %v3374_v49 = vrot.slane %v8101_v53, 2  ;;  %v8935_v50 = vld [vmem:[#allocation19_spill] sm:$0xff] }
 0x14f   : > { %v8092_v8 = vadd.f32 %v6473_v52, %v1143_v23  ;;  %v6424_v16 = vpop.f32.mrf.mxu1  ;;  %v3742_v53 = vshrl.u32 %v8935_v50, 16 }
 0x150   : > { %v6474_v14 = vpop.f32.mrf.mxu0  ;;  %v8103_v54 = vadd.f32 %v1490_v46, %v1135_v12  ;;  %v1146_v6 = vadd.f32 %v6424_v16, %v8928_v42  ;;  %v3375_v44 = vsel %vm2757_vm5, %v3372_v15, %v3374_v49 }
 0x151   : > { %8923 = vst [vmem:[#allocation10_spill] sm:$0xff] %v8092_v8  ;;  %v1137_v52 = vpop.f32.mrf.mxu1 }
 0x152   : > { %v1493_v25 = vpop.f32.mrf.mxu0  ;;  %8927 = vst [vmem:[#allocation11_spill] sm:$0xff] %v8103_v54  ;;  %v8109_v29 = vadd.f32 %v6474_v14, %v1146_v6  ;;  %v1138_v8 = vadd.f32 %v1137_v52, %v8930_v30  ;;  %v8933_v6 = vld [vmem:[#allocation6_spill] sm:$0xff]  ;;  %v8934_v14 = vld [vmem:[#allocation8_spill] sm:$0xff]  ;;  %v3734_v54 = vshrl.u32 %v7662_v3, 16 }
 0x153   : > { %v6427_v46 = vpop.f32.mrf.mxu1  ;;  %6626 = vmatmul.mubr.msk.bf16.gmra.mxu1 %vm619_vm2, %v2798_v41  ;;  %v2801_v2 = vrot.slane %v8933_v6, 2  ;;  %v2803_v52 = vrot.slane %v8934_v14, 2  ;;  %v3737_v41 = vshll.u32 %v7662_v3, 16  ;;  %v6889_v6 = vld [vmem:[%s6959_s29 + $0xd0] ss:$0 sps:$4 sm:$0x33]  }
 0x154   : > { %v6477_v23 = vpop.f32.mrf.mxu0  ;;  %6676 = vmatmul.mubr.msk.bf16.gmra.mxu0 %vm619_vm2, %v3369_v62  ;;  %8929 = vst [vmem:[#allocation13_spill] sm:$0xff] %v8109_v29  ;;  %v8116_v16 = vadd.f32 %v1493_v25, %v1138_v8  ;;  %v8932_v62 = vld [vmem:[#allocation15_spill] sm:$0xff]  ;;  %6629 = vmatprep.mubr.msk.bf16.mxu1 %vm619_vm2, %v2800_v56  ;;  %v3745_v8 = vshll.u32 %v8935_v50, 16  ;;  %v3373_v56 = vsel %vm2757_vm5, %v3370_v32, %v3372_v15  ;;  %v8940_v3 = vld [vmem:[#allocation18_spill] sm:$0xff]  ;;  %v3736_v32 = vrot.slane %v3734_v54, 2  ;;  %v8942_v15 = vld [vmem:[#allocation20_spill] sm:$0xff] }
 0x155   : > { %6679 = vmatprep.mubr.msk.bf16.mxu0 %vm619_vm2, %v3371_v28  ;;  %v1159_v42 = vadd.f32 %v6427_v46, %v8932_v62  ;;  %v4305_v28 = vld [vmem:[%s6959_s29 + $0x10] sm:$0x8]  ;;  %v1150_v30 = vpop.f32.mrf.mxu1  ;;  %v8937_v46 = vld [vmem:[#allocation17_spill] sm:$0xff]  ;;  %v2802_v20 = vsel %vm2757_vm5, %v2799_v51, %v2801_v2 }
 0x156   : > { %v1506_v12 = vpop.f32.mrf.mxu0  ;;  %8931 = vst [vmem:[#allocation14_spill] sm:$0xff] %v8116_v16  ;;  %v1151_v62 = vadd.f32 %v1150_v30, %v8937_v46  ;;  %v5846_v21 = vcombine.low %v4305_v28, %v8938_v1  ;;  %v3739_v30 = vrot.slane %v3737_v41, 3  ;;  %v3744_v46 = vrot.slane %v3742_v53, 2  ;;  %v8946_v41 = vld [vmem:[#allocation12_spill] sm:$0xff] }
 0x157   : > { %v8127_v25 = vadd.f32 %v6477_v23, %v1159_v42  ;;  %v6428_v16 = vpop.f32.mrf.mxu1  ;;  %v2804_v23 = vsel %vm2757_vm5, %v2801_v2, %v2803_v52  ;;  %v3747_v17 = vrot.slane %v3745_v8, 3  ;;  %v4313_v28 = vrot.slane %v8935_v50, 3 }
 0x158   : > { %v6478_v29 = vpop.f32.mrf.mxu0  ;;  %v8134_v31 = vadd.f32 %v1506_v12, %v1151_v62  ;;  %v1162_v27 = vadd.f32 %v6428_v16, %v8940_v3  ;;  %v3376_v12 = vrot.slane %v6889_v6, 2  ;;  %v4312_v2 = vrot.slane %v5846_v21, 3  ;;  %v8943_v62 = vld [vmem:[#allocation23_spill] sm:$0xff]  ;;  %v8947_v21 = vld [vmem:[#allocation25_spill] sm:$0xff] }
 0x159   : > { %8936 = vst [vmem:[#allocation15_spill] sm:$0xff] %v8127_v25  ;;  %v1153_v42 = vpop.f32.mrf.mxu1  ;;  %v3754_v54 = vshll.u32 %v8943_v62, 16  ;;  %v3748_v3 = vor.u32 %v3747_v17, %v3744_v46  ;;  %v3763_v50 = vshll.u32 %v8947_v21, 16  ;;  %v8950_v17 = vld [vmem:[#allocation24_spill] sm:$0xff] }
 0x15a   : > { %v1509_v14 = vpop.f32.mrf.mxu0  ;;  %8939 = vst [vmem:[#allocation6_spill] sm:$0xff] %v8134_v31  ;;  %v8140_v22 = vadd.f32 %v6478_v29, %v1162_v27  ;;  %v1154_v1 = vadd.f32 %v1153_v42, %v8942_v15  ;;  %v8945_v27 = vld [vmem:[#allocation21_spill] sm:$0xff]  ;;  %v3760_v42 = vshrl.u32 %v8947_v21, 16 }
 0x15b   : > { %v6431_v16 = vpop.f32.mrf.mxu1  ;;  %6630 = vmatmul.mubr.msk.bf16.gmra.mxu1 %vm619_vm2, %v2802_v20  ;;  %v3740_v20 = vor.u32 %v3739_v30, %v3736_v32 }
 0x15c   : > { %v6481_v25 = vpop.f32.mrf.mxu0  ;;  %6680 = vmatmul.mubr.msk.bf16.gmra.mxu0 %vm619_vm2, %v3373_v56  ;;  %8941 = vst [vmem:[#allocation8_spill] sm:$0xff] %v8140_v22  ;;  %v3751_v56 = vshrl.u32 %v8943_v62, 16  ;;  %v8148_v53 = vadd.f32 %v1509_v14, %v1154_v1  ;;  %v1175_v29 = vadd.f32 %v6431_v16, %v8945_v27  ;;  %6633 = vmatprep.mubr.msk.bf16.mxu1 %vm619_vm2, %v2804_v23  ;;  %v8948_v22 = vld [vmem:[#allocation22_spill] sm:$0xff] }
 0x15d   : > { %6683 = vmatprep.mubr.msk.bf16.mxu0 %vm619_vm2, %v3375_v44  ;;  %v2805_v44 = vrot.slane %v8946_v41, 2  ;;  %v1166_v8 = vpop.f32.mrf.mxu1  ;;  %v3377_v1 = vsel %vm2757_vm5, %v3374_v49, %v3376_v12  ;;  %v4314_v27 = vsel %vm4311_vm6, %v4312_v2, %v4313_v28  ;;  %v3762_v49 = vrot.slane %v3760_v42, 2 }
 0x15e   : > { %v1522_v51 = vpop.f32.mrf.mxu0  ;;  %8944 = vst [vmem:[#allocation19_spill] sm:$0xff] %v8148_v53  ;;  %v8155_v15 = vadd.f32 %v6481_v25, %v1175_v29  ;;  %v1167_v14 = vadd.f32 %v1166_v8, %v8948_v22  ;;  %v3753_v41 = vrot.slane %v3751_v56, 2  ;;  %v3756_v53 = vrot.slane %v3754_v54, 3  ;;  %v8952_v8 = vld [vmem:[#allocation26_spill] sm:$0xff] }
 0x15f   : > { %v6432_v16 = vpop.f32.mrf.mxu1  ;;  %v2806_v30 = vsel %vm2757_vm5, %v2803_v52, %v2805_v44  ;;  %v3749_v22 = vsel %vm3732_vm7, %v3740_v20, %v3748_v3  ;;  %v3765_v12 = vrot.slane %v3763_v50, 3  ;;  %v4317_v44 = vrot.slane %v8947_v21, 3  ;;  %v8954_v20 = vld [vmem:[#allocation27_spill] sm:$0xff]  ;;  %v8957_v21 = vld [vmem:[#allocation28_spill] sm:$0xff] }
 0x160   : > { %v6482_v6 = vpop.f32.mrf.mxu0  ;;  %v8160_v31 = vadd.f32 %v1522_v51, %v1167_v14  ;;  %v1178_v32 = vadd.f32 %v6432_v16, %v8950_v17  ;;  %v4315_v51 = vrot.slane %v8943_v62, 3  ;;  %v3757_v54 = vor.u32 %v3756_v53, %v3753_v41  ;;  %v8956_v17 = vld [vmem:[#allocation31_spill] sm:$0xff] }
 0x161   : > { %v1169_v46 = vpop.f32.mrf.mxu1  ;;  %v3766_v62 = vor.u32 %v3765_v12, %v3762_v49 }
 0x162   : > { %v1525_v23 = vpop.f32.mrf.mxu0  ;;  %8949 = vst [vmem:[#allocation17_spill] sm:$0xff] %v8160_v31  ;;  %v8166_v29 = vadd.f32 %v6482_v6, %v1178_v32  ;;  %v1170_v2 = vadd.f32 %v1169_v46, %v8952_v8  ;;  %v8955_v6 = vld [vmem:[#allocation29_spill] sm:$0xff]  ;;  %v3778_v32 = vshrl.u32 %v8956_v17, 16  ;;  %v4316_v41 = vsel %vm4311_vm6, %v4313_v28, %v4315_v51 }
 0x163   : > { %v6435_v56 = vpop.f32.mrf.mxu1  ;;  %6634 = vmatmul.mubr.msk.bf16.gmra.mxu1 %vm619_vm2, %v2806_v30  ;;  %v3769_v50 = vshrl.u32 %v8955_v6, 16  ;;  %v3781_v30 = vshll.u32 %v8956_v17, 16 }
 0x164   : > { %v6485_v25 = vpop.f32.mrf.mxu0  ;;  %6684 = vmatmul.mubr.msk.bf16.gmra.mxu0 %vm619_vm2, %v3377_v1  ;;  %8951 = vst [vmem:[#allocation16_spill] sm:$0xff] %v8166_v29  ;;  %v8173_v14 = vadd.f32 %v1525_v23, %v1170_v2  ;;  %v1191_v42 = vadd.f32 %v6435_v56, %v8954_v20  ;;  %6689 = vmatprep.mubr.msk.bf16.mxu1 %vm619_vm2, %v3749_v22  ;;  %v3772_v1 = vshll.u32 %v8955_v6, 16  ;;  %v8958_v20 = vld [vmem:[#allocation30_spill] sm:$0xff] }
 0x165   : > { %6739 = vmatprep.mubr.msk.bf16.mxu0 %vm619_vm2, %v4314_v27  ;;  %v1182_v16 = vpop.f32.mrf.mxu1  ;;  %v3758_v22 = vsel %vm3732_vm7, %v3748_v3, %v3757_v54  ;;  %v4318_v2 = vsel %vm4311_vm6, %v4315_v51, %v4317_v44  ;;  %v3771_v12 = vrot.slane %v3769_v50, 2  ;;  %v3783_v28 = vrot.slane %v3781_v30, 3 }
 0x166   : > { %v1538_v52 = vpop.f32.mrf.mxu0  ;;  %8953 = vst [vmem:[#allocation18_spill] sm:$0xff] %v8173_v14  ;;  %v8181_v53 = vadd.f32 %v6485_v25, %v1191_v42  ;;  %v1183_v23 = vadd.f32 %v1182_v16, %v8957_v21  ;;  %v3774_v14 = vrot.slane %v3772_v1, 3  ;;  %v3767_v25 = vsel %vm3732_vm7, %v3757_v54, %v3766_v62  ;;  %v8959_v21 = vld [vmem:[#allocation32_spill] sm:$0xff] }
 0x167   : > { %v6436_v46 = vpop.f32.mrf.mxu1  ;;  %v3780_v42 = vrot.slane %v3778_v32, 2  ;;  %v4319_v51 = vrot.slane %v8955_v6, 3  ;;  %v4321_v1 = vrot.slane %v8956_v17, 3  ;;  %v3790_v54 = vshll.u32 %v7791_v33, 16 }
 0x168   : > { %v6486_v27 = vpop.f32.mrf.mxu0  ;;  %v8187_v56 = vadd.f32 %v1538_v52, %v1183_v23  ;;  %v1194_v49 = vadd.f32 %v6436_v46, %v8958_v20  ;;  %v3787_v23 = vshrl.u32 %v7791_v33, 16 }
 0x169   : > { %v1185_v29 = vpop.f32.mrf.mxu1  ;;  %v3784_v6 = vor.u32 %v3783_v28, %v3780_v42 }
 0x16a   : > { %v1541_v8 = vpop.f32.mrf.mxu0  ;;  %v8192_v16 = vadd.f32 %v6486_v27, %v1194_v49  ;;  %v1186_v3 = vadd.f32 %v1185_v29, %v8959_v21  ;;  %v8960_v27 = vld [vmem:[#allocation33_spill] sm:$0xff]  ;;  %v3775_v29 = vor.u32 %v3774_v14, %v3771_v12  ;;  %v4320_v49 = vsel %vm4311_vm6, %v4317_v44, %v4319_v51 }
 0x16b   : > { %v6491_v52 = vpop.f32.mrf.mxu1  ;;  %6690 = vmatmul.mubr.msk.bf16.vlgmr.msra.gmra.mxu1 %vm619_vm2, %v3758_v22  ;;  %v3799_v22 = vshll.u32 %v7798_v11, 16 }
 0x16c   : > { %v6541_v31 = vpop.f32.mrf.mxu0  ;;  %6740 = vmatmul.mubr.msk.bf16.vlgmr.msra.gmra.mxu0 %vm619_vm2, %v4316_v41  ;;  %v8201_v32 = vadd.f32 %v1541_v8, %v1186_v3  ;;  %v2126_v30 = vadd.f32 %v6491_v52, %v8960_v27  ;;  %6693 = vmatprep.mubr.msk.bf16.mxu1 %vm619_vm2, %v3767_v25  ;;  %v4322_v3 = vsel %vm4311_vm6, %v4319_v51, %v4321_v1  ;;  %v3789_v52 = vrot.slane %v3787_v23, 2 }
 0x16d   : > { %6743 = vmatprep.mubr.msk.bf16.mxu0 %vm619_vm2, %v4318_v2  ;;  %v1933_v41 = vpop.f32.mrf.mxu1  ;;  %v3796_v2 = vshrl.u32 %v7798_v11, 16  ;;  %v3792_v25 = vrot.slane %v3790_v54, 3  ;;  %v3776_v42 = vsel %vm3732_vm7, %v3766_v62, %v3775_v29  ;;  %v3801_v44 = vrot.slane %v3799_v22, 3 }
 0x16e   : > { %v2512_v50 = vpop.f32.mrf.mxu0  ;;  %v8207_v20 = vadd.f32 %v6541_v31, %v2126_v30  ;;  %v2124_v17 = vadd.f32 %v1933_v41, %v7800_v60  ;;  %v3785_v60 = vsel %vm3732_vm7, %v3775_v29, %v3784_v6  ;;  %v4325_v54 = vrot.slane %v7798_v11, 3 }
 0x16f   : > { %v6492_v8 = vpop.f32.mrf.mxu1  ;;  %v3798_v31 = vrot.slane %v3796_v2, 2  ;;  %v3793_v62 = vor.u32 %v3792_v25, %v3789_v52 }
 0x170   : > { %v6542_v46 = vpop.f32.mrf.mxu0  ;;  %v8212_v14 = vadd.f32 %v2512_v50, %v2124_v17  ;;  %v2127_v12 = vadd.f32 %v6492_v8, %v7809_v45  ;;  %v4323_v50 = vrot.slane %v7791_v33, 3  ;;  %v3814_v17 = vshrl.u32 %v7840_v37, 16 }
 0x171   : > { %v1936_v28 = vpop.f32.mrf.mxu1  ;;  %v3802_v33 = vor.u32 %v3801_v44, %v3798_v31  ;;  %v3794_v52 = vsel %vm3732_vm7, %v3784_v6, %v3793_v62 }
 0x172   : > { %v2515_v21 = vpop.f32.mrf.mxu0  ;;  %v8218_v30 = vadd.f32 %v6542_v46, %v2127_v12  ;;  %v2125_v51 = vadd.f32 %v1936_v28, %v7819_v0  ;;  %v3805_v46 = vshrl.u32 %v7833_v55, 16  ;;  %v3808_v0 = vshll.u32 %v7833_v55, 16 }
 0x173   : > { %v6495_v23 = vpop.f32.mrf.mxu1  ;;  %6694 = vmatmul.mubr.msk.bf16.gmra.mxu1 %vm619_vm2, %v3776_v42  ;;  %v4326_v25 = vsel %vm4311_vm6, %v4323_v50, %v4325_v54 }
 0x174   : > { %v6545_v27 = vpop.f32.mrf.mxu0  ;;  %6744 = vmatmul.mubr.msk.bf16.gmra.mxu0 %vm619_vm2, %v4320_v49  ;;  %v8225_v41 = vadd.f32 %v2515_v21, %v2125_v51  ;;  %v2130_v29 = vadd.f32 %v6495_v23, %v7828_v19  ;;  %6697 = vmatprep.mubr.msk.bf16.mxu1 %vm619_vm2, %v3785_v60  ;;  %v3817_v49 = vshll.u32 %v7840_v37, 16  ;;  %v4324_v21 = vsel %vm4311_vm6, %v4321_v1, %v4323_v50 }
 0x175   : > { %6747 = vmatprep.mubr.msk.bf16.mxu0 %vm619_vm2, %v4322_v3  ;;  %v1949_v2 = vpop.f32.mrf.mxu1  ;;  %v3807_v28 = vrot.slane %v3805_v46, 2  ;;  %v3810_v60 = vrot.slane %v3808_v0, 3  ;;  %v4327_v50 = vrot.slane %v7833_v55, 3 }
 0x176   : > { %v2528_v45 = vpop.f32.mrf.mxu0  ;;  %v8233_v8 = vadd.f32 %v6545_v27, %v2130_v29  ;;  %v2128_v11 = vadd.f32 %v1949_v2, %v7842_v40  ;;  %v3803_v40 = vsel %vm3732_vm7, %v3793_v62, %v3802_v33  ;;  %v3816_v27 = vrot.slane %v3814_v17, 2 }
 0x177   : > { %v6496_v19 = vpop.f32.mrf.mxu1  ;;  %v3819_v1 = vrot.slane %v3817_v49, 3  ;;  %v3823_v29 = vshrl.u32 %v7875_v43, 16  ;;  %v3826_v62 = vshll.u32 %v7875_v43, 16  ;;  %v3832_v17 = vshrl.u32 %v7882_v47, 16 }
 0x178   : > { %v6546_v22 = vpop.f32.mrf.mxu0  ;;  %v8239_v12 = vadd.f32 %v2528_v45, %v2128_v11  ;;  %v2131_v42 = vadd.f32 %v6496_v19, %v7851_v36  ;;  %v4329_v45 = vrot.slane %v7840_v37, 3  ;;  %v3835_v49 = vshll.u32 %v7882_v47, 16 }
 0x179   : > { %v1952_v31 = vpop.f32.mrf.mxu1  ;;  %v3820_v55 = vor.u32 %v3819_v1, %v3816_v27 }
 0x17a   : > { %v2531_v3 = vpop.f32.mrf.mxu0  ;;  %v8244_v51 = vadd.f32 %v6546_v22, %v2131_v42  ;;  %v2129_v6 = vadd.f32 %v1952_v31, %v7861_v18  ;;  %v3811_v18 = vor.u32 %v3810_v60, %v3807_v28 }
 0x17b   : > { %v6499_v23 = vpop.f32.mrf.mxu1  ;;  %6698 = vmatmul.mubr.msk.bf16.gmra.mxu1 %vm619_vm2, %v3794_v52  ;;  %v3825_v52 = vrot.slane %v3823_v29, 2 }
 0x17c   : > { %v6549_v44 = vpop.f32.mrf.mxu0  ;;  %6748 = vmatmul.mubr.msk.bf16.gmra.mxu0 %vm619_vm2, %v4324_v21  ;;  %v8253_v46 = vadd.f32 %v2531_v3, %v2129_v6  ;;  %v2134_v0 = vadd.f32 %v6499_v23, %v7870_v24  ;;  %6701 = vmatprep.mubr.msk.bf16.mxu1 %vm619_vm2, %v3803_v40  ;;  %v4328_v21 = vsel %vm4311_vm6, %v4325_v54, %v4327_v50  ;;  %v3837_v54 = vrot.slane %v3835_v49, 3 }
 0x17d   : > { %6751 = vmatprep.mubr.msk.bf16.mxu0 %vm619_vm2, %v4326_v25  ;;  %v1965_v2 = vpop.f32.mrf.mxu1  ;;  %v4330_v24 = vsel %vm4311_vm6, %v4327_v50, %v4329_v45  ;;  %v3828_v25 = vrot.slane %v3826_v62, 3  ;;  %v3812_v60 = vsel %vm3732_vm7, %v3802_v33, %v3811_v18  ;;  %v4331_v6 = vrot.slane %v7875_v43, 3 }
 0x17e   : > { %v2544_v36 = vpop.f32.mrf.mxu0  ;;  %v8259_v11 = vadd.f32 %v6549_v44, %v2134_v0  ;;  %v2132_v37 = vadd.f32 %v1965_v2, %v7884_v10  ;;  %v3821_v10 = vsel %vm3732_vm7, %v3811_v18, %v3820_v55  ;;  %v3834_v44 = vrot.slane %v3832_v17, 2 }
 0x17f   : > { %v6500_v19 = vpop.f32.mrf.mxu1  ;;  %v3829_v33 = vor.u32 %v3828_v25, %v3825_v52  ;;  %v4333_v23 = vrot.slane %v7882_v47, 3  ;;  %v3841_v62 = vshrl.u32 %v7917_v57, 16  ;;  %v3850_v2 = vshrl.u32 %v7924_v63, 16 }
 0x180   : > { %v6550_v22 = vpop.f32.mrf.mxu0  ;;  %v8264_v42 = vadd.f32 %v2544_v36, %v2132_v37  ;;  %v2135_v28 = vadd.f32 %v6500_v19, %v7893_v61  ;;  %v3838_v43 = vor.u32 %v3837_v54, %v3834_v44  ;;  %v4332_v49 = vsel %vm4311_vm6, %v4329_v45, %v4331_v6 }
 0x181   : > { %v1968_v31 = vpop.f32.mrf.mxu1  ;;  %v4334_v19 = vsel %vm4311_vm6, %v4331_v6, %v4333_v23  ;;  %v3843_v52 = vrot.slane %v3841_v62, 2  ;;  %v4337_v54 = vrot.slane %v7924_v63, 3  ;;  %v3862_v6 = vshll.u32 %v7959_v58, 16 }
 0x182   : > { %v2547_v3 = vpop.f32.mrf.mxu0  ;;  %v8270_v27 = vadd.f32 %v6550_v22, %v2135_v28  ;;  %v2133_v1 = vadd.f32 %v1968_v31, %v7903_v26  ;;  %v3844_v26 = vshll.u32 %v7917_v57, 16  ;;  %v3853_v22 = vshll.u32 %v7924_v63, 16 }
 0x183   : > { %v6503_v50 = vpop.f32.mrf.mxu1  ;;  %6702 = vmatmul.mubr.msk.bf16.gmra.mxu1 %vm619_vm2, %v3812_v60  ;;  %v3852_v31 = vrot.slane %v3850_v2, 2  ;;  %v3868_v62 = vshrl.u32 %v7966_v38, 16 }
 0x184   : > { %v6553_v40 = vpop.f32.mrf.mxu0  ;;  %6752 = vmatmul.mubr.msk.bf16.gmra.mxu0 %vm619_vm2, %v4328_v21  ;;  %v8277_v36 = vadd.f32 %v2547_v3, %v2133_v1  ;;  %v2138_v29 = vadd.f32 %v6503_v50, %v7912_v59  ;;  %6705 = vmatprep.mubr.msk.bf16.mxu1 %vm619_vm2, %v3821_v10  ;;  %v3830_v21 = vsel %vm3732_vm7, %v3820_v55, %v3829_v33  ;;  %v3846_v25 = vrot.slane %v3844_v26, 3 }
 0x185   : > { %6755 = vmatprep.mubr.msk.bf16.mxu0 %vm619_vm2, %v4330_v24  ;;  %v1981_v0 = vpop.f32.mrf.mxu1  ;;  %v3855_v45 = vrot.slane %v3853_v22, 3  ;;  %v4335_v10 = vrot.slane %v7917_v57, 3  ;;  %v3859_v1 = vshrl.u32 %v7959_v58, 16  ;;  %v3871_v26 = vshll.u32 %v7966_v38, 16 }
 0x186   : > { %v2560_v61 = vpop.f32.mrf.mxu0  ;;  %v8285_v17 = vadd.f32 %v6553_v40, %v2138_v29  ;;  %v2136_v47 = vadd.f32 %v1981_v0, %v7926_v39  ;;  %v3839_v39 = vsel %vm3732_vm7, %v3829_v33, %v3838_v43 }
 0x187   : > { %v6504_v59 = vpop.f32.mrf.mxu1  ;;  %v3856_v57 = vor.u32 %v3855_v45, %v3852_v31  ;;  %v4341_v31 = vrot.slane %v7966_v38, 3  ;;  %v8962_v38 = vld [vmem:[#allocation35_spill] sm:$0xff] }
 0x188   : > { %v6554_v18 = vpop.f32.mrf.mxu0  ;;  %v8291_v3 = vadd.f32 %v2560_v61, %v2136_v47  ;;  %v2139_v24 = vadd.f32 %v6504_v59, %v7935_v4  ;;  %v3861_v47 = vrot.slane %v3859_v1, 2  ;;  %v8961_v1 = vld [vmem:[#allocation34_spill] sm:$0xff] }
 0x189   : > { %v1984_v28 = vpop.f32.mrf.mxu1 }
 0x18a   : > { %v2563_v37 = vpop.f32.mrf.mxu0  ;;  %v8296_v40 = vadd.f32 %v6554_v18, %v2139_v24  ;;  %v2137_v55 = vadd.f32 %v1984_v28, %v7945_v9  ;;  %v3847_v9 = vor.u32 %v3846_v25, %v3843_v52  ;;  %v4336_v18 = vsel %vm4311_vm6, %v4333_v23, %v4335_v10 }
 0x18b   : > { %v6507_v44 = vpop.f32.mrf.mxu1  ;;  %6706 = vmatmul.mubr.msk.bf16.gmra.mxu1 %vm619_vm2, %v3830_v21  ;;  %v3870_v52 = vrot.slane %v3868_v62, 2  ;;  %v3873_v23 = vrot.slane %v3871_v26, 3 }
 0x18c   : > { %v6557_v60 = vpop.f32.mrf.mxu0  ;;  %6756 = vmatmul.mubr.msk.bf16.gmra.mxu0 %vm619_vm2, %v4332_v49  ;;  %v8305_v50 = vadd.f32 %v2563_v37, %v2137_v55  ;;  %v2142_v61 = vadd.f32 %v6507_v44, %v7954_v5  ;;  %6709 = vmatprep.mubr.msk.bf16.mxu1 %vm619_vm2, %v3839_v39  ;;  %v4338_v5 = vsel %vm4311_vm6, %v4335_v10, %v4337_v54  ;;  %v3864_v49 = vrot.slane %v3862_v6, 3 }
 0x18d   : > { %6759 = vmatprep.mubr.msk.bf16.mxu0 %vm619_vm2, %v4334_v19  ;;  %v1997_v33 = vpop.f32.mrf.mxu1  ;;  %v3848_v21 = vsel %vm3732_vm7, %v3838_v43, %v3847_v9  ;;  %v3877_v10 = vshrl.u32 %v8001_v48, 16  ;;  %v3886_v6 = vshrl.u32 %v8961_v1, 16 }
 0x18e   : > { %v2576_v4 = vpop.f32.mrf.mxu0  ;;  %v8311_v0 = vadd.f32 %v6557_v60, %v2142_v61  ;;  %v2140_v63 = vadd.f32 %v1997_v33, %v7968_v13  ;;  %v3857_v13 = vsel %vm3732_vm7, %v3847_v9, %v3856_v57  ;;  %v4339_v60 = vrot.slane %v7959_v58, 3 }
 0x18f   : > { %v6508_v2 = vpop.f32.mrf.mxu1  ;;  %v3865_v43 = vor.u32 %v3864_v49, %v3861_v47  ;;  %v3874_v58 = vor.u32 %v3873_v23, %v3870_v52  ;;  %v3889_v61 = vshll.u32 %v8961_v1, 16  ;;  %v4343_v52 = vrot.slane %v8001_v48, 3 }
 0x190   : > { %v6558_v29 = vpop.f32.mrf.mxu0  ;;  %v8316_v59 = vadd.f32 %v2576_v4, %v2140_v63  ;;  %v2143_v37 = vadd.f32 %v6508_v2, %v7977_v7  ;;  %v4342_v63 = vsel %vm4311_vm6, %v4339_v60, %v4341_v31  ;;  %v8963_v2 = vld [vmem:[#allocation36_spill] sm:$0xff] }
 0x191   : > { %v2000_v19 = vpop.f32.mrf.mxu1  ;;  %v3866_v26 = vsel %vm3732_vm7, %v3856_v57, %v3865_v43 }
 0x192   : > { %v2579_v22 = vpop.f32.mrf.mxu0  ;;  %v8322_v25 = vadd.f32 %v6558_v29, %v2143_v37  ;;  %v2141_v28 = vadd.f32 %v2000_v19, %v7987_v34  ;;  %v3880_v34 = vshll.u32 %v8001_v48, 16  ;;  %v4340_v29 = vsel %vm4311_vm6, %v4337_v54, %v4339_v60 }
 0x193   : > { %v6511_v39 = vpop.f32.mrf.mxu1  ;;  %6710 = vmatmul.mubr.msk.bf16.gmra.mxu1 %vm619_vm2, %v3848_v21  ;;  %v3875_v21 = vsel %vm3732_vm7, %v3865_v43, %v3874_v58  ;;  %v3888_v19 = vrot.slane %v3886_v6, 2  ;;  %v3891_v54 = vrot.slane %v3889_v61, 3  ;;  %v4345_v60 = vrot.slane %v8961_v1, 3  ;;  %v8967_v61 = vld [vmem:[#allocation40_spill] sm:$0xff]  ;;  %v8968_v1 = vld [vmem:[#allocation41_spill] sm:$0xff] }
 0x194   : > { %v6561_v24 = vpop.f32.mrf.mxu0  ;;  %6760 = vmatmul.mubr.msk.bf16.gmra.mxu0 %vm619_vm2, %v4336_v18  ;;  %v8329_v45 = vadd.f32 %v2579_v22, %v2141_v28  ;;  %v2146_v55 = vadd.f32 %v6511_v39, %v7996_v35  ;;  %6713 = vmatprep.mubr.msk.bf16.mxu1 %vm619_vm2, %v3857_v13  ;;  %v3882_v47 = vrot.slane %v3880_v34, 3  ;;  %v8964_v13 = vld [vmem:[#allocation37_spill] sm:$0xff]  ;;  %v8965_v39 = vld [vmem:[#allocation39_spill] sm:$0xff] }
 0x195   : > { %6763 = vmatprep.mubr.msk.bf16.mxu0 %vm619_vm2, %v4338_v5  ;;  %v2013_v44 = vpop.f32.mrf.mxu1  ;;  %v3879_v5 = vrot.slane %v3877_v10, 2  ;;  %v3898_v43 = vshll.u32 %v8965_v39, 16  ;;  %v8966_v10 = vld [vmem:[#allocation38_spill] sm:$0xff]  ;;  %v3892_v48 = vor.u32 %v3891_v54, %v3888_v19 }
 0x196   : > { %v2592_v7 = vpop.f32.mrf.mxu0  ;;  %v8337_v9 = vadd.f32 %v6561_v24, %v2146_v55  ;;  %v2144_v33 = vadd.f32 %v2013_v44, %v8962_v38  ;;  %v3904_v38 = vshrl.u32 %v8967_v61, 16 }
 0x197   : > { %v6512_v35 = vpop.f32.mrf.mxu1  ;;  %v3883_v44 = vor.u32 %v3882_v47, %v3879_v5  ;;  %v8969_v47 = vld [vmem:[#allocation42_spill] sm:$0xff] }
 0x198   : > { %v6562_v4 = vpop.f32.mrf.mxu0  ;;  %v8343_v18 = vadd.f32 %v2592_v7, %v2144_v33  ;;  %v2147_v22 = vadd.f32 %v6512_v35, %v8963_v2  ;;  %v3895_v7 = vshrl.u32 %v8965_v39, 16  ;;  %v3907_v33 = vshll.u32 %v8967_v61, 16 }
 0x199   : > { %v2016_v49 = vpop.f32.mrf.mxu1  ;;  %v4346_v2 = vsel %vm4311_vm6, %v4343_v52, %v4345_v60  ;;  %v3884_v19 = vsel %vm3732_vm7, %v3874_v58, %v3883_v44 }
 0x19a   : > { %v2595_v62 = vpop.f32.mrf.mxu0  ;;  %v8348_v24 = vadd.f32 %v6562_v4, %v2147_v22  ;;  %v2145_v57 = vadd.f32 %v2016_v49, %v8964_v13  ;;  %v3897_v22 = vrot.slane %v3895_v7, 2  ;;  %v3900_v49 = vrot.slane %v3898_v43, 3 }
 0x19b   : > { %v6515_v23 = vpop.f32.mrf.mxu1  ;;  %6714 = vmatmul.mubr.msk.bf16.gmra.mxu1 %vm619_vm2, %v3866_v26  ;;  %v4344_v26 = vsel %vm4311_vm6, %v4341_v31, %v4343_v52  ;;  %v3909_v31 = vrot.slane %v3907_v33, 3 }
 0x19c   : > { %v6565_v37 = vpop.f32.mrf.mxu0  ;;  %6764 = vmatmul.mubr.msk.bf16.gmra.mxu0 %vm619_vm2, %v4340_v29  ;;  %v8357_v55 = vadd.f32 %v2595_v62, %v2145_v57  ;;  %v2150_v34 = vadd.f32 %v6515_v23, %v8966_v10  ;;  %6717 = vmatprep.mubr.msk.bf16.mxu1 %vm619_vm2, %v3875_v21  ;;  %v3906_v57 = vrot.slane %v3904_v38, 2  ;;  %v8970_v10 = vld [vmem:[#allocation43_spill] sm:$0xff]  ;;  %v3901_v43 = vor.u32 %v3900_v49, %v3897_v22 }
 0x19d   : > { %6767 = vmatprep.mubr.msk.bf16.mxu0 %vm619_vm2, %v4342_v63  ;;  %v2029_v4 = vpop.f32.mrf.mxu1 }
 0x19e   : > { %v2608_v28 = vpop.f32.mrf.mxu0  ;;  %v8363_v29 = vadd.f32 %v6565_v37, %v2150_v34  ;;  %v2148_v35 = vadd.f32 %v2029_v4, %v8968_v1  ;;  %v3893_v37 = vsel %vm3732_vm7, %v3883_v44, %v3892_v48  ;;  %v4349_v34 = vrot.slane %v8967_v61, 3  ;;  %v8972_v44 = vld [vmem:[#allocation2_spill] sm:$0xff]  ;;  %v8976_v61 = vld [vmem:[#allocation45_spill] sm:$0xff] }
 0x19f   : > { %v6516_v62 = vpop.f32.mrf.mxu1 }
 0x1a0   : > { %v6566_v6 = vpop.f32.mrf.mxu0  ;;  %v8368_v5 = vadd.f32 %v2608_v28, %v2148_v35  ;;  %v2151_v21 = vadd.f32 %v6516_v62, %v8969_v47  ;;  %v4347_v28 = vrot.slane %v8965_v39, 3  ;;  %v3910_v39 = vor.u32 %v3909_v31, %v3906_v57  ;;  %v8974_v62 = vld [vmem:[#allocation44_spill] sm:$0xff] }
 0x1a1   : > { %v2032_v54 = vpop.f32.mrf.mxu1  ;;  %v3925_v47 = vshll.u32 %v8974_v62, 16 }
 0x1a2   : > { %v2611_v63 = vpop.f32.mrf.mxu0  ;;  %v8374_v23 = vadd.f32 %v6566_v6, %v2151_v21  ;;  %v2149_v52 = vadd.f32 %v2032_v54, %v8970_v10  ;;  %v8973_v6 = vld [vmem:[#allocation5_spill] sm:$0xff]  ;;  %v4348_v49 = vsel %vm4311_vm6, %v4345_v60, %v4347_v28  ;;  %v3902_v54 = vsel %vm3732_vm7, %v3892_v48, %v3901_v43 }
 0x1a3   : > { %v6519_v7 = vpop.f32.mrf.mxu1  ;;  %6718 = vmatmul.mubr.msk.bf16.gmra.mxu1 %vm619_vm2, %v3884_v19  ;;  %v3913_v33 = vshrl.u32 %v8973_v6, 16  ;;  %v3916_v1 = vshll.u32 %v8973_v6, 16  ;;  %v3927_v60 = vrot.slane %v3925_v47, 3 }
 0x1a4   : > { %v6569_v13 = vpop.f32.mrf.mxu0  ;;  %6768 = vmatmul.mubr.msk.bf16.gmra.mxu0 %vm619_vm2, %v4344_v26  ;;  %v8381_v4 = vadd.f32 %v2611_v63, %v2149_v52  ;;  %v2154_v38 = vadd.f32 %v6519_v7, %v8972_v44  ;;  %6721 = vmatprep.mubr.msk.bf16.mxu1 %vm619_vm2, %v3893_v37  ;;  %v4350_v37 = vsel %vm4311_vm6, %v4347_v28, %v4349_v34  ;;  %v8978_v52 = vld [vmem:[#allocation7_spill] sm:$0xff]  ;;  %v4351_v28 = vrot.slane %v8973_v6, 3 }
 0x1a5   : > { %6771 = vmatprep.mubr.msk.bf16.mxu0 %vm619_vm2, %v4346_v2  ;;  %v2045_v35 = vpop.f32.mrf.mxu1  ;;  %v3922_v2 = vshrl.u32 %v8974_v62, 16  ;;  %v3915_v31 = vrot.slane %v3913_v33, 2  ;;  %v3918_v7 = vrot.slane %v3916_v1, 3  ;;  %v4353_v1 = vrot.slane %v8974_v62, 3 }
 0x1a6   : > { %v2624_v58 = vpop.f32.mrf.mxu0  ;;  %8971 = vst [vmem:[#allocation20_spill] sm:$0xff] %v8381_v4  ;;  %v8389_v22 = vadd.f32 %v6569_v13, %v2154_v38  ;;  %v2152_v63 = vadd.f32 %v2045_v35, %v8976_v61  ;;  %v3911_v13 = vsel %vm3732_vm7, %v3901_v43, %v3910_v39  ;;  %v8980_v61 = vld [vmem:[#allocation9_spill] sm:$0xff] }
 0x1a7   : > { %v6520_v21 = vpop.f32.mrf.mxu1  ;;  %v3924_v38 = vrot.slane %v3922_v2, 2 }
 0x1a8   : > { %v6570_v26 = vpop.f32.mrf.mxu0  ;;  %8975 = vst [vmem:[#allocation23_spill] sm:$0xff] %v8389_v22  ;;  %v8395_v10 = vadd.f32 %v2624_v58, %v2152_v63  ;;  %v2155_v57 = vadd.f32 %v6520_v21, %v8978_v52  ;;  %v8981_v63 = vld [vmem:[#allocation3_spill] sm:$0xff]  ;;  %v3919_v21 = vor.u32 %v3918_v7, %v3915_v31 }
 0x1a9   : > { %v2048_v44 = vpop.f32.mrf.mxu1  ;;  %v3934_v43 = vshll.u32 %v8981_v63, 16  ;;  %v3928_v52 = vor.u32 %v3927_v60, %v3924_v38 }
 0x1aa   : > { %v2627_v19 = vpop.f32.mrf.mxu0  ;;  %8977 = vst [vmem:[#allocation21_spill] sm:$0xff] %v8395_v10  ;;  %v8400_v35 = vadd.f32 %v6570_v26, %v2155_v57  ;;  %v2153_v48 = vadd.f32 %v2048_v44, %v8980_v61  ;;  %v8983_v26 = vld [vmem:[#allocation10_spill] sm:$0xff]  ;;  %v8984_v57 = vld [vmem:[#allocation4_spill] sm:$0xff]  ;;  %v8985_v61 = vld [vmem:[#allocation11_spill] sm:$0xff]  ;;  %v3920_v60 = vsel %vm3732_vm7, %v3910_v39, %v3919_v21 }
 0x1ab   : > { %v6523_v58 = vpop.f32.mrf.mxu1  ;;  %6722 = vmatmul.mubr.msk.bf16.gmra.mxu1 %vm619_vm2, %v3902_v54  ;;  %v3940_v54 = vshrl.u32 %v8984_v57, 16  ;;  %v3943_v44 = vshll.u32 %v8984_v57, 16  ;;  %v3936_v31 = vrot.slane %v3934_v43, 3  ;;  %v6891_v10 = vld [vmem:[%s6959_s29 + $0xd0] ss:$0 sps:$4 sm:$0x77]  }
 0x1ac   : > { %v6573_v4 = vpop.f32.mrf.mxu0  ;;  %6772 = vmatmul.mubr.msk.bf16.gmra.mxu0 %vm619_vm2, %v4348_v49  ;;  %8979 = vst [vmem:[#allocation12_spill] sm:$0xff] %v8400_v35  ;;  %v3931_v49 = vshrl.u32 %v8981_v63, 16  ;;  %v8409_v2 = vadd.f32 %v2627_v19, %v2153_v48  ;;  %v2158_v47 = vadd.f32 %v6523_v58, %v8983_v26  ;;  %6725 = vmatprep.mubr.msk.bf16.mxu1 %vm619_vm2, %v3911_v13  ;;  %v8986_v26 = vld [vmem:[#allocation13_spill] sm:$0xff]  ;;  %s6800_s29 = smul.u32 192, %s9051_s19 }
 0x1ad   : > { %6775 = vmatprep.mubr.msk.bf16.mxu0 %vm619_vm2, %v4350_v37  ;;  %v2061_v37 = vpop.f32.mrf.mxu1  ;;  %v4352_v19 = vsel %vm4311_vm6, %v4349_v34, %v4351_v28  ;;  %v4354_v58 = vsel %vm4311_vm6, %v4351_v28, %v4353_v1  ;;  %v3942_v34 = vrot.slane %v3940_v54, 2  ;;  %v8988_v28 = vld [vmem:[#allocation14_spill] sm:$0xff] }
 0x1ae   : > { %v2640_v33 = vpop.f32.mrf.mxu0  ;;  %8982 = vst [vmem:[#allocation25_spill] sm:$0xff] %v8409_v2  ;;  %v8415_v62 = vadd.f32 %v6573_v4, %v2158_v47  ;;  %v2156_v35 = vadd.f32 %v2061_v37, %v8985_v61  ;;  %v3933_v13 = vrot.slane %v3931_v49, 2  ;;  %v3929_v47 = vsel %vm3732_vm7, %v3919_v21, %v3928_v52  ;;  %v8990_v21 = vld [vmem:[#allocation15_spill] sm:$0xff]  ;;  %s8676_s30 = scalar_lea.vmem %s8834_s3, %s6800_s29 }
 0x1af   : > { %v6524_v48 = vpop.f32.mrf.mxu1  ;;  %v3945_v37 = vrot.slane %v3943_v44, 3  ;;  %v3952_v44 = vshll.u32 %v6891_v10, 16 }
 0x1b0   : > { %v6574_v6 = vpop.f32.mrf.mxu0  ;;  %v8420_v7 = vadd.f32 %v2640_v33, %v2156_v35  ;;  %v2159_v38 = vadd.f32 %v6524_v48, %v8986_v26  ;;  %v4355_v35 = vrot.slane %v8981_v63, 3  ;;  %v3937_v43 = vor.u32 %v3936_v31, %v3933_v13  ;;  %v8991_v63 = vld [vmem:[#allocation6_spill] sm:$0xff] }
 0x1b1   : > { %v2064_v22 = vpop.f32.mrf.mxu1  ;;  %v4357_v48 = vrot.slane %v8984_v57, 3 }
 0x1b2   : > { %v2643_v2 = vpop.f32.mrf.mxu0  ;;  %v8427_v61 = vadd.f32 %v6574_v6, %v2159_v38  ;;  %v2157_v49 = vadd.f32 %v2064_v22, %v8988_v28  ;;  %v3949_v6 = vshrl.u32 %v6891_v10, 16 }
 0x1b3   : > { %v6527_v33 = vpop.f32.mrf.mxu1  ;;  %6726 = vmatmul.mubr.msk.bf16.gmra.mxu1 %vm619_vm2, %v3920_v60  ;;  %v4356_v60 = vsel %vm4311_vm6, %v4353_v1, %v4355_v35  ;;  %v4358_v57 = vsel %vm4311_vm6, %v4355_v35, %v4357_v48  ;;  %v8993_v1 = vld [vmem:[#allocation19_spill] sm:$0xff] }
 0x1b4   : > { %v6577_v4 = vpop.f32.mrf.mxu0  ;;  %6776 = vmatmul.mubr.msk.bf16.gmra.mxu0 %vm619_vm2, %v4352_v19  ;;  %8987 = vst [vmem:[#allocation22_spill] sm:$0xff] %v8427_v61  ;;  %v8434_v19 = vadd.f32 %v2643_v2, %v2157_v49  ;;  %v2162_v54 = vadd.f32 %v6527_v33, %v8990_v21  ;;  %6729 = vmatprep.mubr.msk.bf16.mxu1 %vm619_vm2, %v3929_v47  ;;  %v8992_v47 = vld [vmem:[#allocation8_spill] sm:$0xff]  ;;  %v3951_v21 = vrot.slane %v3949_v6, 2 }
 0x1b5   : > { %6779 = vmatprep.mubr.msk.bf16.mxu0 %vm619_vm2, %v4354_v58  ;;  %v2077_v22 = vpop.f32.mrf.mxu1  ;;  %v3946_v58 = vor.u32 %v3945_v37, %v3942_v34  ;;  %v3938_v2 = vsel %vm3732_vm7, %v3928_v52, %v3937_v43  ;;  %v4359_v52 = vrot.slane %v6891_v10, 3 }
 0x1b6   : > { %v2656_v39 = vpop.f32.mrf.mxu0  ;;  %8989 = vst [vmem:[#allocation24_spill] sm:$0xff] %v8434_v19  ;;  %v8438_v38 = vadd.f32 %v6577_v4, %v2162_v54  ;;  %v2160_v28 = vadd.f32 %v2077_v22, %v8991_v63  ;;  %v3954_v19 = vrot.slane %v3952_v44, 3 }
 0x1b7   : > { %v6528_v13 = vpop.f32.mrf.mxu1  ;;  %v3947_v4 = vsel %vm3732_vm7, %v3937_v43, %v3946_v58 }
 0x1b8   : > { %v6578_v26 = vpop.f32.mrf.mxu0  ;;  %v8444_v49 = vadd.f32 %v2656_v39, %v2160_v28  ;;  %v2163_v33 = vadd.f32 %v6528_v13, %v8992_v47  ;;  %v3955_v44 = vor.u32 %v3954_v19, %v3951_v21  ;;  %v8994_v28 = vld [vmem:[#allocation17_spill] sm:$0xff]  ;;  %v8996_v21 = vld [vmem:[#allocation18_spill] sm:$0xff] }
 0x1b9   : > { %v2080_v61 = vpop.f32.mrf.mxu1 }
 0x1ba   : > { %v2659_v31 = vpop.f32.mrf.mxu0  ;;  %v8449_v37 = vadd.f32 %v6578_v26, %v2163_v33  ;;  %v2161_v54 = vadd.f32 %v2080_v61, %v8993_v1  ;;  %v3956_v47 = vsel %vm3732_vm7, %v3946_v58, %v3955_v44 }
 0x1bb   : > { %v6531_v35 = vpop.f32.mrf.mxu1  ;;  %6730 = vmatmul.mubr.msk.bf16.gmra.mxu1 %vm619_vm2, %v3938_v2  ;;  %v8995_v2 = vld [vmem:[#allocation16_spill] sm:$0xff] }
 0x1bc   : > { %v6581_v34 = vpop.f32.mrf.mxu0  ;;  %6780 = vmatmul.mubr.msk.bf16.gmra.mxu0 %vm619_vm2, %v4356_v60  ;;  %v8454_v22 = vadd.f32 %v2659_v31, %v2161_v54  ;;  %v2166_v6 = vadd.f32 %v6531_v35, %v8155_v15  ;;  %6733 = vmatprep.mubr.msk.bf16.mxu1 %vm619_vm2, %v3947_v4  ;;  %v4360_v60 = vsel %vm4311_vm6, %v4357_v48, %v4359_v52 }
 0x1bd   : > { %6783 = vmatprep.mubr.msk.bf16.mxu0 %vm619_vm2, %v4358_v57  ;;  %v2093_v63 = vpop.f32.mrf.mxu1 }
 0x1be   : > { %v2672_v39 = vpop.f32.mrf.mxu0  ;;  %v8458_v26 = vadd.f32 %v6581_v34, %v2166_v6  ;;  %v2164_v61 = vadd.f32 %v2093_v63, %v8994_v28 }
 0x1bf   : > { %v6532_v10 = vpop.f32.mrf.mxu1 }
 0x1c0   : > { %v6582_v43 = vpop.f32.mrf.mxu0  ;;  %v8462_v57 = vadd.f32 %v2672_v39, %v2164_v61  ;;  %v2167_v31 = vadd.f32 %v6532_v10, %v8995_v2 }
 0x1c1   : > { %v2096_v15 = vpop.f32.mrf.mxu1 }
 0x1c2   : > { %v2675_v13 = vpop.f32.mrf.mxu0  ;;  %v8467_v19 = vadd.f32 %v6582_v43, %v2167_v31  ;;  %v2165_v34 = vadd.f32 %v2096_v15, %v8996_v21 }
 0x1c3   : > { %v6535_v4 = vpop.f32.mrf.mxu1  ;;  %6734 = vmatmul.mubr.msk.bf16.gmra.mxu1 %vm619_vm2, %v3956_v47 }
 0x1c4   : > { %v6585_v33 = vpop.f32.mrf.mxu0  ;;  %6784 = vmatmul.mubr.msk.bf16.gmra.mxu0 %vm619_vm2, %v4360_v60  ;;  %v8471_v1 = vadd.f32 %v2675_v13, %v2165_v34  ;;  %v2170_v54 = vadd.f32 %v6535_v4, %v8181_v53 }
 0x1c5   : > { %v2109_v52 = vpop.f32.mrf.mxu1 }
 0x1c6   : > { %v2688_v48 = vpop.f32.mrf.mxu0  ;;  %v8474_v39 = vadd.f32 %v6585_v33, %v2170_v54  ;;  %v2168_v58 = vadd.f32 %v2109_v52, %v8187_v56 }
 0x1c7   : > { %v6536_v6 = vpop.f32.mrf.mxu1 }
 0x1c8   : > { %v6586_v35 = vpop.f32.mrf.mxu0  ;;  %v8477_v63 = vadd.f32 %v2688_v48, %v2168_v58  ;;  %v2171_v43 = vadd.f32 %v6536_v6, %v8192_v16 }
 0x1c9   : > { %v2112_v28 = vpop.f32.mrf.mxu1 }
 0x1ca   : > { %v2691_v44 = vpop.f32.mrf.mxu0  ;;  %v8480_v60 = vadd.f32 %v6586_v35, %v2171_v43  ;;  %v2169_v10 = vadd.f32 %v2112_v28, %v8201_v32 }
 0x1cb   : > { %v6591_v13 = vpop.f32.mrf.mxu1 }
 0x1cc   : > { %v6641_v61 = vpop.f32.mrf.mxu0  ;;  %v8483_v2 = vadd.f32 %v2691_v44, %v2169_v10  ;;  %v3109_v31 = vadd.f32 %v6591_v13, %v8207_v20 }
 0x1cd   : > { %v2916_v47 = vpop.f32.mrf.mxu1 }
 0x1ce   : > { %v3487_v53 = vpop.f32.mrf.mxu0  ;;  %v8486_v15 = vadd.f32 %v6641_v61, %v3109_v31  ;;  %v3107_v33 = vadd.f32 %v2916_v47, %v8212_v14 }
 0x1cf   : > { %v6592_v21 = vpop.f32.mrf.mxu1 }
 0x1d0   : > { %v6642_v56 = vpop.f32.mrf.mxu0  ;;  %v8489_v34 = vadd.f32 %v3487_v53, %v3107_v33  ;;  %v3110_v4 = vadd.f32 %v6592_v21, %v8218_v30 }
 0x1d1   : > { %v2919_v48 = vpop.f32.mrf.mxu1 }
 0x1d2   : > { %v3490_v16 = vpop.f32.mrf.mxu0  ;;  %v8492_v54 = vadd.f32 %v6642_v56, %v3110_v4  ;;  %v3108_v52 = vadd.f32 %v2919_v48, %v8225_v41 }
 0x1d3   : > { %v6595_v35 = vpop.f32.mrf.mxu1 }
 0x1d4   : > { %v6645_v32 = vpop.f32.mrf.mxu0  ;;  %v8495_v58 = vadd.f32 %v3490_v16, %v3108_v52  ;;  %v3113_v6 = vadd.f32 %v6595_v35, %v8233_v8 }
 0x1d5   : > { %v2932_v44 = vpop.f32.mrf.mxu1 }
 0x1d6   : > { %v3503_v20 = vpop.f32.mrf.mxu0  ;;  %v8498_v43 = vadd.f32 %v6645_v32, %v3113_v6  ;;  %v3111_v28 = vadd.f32 %v2932_v44, %v8239_v12 }
 0x1d7   : > { %v6596_v61 = vpop.f32.mrf.mxu1 }
 0x1d8   : > { %v6646_v14 = vpop.f32.mrf.mxu0  ;;  %v8501_v10 = vadd.f32 %v3503_v20, %v3111_v28  ;;  %v3114_v13 = vadd.f32 %v6596_v61, %v8244_v51 }
 0x1d9   : > { %v2935_v53 = vpop.f32.mrf.mxu1 }
 0x1da   : > { %v3506_v30 = vpop.f32.mrf.mxu0  ;;  %v8504_v31 = vadd.f32 %v6646_v14, %v3114_v13  ;;  %v3112_v47 = vadd.f32 %v2935_v53, %v8253_v46 }
 0x1db   : > { %v6599_v56 = vpop.f32.mrf.mxu1 }
 0x1dc   : > { %v6649_v41 = vpop.f32.mrf.mxu0  ;;  %v8507_v33 = vadd.f32 %v3506_v30, %v3112_v47  ;;  %v3117_v21 = vadd.f32 %v6599_v56, %v8259_v11 }
 0x1dd   : > { %v2948_v16 = vpop.f32.mrf.mxu1 }
 0x1de   : > { %v3519_v8 = vpop.f32.mrf.mxu0  ;;  %v8510_v4 = vadd.f32 %v6649_v41, %v3117_v21  ;;  %v3115_v48 = vadd.f32 %v2948_v16, %v8264_v42 }
 0x1df   : > { %v6600_v32 = vpop.f32.mrf.mxu1 }
 0x1e0   : > { %v6650_v12 = vpop.f32.mrf.mxu0  ;;  %v8513_v52 = vadd.f32 %v3519_v8, %v3115_v48  ;;  %v3118_v35 = vadd.f32 %v6600_v32, %v8270_v27 }
 0x1e1   : > { %v2951_v20 = vpop.f32.mrf.mxu1 }
 0x1e2   : > { %v3522_v51 = vpop.f32.mrf.mxu0  ;;  %v8516_v6 = vadd.f32 %v6650_v12, %v3118_v35  ;;  %v3116_v44 = vadd.f32 %v2951_v20, %v8277_v36 }
 0x1e3   : > { %v6603_v14 = vpop.f32.mrf.mxu1 }
 0x1e4   : > { %v6653_v46 = vpop.f32.mrf.mxu0  ;;  %v8519_v28 = vadd.f32 %v3522_v51, %v3116_v44  ;;  %v3121_v61 = vadd.f32 %v6603_v14, %v8285_v17 }
 0x1e5   : > { %v2964_v30 = vpop.f32.mrf.mxu1 }
 0x1e6   : > { %v3535_v11 = vpop.f32.mrf.mxu0  ;;  %v8522_v13 = vadd.f32 %v6653_v46, %v3121_v61  ;;  %v3119_v53 = vadd.f32 %v2964_v30, %v8291_v3 }
 0x1e7   : > { %v6604_v41 = vpop.f32.mrf.mxu1 }
 0x1e8   : > { %v6654_v42 = vpop.f32.mrf.mxu0  ;;  %v8525_v47 = vadd.f32 %v3535_v11, %v3119_v53  ;;  %v3122_v56 = vadd.f32 %v6604_v41, %v8296_v40 }
 0x1e9   : > { %v2967_v8 = vpop.f32.mrf.mxu1 }
 0x1ea   : > { %v3538_v27 = vpop.f32.mrf.mxu0  ;;  %v8528_v21 = vadd.f32 %v6654_v42, %v3122_v56  ;;  %v3120_v16 = vadd.f32 %v2967_v8, %v8305_v50 }
 0x1eb   : > { %v6607_v12 = vpop.f32.mrf.mxu1 }
 0x1ec   : > { %v6657_v36 = vpop.f32.mrf.mxu0  ;;  %v8531_v48 = vadd.f32 %v3538_v27, %v3120_v16  ;;  %v3125_v32 = vadd.f32 %v6607_v12, %v8311_v0 }
 0x1ed   : > { %v2980_v51 = vpop.f32.mrf.mxu1 }
 0x1ee   : > { %v3551_v17 = vpop.f32.mrf.mxu0  ;;  %v8534_v35 = vadd.f32 %v6657_v36, %v3125_v32  ;;  %v3123_v20 = vadd.f32 %v2980_v51, %v8316_v59 }
 0x1ef   : > { %v6608_v46 = vpop.f32.mrf.mxu1 }
 0x1f0   : > { %v6658_v3 = vpop.f32.mrf.mxu0  ;;  %v8537_v44 = vadd.f32 %v3551_v17, %v3123_v20  ;;  %v3126_v14 = vadd.f32 %v6608_v46, %v8322_v25 }
 0x1f1   : > { %v2983_v11 = vpop.f32.mrf.mxu1 }
 0x1f2   : > { %v3554_v40 = vpop.f32.mrf.mxu0  ;;  %v8540_v61 = vadd.f32 %v6658_v3, %v3126_v14  ;;  %v3124_v30 = vadd.f32 %v2983_v11, %v8329_v45 }
 0x1f3   : > { %v6611_v42 = vpop.f32.mrf.mxu1 }
 0x1f4   : > { %v6661_v50 = vpop.f32.mrf.mxu0  ;;  %v8543_v53 = vadd.f32 %v3554_v40, %v3124_v30  ;;  %v3129_v41 = vadd.f32 %v6611_v42, %v8337_v9 }
 0x1f5   : > { %v2996_v27 = vpop.f32.mrf.mxu1 }
 0x1f6   : > { %v3567_v0 = vpop.f32.mrf.mxu0  ;;  %v8546_v56 = vadd.f32 %v6661_v50, %v3129_v41  ;;  %v3127_v8 = vadd.f32 %v2996_v27, %v8343_v18  ;;  %v8564_v41 = vpop.permute.xlu0 %4759 }
 0x1f7   : > { %v6612_v36 = vpop.f32.mrf.mxu1  ;;  %v8566_v27 = vpop.permute.xlu1 %4769 }
 0x1f8   : > { %v6662_v59 = vpop.f32.mrf.mxu0  ;;  %v8549_v16 = vadd.f32 %v3567_v0, %v3127_v8  ;;  %v3130_v12 = vadd.f32 %v6612_v36, %v8348_v24 }
 0x1f9   : > { %v2999_v17 = vpop.f32.mrf.mxu1 }
 0x1fa   : > { %v3570_v25 = vpop.f32.mrf.mxu0  ;;  %v8552_v32 = vadd.f32 %v6662_v59, %v3130_v12  ;;  %v3128_v51 = vadd.f32 %v2999_v17, %v8357_v55 }
 0x1fb   : > { %v6615_v3 = vpop.f32.mrf.mxu1 }
 0x1fc   : > { %v6665_v45 = vpop.f32.mrf.mxu0  ;;  %v8555_v20 = vadd.f32 %v3570_v25, %v3128_v51  ;;  %v3133_v46 = vadd.f32 %v6615_v3, %v8363_v29  ;;  %v8999_v29 = vld [vmem:[#allocation20_spill] sm:$0xff] }
 0x1fd   : > { %v3012_v40 = vpop.f32.mrf.mxu1 }
 0x1fe   : > { %v3583_v9 = vpop.f32.mrf.mxu0  ;;  %v8558_v14 = vadd.f32 %v6665_v45, %v3133_v46  ;;  %v3131_v11 = vadd.f32 %v3012_v40, %v8368_v5  ;;  %v9001_v5 = vld [vmem:[#allocation23_spill] sm:$0xff] }
 0x1ff   : > { %v6616_v50 = vpop.f32.mrf.mxu1 }
 0x200   : > { %v6666_v18 = vpop.f32.mrf.mxu0  ;;  %v8561_v30 = vadd.f32 %v3583_v9, %v3131_v11  ;;  %v3134_v42 = vadd.f32 %v6616_v50, %v8374_v23  ;;  %v9003_v23 = vld [vmem:[#allocation21_spill] sm:$0xff]  ;;  %v8577_v11 = vpop.permute.xlu0 %4764 }
 0x201   : > { %v3015_v0 = vpop.f32.mrf.mxu1 }
 0x202   : > { %v3586_v24 = vpop.f32.mrf.mxu0  ;;  %8997 = vst [vmem:[#allocation26_spill] sm:$0xff] %v8561_v30  ;;  %v8568_v59 = vadd.f32 %v6666_v18, %v3134_v42  ;;  %v3132_v8 = vadd.f32 %v3015_v0, %v8999_v29  ;;  %v8579_v18 = vpop.permute.xlu1 %4774  ;;  %v9005_v42 = vld [vmem:[#allocation12_spill] sm:$0xff] }
 0x203   : > { %v6619_v36 = vpop.f32.mrf.mxu1 }
 0x204   : > { %v6669_v55 = vpop.f32.mrf.mxu0  ;;  %8998 = vst [vmem:[#allocation27_spill] sm:$0xff] %v8568_v59  ;;  %v8571_v12 = vadd.f32 %v3586_v24, %v3132_v8  ;;  %v3137_v17 = vadd.f32 %v6619_v36, %v9001_v5  ;;  %v9007_v36 = vld [vmem:[#allocation25_spill] sm:$0xff]  ;;  %v8590_v59 = vpop.permute.xlu0 %4779 }
 0x205   : > { %v3028_v45 = vpop.f32.mrf.mxu1 }
 0x206   : > { %v3599_v25 = vpop.f32.mrf.mxu0  ;;  %9000 = vst [vmem:[#allocation29_spill] sm:$0xff] %v8571_v12  ;;  %v8574_v3 = vadd.f32 %v6669_v55, %v3137_v17  ;;  %v3135_v9 = vadd.f32 %v3028_v45, %v9003_v23 }
 0x207   : > { %v6620_v46 = vpop.f32.mrf.mxu1 }
 0x208   : > { %v6670_v51 = vpop.f32.mrf.mxu0  ;;  %9002 = vst [vmem:[#allocation31_spill] sm:$0xff] %v8574_v3  ;;  %v8581_v50 = vadd.f32 %v3599_v25, %v3135_v9  ;;  %v3138_v0 = vadd.f32 %v6620_v46, %v9005_v42  ;;  %v8592_v25 = vpop.permute.xlu1 %4784 }
 0x209   : > { %v3031_v24 = vpop.f32.mrf.mxu1  ;;  %v8603_v30 = vpop.permute.xlu0 %4789 }
 0x20a   : > { %v3602_v40 = vpop.f32.mrf.mxu0  ;;  %9004 = vst [vmem:[#allocation28_spill] sm:$0xff] %v8581_v50  ;;  %v8584_v8 = vadd.f32 %v6670_v51, %v3138_v0  ;;  %v3136_v5 = vadd.f32 %v3031_v24, %v9007_v36  ;;  %v9011_v24 = vld [vmem:[#allocation22_spill] sm:$0xff] }
 0x20b   : > { %v6623_v55 = vpop.f32.mrf.mxu1 }
 0x20c   : > { %v6673_v29 = vpop.f32.mrf.mxu0  ;;  %9006 = vst [vmem:[#allocation30_spill] sm:$0xff] %v8584_v8  ;;  %v8587_v3 = vadd.f32 %v3602_v40, %v3136_v5  ;;  %v3141_v45 = vadd.f32 %v6623_v55, %v8415_v62  ;;  %v9013_v62 = vld [vmem:[#allocation24_spill] sm:$0xff] }
 0x20d   : > { %v3044_v23 = vpop.f32.mrf.mxu1 }
 0x20e   : > { %v3615_v17 = vpop.f32.mrf.mxu0  ;;  %9008 = vst [vmem:[#allocation32_spill] sm:$0xff] %v8587_v3  ;;  %v8594_v9 = vadd.f32 %v6673_v29, %v3141_v45  ;;  %v3139_v46 = vadd.f32 %v3044_v23, %v8420_v7  ;;  %v8605_v29 = vpop.permute.xlu1 %4794 }
 0x20f   : > { %v6624_v51 = vpop.f32.mrf.mxu1 }
 0x210   : > { %v6674_v12 = vpop.f32.mrf.mxu0  ;;  %9009 = vst [vmem:[#allocation33_spill] sm:$0xff] %v8594_v9  ;;  %v8597_v0 = vadd.f32 %v3615_v17, %v3139_v46  ;;  %v3142_v36 = vadd.f32 %v6624_v51, %v9011_v24 }
 0x211   : > { %v3047_v40 = vpop.f32.mrf.mxu1 }
 0x212   : > { %v3618_v42 = vpop.f32.mrf.mxu0  ;;  %9010 = vst [vmem:[#allocation34_spill] sm:$0xff] %v8597_v0  ;;  %v8600_v3 = vadd.f32 %v6674_v12, %v3142_v36  ;;  %v3140_v55 = vadd.f32 %v3047_v40, %v9013_v62  ;;  %v8616_v0 = vpop.permute.xlu0 %4799 }
 0x213   : > { %v6627_v8 = vpop.f32.mrf.mxu1 }
 0x214   : > { %v6677_v5 = vpop.f32.mrf.mxu0  ;;  %9012 = vst [vmem:[#allocation35_spill] sm:$0xff] %v8600_v3  ;;  %v8607_v45 = vadd.f32 %v3618_v42, %v3140_v55  ;;  %v3145_v7 = vadd.f32 %v6627_v8, %v8438_v38  ;;  %v8618_v42 = vpop.permute.xlu1 %4804 }
 0x215   : > { %v3060_v17 = vpop.f32.mrf.mxu1 }
 0x216   : > { %v3631_v50 = vpop.f32.mrf.mxu0  ;;  %9014 = vst [vmem:[#allocation36_spill] sm:$0xff] %v8607_v45  ;;  %v8610_v46 = vadd.f32 %v6677_v5, %v3145_v7  ;;  %v3143_v51 = vadd.f32 %v3060_v17, %v8444_v49 }
 0x217   : > { %v6628_v12 = vpop.f32.mrf.mxu1 }
 0x218   : > { %v6678_v23 = vpop.f32.mrf.mxu0  ;;  %9015 = vst [vmem:[#allocation37_spill] sm:$0xff] %v8610_v46  ;;  %v8613_v36 = vadd.f32 %v3631_v50, %v3143_v51  ;;  %v3146_v40 = vadd.f32 %v6628_v12, %v8449_v37  ;;  %v8629_v46 = vpop.permute.xlu0 %4809 }
 0x219   : > { %v3063_v62 = vpop.f32.mrf.mxu1 }
 0x21a   : > { %v3634_v24 = vpop.f32.mrf.mxu0  ;;  %9016 = vst [vmem:[#allocation39_spill] sm:$0xff] %v8613_v36  ;;  %v8620_v55 = vadd.f32 %v6678_v23, %v3146_v40  ;;  %v3144_v38 = vadd.f32 %v3063_v62, %v8454_v22  ;;  %v8631_v23 = vpop.permute.xlu1 %4814 }
 0x21b   : > { %v6631_v8 = vpop.f32.mrf.mxu1 }
 0x21c   : > { %v6681_v3 = vpop.f32.mrf.mxu0  ;;  %9017 = vst [vmem:[#allocation38_spill] sm:$0xff] %v8620_v55  ;;  %v8623_v7 = vadd.f32 %v3634_v24, %v3144_v38  ;;  %v3149_v49 = vadd.f32 %v6631_v8, %v8458_v26 }
 0x21d   : > { %v3076_v50 = vpop.f32.mrf.mxu1 }
 0x21e   : > { %v3647_v5 = vpop.f32.mrf.mxu0  ;;  %9018 = vst [vmem:[#allocation40_spill] sm:$0xff] %v8623_v7  ;;  %v8626_v51 = vadd.f32 %v6681_v3, %v3149_v49  ;;  %v3147_v37 = vadd.f32 %v3076_v50, %v8462_v57  ;;  %v8642_v7 = vpop.permute.xlu0 %4819 }
 0x21f   : > { %v6632_v12 = vpop.f32.mrf.mxu1 }
 0x220   : > { %v6682_v17 = vpop.f32.mrf.mxu0  ;;  %9019 = vst [vmem:[#allocation41_spill] sm:$0xff] %v8626_v51  ;;  %v8633_v40 = vadd.f32 %v3647_v5, %v3147_v37  ;;  %v3150_v22 = vadd.f32 %v6632_v12, %v8467_v19  ;;  %v8644_v5 = vpop.permute.xlu1 %4824 }
 0x221   : > { %v3079_v24 = vpop.f32.mrf.mxu1 }
 0x222   : > { %v3650_v36 = vpop.f32.mrf.mxu0  ;;  %9020 = vst [vmem:[#allocation42_spill] sm:$0xff] %v8633_v40  ;;  %v8636_v38 = vadd.f32 %v6682_v17, %v3150_v22  ;;  %v3148_v26 = vadd.f32 %v3079_v24, %v8471_v1 }
 0x223   : > { %v6635_v3 = vpop.f32.mrf.mxu1 }
 0x224   : > { %v6685_v62 = vpop.f32.mrf.mxu0  ;;  %9021 = vst [vmem:[#allocation43_spill] sm:$0xff] %v8636_v38  ;;  %v8639_v49 = vadd.f32 %v3650_v36, %v3148_v26  ;;  %v3153_v57 = vadd.f32 %v6635_v3, %v8474_v39  ;;  %v8655_v38 = vpop.permute.xlu0 %4829 }
 0x225   : > { %v3092_v50 = vpop.f32.mrf.mxu1 }
 0x226   : > { %v3663_v8 = vpop.f32.mrf.mxu0  ;;  %9022 = vst [vmem:[#allocation2_spill] sm:$0xff] %v8639_v49  ;;  %v8646_v37 = vadd.f32 %v6685_v62, %v3153_v57  ;;  %v3151_v19 = vadd.f32 %v3092_v50, %v8477_v63  ;;  %v8657_v62 = vpop.permute.xlu1 %4834 }
 0x227   : > { %v6636_v17 = vpop.f32.mrf.mxu1 }
 0x228   : > { %v6686_v51 = vpop.f32.mrf.mxu0  ;;  %9023 = vst [vmem:[#allocation5_spill] sm:$0xff] %v8646_v37  ;;  %v8649_v22 = vadd.f32 %v3663_v8, %v3151_v19  ;;  %v3154_v1 = vadd.f32 %v6636_v17, %v8480_v60 }
 0x229   : > { %v3095_v36 = vpop.f32.mrf.mxu1 }
 0x22a   : > { %v3666_v12 = vpop.f32.mrf.mxu0  ;;  %9024 = vst [vmem:[#allocation44_spill] sm:$0xff] %v8649_v22  ;;  %v8652_v26 = vadd.f32 %v6686_v51, %v3154_v1  ;;  %v3152_v39 = vadd.f32 %v3095_v36, %v8483_v2  ;;  %v8665_v22 = vpop.permute.xlu0 %4839 }
 0x22b   : > { %v6691_v3 = vpop.f32.mrf.mxu1  ;;  %v8667_v37 = vpop.permute.xlu1 %4844 }
 0x22c   : > { %v6741_v24 = vpop.f32.mrf.mxu0  ;;  %9025 = vst [vmem:[#allocation45_spill] sm:$0xff] %v8652_v26  ;;  %v8659_v63 = vadd.f32 %v3666_v12, %v3152_v39  ;;  %v4259_v8 = vadd.f32 %v6691_v3, %v8486_v15 }
 0x22d   : > { %v4066_v57 = vpop.f32.mrf.mxu1 }
 0x22e   : > { %v4470_v49 = vpop.f32.mrf.mxu0  ;;  %9026 = vst [vmem:[#allocation7_spill] sm:$0xff] %v8659_v63  ;;  %v4257_v60 = vadd.f32 %v4066_v57, %v8489_v34  ;;  %v4663_v17 = vadd.f32 %v6741_v24, %v4259_v8 }
 0x22f   : > { %v6692_v19 = vpop.f32.mrf.mxu1 }
 0x230   : > { %v6742_v50 = vpop.f32.mrf.mxu0  ;;  %v4661_v1 = vadd.f32 %v4470_v49, %v4257_v60  ;;  %v4260_v2 = vadd.f32 %v6692_v19, %v8492_v54  ;;  %v4999_v34 = vmul.f32 %v8566_v27, %v4663_v17 }
 0x231   : > { %v4069_v36 = vpop.f32.mrf.mxu1 }
 0x232   : > { %v4473_v51 = vpop.f32.mrf.mxu0  ;;  %v4664_v12 = vadd.f32 %v6742_v50, %v4260_v2  ;;  %v4258_v15 = vadd.f32 %v4069_v36, %v8495_v58  ;;  %v4997_v57 = vmul.f32 %v8564_v41, %v4661_v1 }
 0x233   : > { %v6695_v39 = vpop.f32.mrf.mxu1 }
 0x234   : > { %v6745_v26 = vpop.f32.mrf.mxu0  ;;  %v5000_v49 = vmul.f32 %v8579_v18, %v4664_v12  ;;  %v4662_v24 = vadd.f32 %v4473_v51, %v4258_v15  ;;  %v4263_v54 = vadd.f32 %v6695_v39, %v8498_v43  ;;  %v8681_v18 = vpop.permute.xlu0 %4849  ;;  %v5338_v17 = vmul.f32 %v4997_v57, %v4997_v57 }
 0x235   : > { %v4082_v8 = vpop.f32.mrf.mxu1  ;;  %v8683_v51 = vpop.permute.xlu1 %4854 }
 0x236   : > { %v4486_v3 = vpop.f32.mrf.mxu0  ;;  %v5977_v58 = vpack.c.bf16 %v5000_v49, %v4999_v34  ;;  %v4998_v60 = vmul.f32 %v8577_v11, %v4662_v24  ;;  %v4261_v27 = vadd.f32 %v4082_v8, %v8501_v10  ;;  %v4667_v43 = vadd.f32 %v6745_v26, %v4263_v54 }
 0x237   : > { %v6696_v41 = vpop.f32.mrf.mxu1  ;;  %v5340_v24 = vmul.f32 %v4999_v34, %v4999_v34  ;;  %v5341_v9 = vmul.f32 %v5000_v49, %v5000_v49 }
 0x238   : > { %v6746_v50 = vpop.f32.mrf.mxu0  ;;  %6089 = vst [vmem:[%s8676_s30 + $0x8] sm:$0xff] %v5977_v58   ;;  %v5972_v1 = vpack.c.bf16 %v4998_v60, %v4997_v57  ;;  %v5285_v2 = vadd.f32 %v4998_v60, %v4997_v57  ;;  %v5339_v36 = vmul.f32 %v4998_v60, %v4998_v60  ;;  %v4665_v12 = vadd.f32 %v4486_v3, %v4261_v27 }
 0x239   : > { %v4264_v15 = vadd.f32 %v6696_v41, %v8504_v31  ;;  %v4085_v39 = vpop.f32.mrf.mxu1  ;;  %v5003_v3 = vmul.f32 %v8603_v30, %v4667_v43  ;;  %v8693_v41 = vpop.permute.xlu0 %4859 }
 0x23a   : > { %v4489_v19 = vpop.f32.mrf.mxu0  ;;  %5973 = vst [vmem:[%s8676_s30] sm:$0xff] %v5972_v1   ;;  %v5286_v10 = vadd.f32 %v5285_v2, %v4999_v34  ;;  %v5386_v8 = vadd.f32 %v5339_v36, %v5338_v17  ;;  %v4262_v63 = vadd.f32 %v4085_v39, %v8507_v33  ;;  %v5001_v40 = vmul.f32 %v8590_v59, %v4665_v12  ;;  %v8695_v33 = vpop.permute.xlu1 %4864 }
 0x23b   : > { %v4668_v55 = vadd.f32 %v6746_v50, %v4264_v15  ;;  %v6699_v45 = vpop.f32.mrf.mxu1 }
 0x23c   : > { %v6749_v11 = vpop.f32.mrf.mxu0  ;;  %v5387_v57 = vadd.f32 %v5386_v8, %v5340_v24  ;;  %v5287_v60 = vadd.f32 %v5286_v10, %v5000_v49  ;;  %v4666_v26 = vadd.f32 %v4489_v19, %v4262_v63  ;;  %v4267_v54 = vadd.f32 %v6699_v45, %v8510_v4 }
 0x23d   : > { %v5004_v31 = vmul.f32 %v8605_v29, %v4668_v55  ;;  %v4098_v27 = vpop.f32.mrf.mxu1  ;;  %v5342_v50 = vmul.f32 %v5001_v40, %v5001_v40 }
 0x23e   : > { %v4502_v58 = vpop.f32.mrf.mxu0  ;;  %v5288_v59 = vadd.f32 %v5287_v60, %v5001_v40  ;;  %v5388_v17 = vadd.f32 %v5387_v57, %v5341_v9  ;;  %v5002_v1 = vmul.f32 %v8592_v25, %v4666_v26  ;;  %v4265_v30 = vadd.f32 %v4098_v27, %v8513_v52  ;;  %v8704_v57 = vpop.permute.xlu0 %4869 }
 0x23f   : > { %v5987_v63 = vpack.c.bf16 %v5004_v31, %v5003_v3  ;;  %v6700_v49 = vpop.f32.mrf.mxu1  ;;  %v4671_v2 = vadd.f32 %v6749_v11, %v4267_v54  ;;  %v5344_v9 = vmul.f32 %v5003_v3, %v5003_v3  ;;  %v8706_v60 = vpop.permute.xlu1 %4874  ;;  %v5345_v11 = vmul.f32 %v5004_v31, %v5004_v31 }
 0x240   : > { %v6750_v34 = vpop.f32.mrf.mxu0  ;;  %v5389_v55 = vadd.f32 %v5388_v17, %v5342_v50  ;;  %v5982_v4 = vpack.c.bf16 %v5002_v1, %v5001_v40  ;;  %v5289_v45 = vadd.f32 %v5288_v59, %v5002_v1  ;;  %v5343_v19 = vmul.f32 %v5002_v1, %v5002_v1 }
 0x241   : > { %6091 = vst [vmem:[%s8676_s30 + $0x18] sm:$0xff] %v5987_v63   ;;  %v4669_v36 = vadd.f32 %v4502_v58, %v4265_v30  ;;  %v4268_v43 = vadd.f32 %v6700_v49, %v8516_v6  ;;  %v4101_v12 = vpop.f32.mrf.mxu1  ;;  %v5007_v54 = vmul.f32 %v8629_v46, %v4671_v2 }
 0x242   : > { %v4505_v29 = vpop.f32.mrf.mxu0  ;;  %6090 = vst [vmem:[%s8676_s30 + $0x10] sm:$0xff] %v5982_v4   ;;  %v5290_v25 = vadd.f32 %v5289_v45, %v5003_v3  ;;  %v5390_v39 = vadd.f32 %v5389_v55, %v5343_v19  ;;  %v4266_v24 = vadd.f32 %v4101_v12, %v8519_v28  ;;  %v8715_v2 = vpop.permute.xlu0 %4879 }
 0x243   : > { %v5005_v52 = vmul.f32 %v8616_v0, %v4669_v36  ;;  %v4672_v10 = vadd.f32 %v6750_v34, %v4268_v43  ;;  %v6703_v8 = vpop.f32.mrf.mxu1  ;;  %v5348_v36 = vmul.f32 %v5007_v54, %v5007_v54 }
 0x244   : > { %v6753_v15 = vpop.f32.mrf.mxu0  ;;  %v5391_v58 = vadd.f32 %v5390_v39, %v5344_v9  ;;  %v5291_v6 = vadd.f32 %v5290_v25, %v5004_v31  ;;  %v4670_v26 = vadd.f32 %v4505_v29, %v4266_v24  ;;  %v4271_v28 = vadd.f32 %v6703_v8, %v8522_v13 }
 0x245   : > { %v5008_v3 = vmul.f32 %v8631_v23, %v4672_v10  ;;  %v4114_v27 = vpop.f32.mrf.mxu1  ;;  %v5346_v59 = vmul.f32 %v5005_v52, %v5005_v52 }
 0x246   : > { %v4518_v40 = vpop.f32.mrf.mxu0  ;;  %v5292_v34 = vadd.f32 %v5291_v6, %v5005_v52  ;;  %v5392_v50 = vadd.f32 %v5391_v58, %v5345_v11  ;;  %v5006_v17 = vmul.f32 %v8618_v42, %v4670_v26  ;;  %v4269_v63 = vadd.f32 %v4114_v27, %v8525_v47  ;;  %v8717_v42 = vpop.permute.xlu1 %4884 }
 0x247   : > { %v5997_v1 = vpack.c.bf16 %v5008_v3, %v5007_v54  ;;  %v6704_v31 = vpop.f32.mrf.mxu1  ;;  %v4675_v55 = vadd.f32 %v6753_v15, %v4271_v28  ;;  %v5349_v24 = vmul.f32 %v5008_v3, %v5008_v3 }
 0x248   : > { %v6754_v0 = vpop.f32.mrf.mxu0  ;;  %v5393_v49 = vadd.f32 %v5392_v50, %v5346_v59  ;;  %v5992_v46 = vpack.c.bf16 %v5006_v17, %v5005_v52  ;;  %v5293_v29 = vadd.f32 %v5292_v34, %v5006_v17  ;;  %v5347_v23 = vmul.f32 %v5006_v17, %v5006_v17  ;;  %v8727_v34 = vpop.permute.xlu0 %4889 }
 0x249   : > { %6093 = vst [vmem:[%s8676_s30 + $0x28] sm:$0xff] %v5997_v1   ;;  %v4673_v13 = vadd.f32 %v4518_v40, %v4269_v63  ;;  %v4272_v4 = vadd.f32 %v6704_v31, %v8528_v21  ;;  %v4117_v45 = vpop.f32.mrf.mxu1  ;;  %v5011_v8 = vmul.f32 %v8655_v38, %v4675_v55 }
 0x24a   : > { %v4521_v30 = vpop.f32.mrf.mxu0  ;;  %6092 = vst [vmem:[%s8676_s30 + $0x20] sm:$0xff] %v5992_v46   ;;  %v5294_v47 = vadd.f32 %v5293_v29, %v5007_v54  ;;  %v5394_v43 = vadd.f32 %v5393_v49, %v5347_v23  ;;  %v4270_v12 = vadd.f32 %v4117_v45, %v8531_v48  ;;  %v8729_v38 = vpop.permute.xlu1 %4894 }
 0x24b   : > { %v5009_v9 = vmul.f32 %v8642_v7, %v4673_v13  ;;  %v4676_v25 = vadd.f32 %v6754_v0, %v4272_v4  ;;  %v6707_v39 = vpop.f32.mrf.mxu1 }
 0x24c   : > { %v6757_v19 = vpop.f32.mrf.mxu0  ;;  %v5395_v52 = vadd.f32 %v5394_v43, %v5348_v36  ;;  %v5295_v21 = vadd.f32 %v5294_v47, %v5008_v3  ;;  %v4674_v10 = vadd.f32 %v4521_v30, %v4270_v12  ;;  %v4275_v11 = vadd.f32 %v6707_v39, %v8534_v35 }
 0x24d   : > { %v5012_v40 = vmul.f32 %v8657_v62, %v4676_v25  ;;  %v4130_v58 = vpop.f32.mrf.mxu1  ;;  %v5350_v48 = vmul.f32 %v5009_v9, %v5009_v9  ;;  %v5352_v30 = vmul.f32 %v5011_v8, %v5011_v8  ;;  %v8739_v25 = vpop.permute.xlu0 %4899 }
 0x24e   : > { %v4534_v15 = vpop.f32.mrf.mxu0  ;;  %v5296_v26 = vadd.f32 %v5295_v21, %v5009_v9  ;;  %v5396_v54 = vadd.f32 %v5395_v52, %v5349_v24  ;;  %v5010_v7 = vmul.f32 %v8644_v5, %v4674_v10  ;;  %v4273_v27 = vadd.f32 %v4130_v58, %v8537_v44 }
 0x24f   : > { %v6007_v28 = vpack.c.bf16 %v5012_v40, %v5011_v8  ;;  %v6708_v3 = vpop.f32.mrf.mxu1  ;;  %v4679_v17 = vadd.f32 %v6757_v19, %v4275_v11  ;;  %v5353_v4 = vmul.f32 %v5012_v40, %v5012_v40 }
 0x250   : > { %v6758_v6 = vpop.f32.mrf.mxu0  ;;  %v5397_v62 = vadd.f32 %v5396_v54, %v5350_v48  ;;  %v6002_v35 = vpack.c.bf16 %v5010_v7, %v5009_v9  ;;  %v5297_v59 = vadd.f32 %v5296_v26, %v5010_v7  ;;  %v5351_v50 = vmul.f32 %v5010_v7, %v5010_v7 }
 0x251   : > { %6095 = vst [vmem:[%s8676_s30 + $0x38] sm:$0xff] %v6007_v28   ;;  %v4677_v1 = vadd.f32 %v4534_v15, %v4273_v27  ;;  %v4276_v63 = vadd.f32 %v6708_v3, %v8540_v61  ;;  %v4133_v5 = vpop.f32.mrf.mxu1  ;;  %v5015_v47 = vmul.f32 %v8681_v18, %v4679_v17 }
 0x252   : > { %v4537_v0 = vpop.f32.mrf.mxu0  ;;  %6094 = vst [vmem:[%s8676_s30 + $0x30] sm:$0xff] %v6002_v35   ;;  %v5298_v44 = vadd.f32 %v5297_v59, %v5011_v8  ;;  %v5398_v49 = vadd.f32 %v5397_v62, %v5351_v50  ;;  %v4274_v46 = vadd.f32 %v4133_v5, %v8543_v53  ;;  %v8741_v53 = vpop.permute.xlu1 %4904 }
 0x253   : > { %v5013_v29 = vmul.f32 %v8665_v22, %v4677_v1  ;;  %v4680_v23 = vadd.f32 %v6758_v6, %v4276_v63  ;;  %v6711_v55 = vpop.f32.mrf.mxu1  ;;  %v5356_v54 = vmul.f32 %v5015_v47, %v5015_v47  ;;  %v8750_v62 = vpop.permute.xlu0 %4909 }
 0x254   : > { %v6761_v31 = vpop.f32.mrf.mxu0  ;;  %v5399_v45 = vadd.f32 %v5398_v49, %v5352_v30  ;;  %v5299_v36 = vadd.f32 %v5298_v44, %v5012_v40  ;;  %v4678_v19 = vadd.f32 %v4537_v0, %v4274_v46  ;;  %v4279_v43 = vadd.f32 %v6711_v55, %v8546_v56 }
 0x255   : > { %v5016_v61 = vmul.f32 %v8683_v51, %v4680_v23  ;;  %v4146_v12 = vpop.f32.mrf.mxu1  ;;  %v5354_v39 = vmul.f32 %v5013_v29, %v5013_v29 }
 0x256   : > { %v4550_v13 = vpop.f32.mrf.mxu0  ;;  %v5300_v22 = vadd.f32 %v5299_v36, %v5013_v29  ;;  %v5400_v15 = vadd.f32 %v5399_v45, %v5353_v4  ;;  %v5014_v24 = vmul.f32 %v8667_v37, %v4678_v19  ;;  %v4277_v18 = vadd.f32 %v4146_v12, %v8549_v16  ;;  %v8752_v35 = vpop.permute.xlu1 %4914  ;;  %v9028_v19 = vld [vmem:[#allocation27_spill] sm:$0xff] }
 0x257   : > { %v6017_v52 = vpack.c.bf16 %v5016_v61, %v5015_v47  ;;  %v6712_v21 = vpop.f32.mrf.mxu1  ;;  %v4683_v11 = vadd.f32 %v6761_v31, %v4279_v43  ;;  %v5357_v59 = vmul.f32 %v5016_v61, %v5016_v61  ;;  %v8761_v12 = vpop.permute.xlu0 %4919 }
 0x258   : > { %v6762_v9 = vpop.f32.mrf.mxu0  ;;  %v5401_v10 = vadd.f32 %v5400_v15, %v5354_v39  ;;  %v6012_v56 = vpack.c.bf16 %v5014_v24, %v5013_v29  ;;  %v5301_v8 = vadd.f32 %v5300_v22, %v5014_v24  ;;  %v5355_v40 = vmul.f32 %v5014_v24, %v5014_v24  ;;  %v9027_v29 = vld [vmem:[#allocation26_spill] sm:$0xff]  ;;  %v9029_v15 = vld [vmem:[#allocation29_spill] sm:$0xff] }
 0x259   : > { %6097 = vst [vmem:[%s8676_s30 + $0x48] sm:$0xff] %v6017_v52   ;;  %v4681_v58 = vadd.f32 %v4550_v13, %v4277_v18  ;;  %v4280_v6 = vadd.f32 %v6712_v21, %v8552_v32  ;;  %v4149_v26 = vpop.f32.mrf.mxu1  ;;  %v5019_v1 = vmul.f32 %v8704_v57, %v4683_v11 }
 0x25a   : > { %v4553_v51 = vpop.f32.mrf.mxu0  ;;  %6096 = vst [vmem:[%s8676_s30 + $0x40] sm:$0xff] %v6012_v56   ;;  %v5302_v37 = vadd.f32 %v5301_v8, %v5015_v47  ;;  %v5402_v7 = vadd.f32 %v5401_v10, %v5355_v40  ;;  %v4278_v28 = vadd.f32 %v4149_v26, %v8555_v20 }
 0x25b   : > { %v5017_v16 = vmul.f32 %v8693_v41, %v4681_v58  ;;  %v4684_v27 = vadd.f32 %v6762_v9, %v4280_v6  ;;  %v6715_v3 = vpop.f32.mrf.mxu1  ;;  %v5360_v9 = vmul.f32 %v5019_v1, %v5019_v1  ;;  %v9030_v6 = vld [vmem:[#allocation31_spill] sm:$0xff] }
 0x25c   : > { %v6765_v48 = vpop.f32.mrf.mxu0  ;;  %v5403_v50 = vadd.f32 %v5402_v7, %v5356_v54  ;;  %v5303_v32 = vadd.f32 %v5302_v37, %v5016_v61  ;;  %v4682_v17 = vadd.f32 %v4553_v51, %v4278_v28  ;;  %v4283_v20 = vadd.f32 %v6715_v3, %v8558_v14 }
 0x25d   : > { %v5020_v63 = vmul.f32 %v8706_v60, %v4684_v27  ;;  %v4162_v5 = vpop.f32.mrf.mxu1  ;;  %v5358_v30 = vmul.f32 %v5017_v16, %v5017_v16  ;;  %v9031_v27 = vld [vmem:[#allocation28_spill] sm:$0xff] }
 0x25e   : > { %v4566_v0 = vpop.f32.mrf.mxu0  ;;  %v5304_v31 = vadd.f32 %v5303_v32, %v5017_v16  ;;  %v5404_v44 = vadd.f32 %v5403_v50, %v5357_v59  ;;  %v5018_v49 = vmul.f32 %v8695_v33, %v4682_v17  ;;  %v4281_v23 = vadd.f32 %v4162_v5, %v9027_v29  ;;  %v8763_v33 = vpop.permute.xlu1 %4924  ;;  %v9032_v5 = vld [vmem:[#allocation30_spill] sm:$0xff] }
 0x25f   : > { %v6027_v46 = vpack.c.bf16 %v5020_v63, %v5019_v1  ;;  %v6716_v55 = vpop.f32.mrf.mxu1  ;;  %v4687_v36 = vadd.f32 %v6765_v48, %v4283_v20  ;;  %v5361_v10 = vmul.f32 %v5020_v63, %v5020_v63  ;;  %v8773_v50 = vpop.permute.xlu0 %4929 }
 0x260   : > { %v6766_v41 = vpop.f32.mrf.mxu0  ;;  %v5405_v4 = vadd.f32 %v5404_v44, %v5358_v30  ;;  %v6022_v57 = vpack.c.bf16 %v5018_v49, %v5017_v16  ;;  %v5305_v45 = vadd.f32 %v5304_v31, %v5018_v49  ;;  %v5359_v60 = vmul.f32 %v5018_v49, %v5018_v49 }
 0x261   : > { %6099 = vst [vmem:[%s8676_s30 + $0x58] sm:$0xff] %v6027_v46   ;;  %v4685_v14 = vadd.f32 %v4566_v0, %v4281_v23  ;;  %v4284_v47 = vadd.f32 %v6716_v55, %v9028_v19  ;;  %v4165_v61 = vpop.f32.mrf.mxu1  ;;  %v5023_v11 = vmul.f32 %v8727_v34, %v4687_v36  ;;  %v9033_v46 = vld [vmem:[#allocation32_spill] sm:$0xff] }
 0x262   : > { %v4569_v13 = vpop.f32.mrf.mxu0  ;;  %6098 = vst [vmem:[%s8676_s30 + $0x50] sm:$0xff] %v6022_v57   ;;  %v5306_v22 = vadd.f32 %v5305_v45, %v5019_v1  ;;  %v5406_v39 = vadd.f32 %v5405_v4, %v5359_v60  ;;  %v4282_v24 = vadd.f32 %v4165_v61, %v9029_v15  ;;  %v8775_v34 = vpop.permute.xlu1 %4934 }
 0x263   : > { %v5021_v52 = vmul.f32 %v8715_v2, %v4685_v14  ;;  %v4688_v18 = vadd.f32 %v6766_v41, %v4284_v47  ;;  %v6719_v21 = vpop.f32.mrf.mxu1  ;;  %v5364_v30 = vmul.f32 %v5023_v11, %v5023_v11  ;;  %v9034_v47 = vld [vmem:[#allocation33_spill] sm:$0xff] }
 0x264   : > { %v6769_v43 = vpop.f32.mrf.mxu0  ;;  %v5407_v56 = vadd.f32 %v5406_v39, %v5360_v9  ;;  %v5307_v8 = vadd.f32 %v5306_v22, %v5020_v63  ;;  %v4686_v40 = vadd.f32 %v4569_v13, %v4282_v24  ;;  %v4287_v26 = vadd.f32 %v6719_v21, %v9030_v6  ;;  %v8785_v22 = vpop.permute.xlu0 %4939  ;;  %v9035_v21 = vld [vmem:[#allocation34_spill] sm:$0xff]  ;;  %v9036_v6 = vld [vmem:[#allocation35_spill] sm:$0xff] }
 0x265   : > { %v5024_v58 = vmul.f32 %v8729_v38, %v4688_v18  ;;  %v4178_v48 = vpop.f32.mrf.mxu1  ;;  %v5362_v7 = vmul.f32 %v5021_v52, %v5021_v52 }
 0x266   : > { %v4582_v51 = vpop.f32.mrf.mxu0  ;;  %v5308_v37 = vadd.f32 %v5307_v8, %v5021_v52  ;;  %v5408_v28 = vadd.f32 %v5407_v56, %v5361_v10  ;;  %v5022_v2 = vmul.f32 %v8717_v42, %v4686_v40  ;;  %v4285_v3 = vadd.f32 %v4178_v48, %v9031_v27  ;;  %v8787_v39 = vpop.permute.xlu1 %4944 }
 0x267   : > { %v6037_v16 = vpack.c.bf16 %v5024_v58, %v5023_v11  ;;  %v6720_v0 = vpop.f32.mrf.mxu1  ;;  %v4691_v63 = vadd.f32 %v6769_v43, %v4287_v26  ;;  %v5365_v57 = vmul.f32 %v5024_v58, %v5024_v58 }
 0x268   : > { %v6770_v54 = vpop.f32.mrf.mxu0  ;;  %v5409_v38 = vadd.f32 %v5408_v28, %v5362_v7  ;;  %v6032_v32 = vpack.c.bf16 %v5022_v2, %v5021_v52  ;;  %v5309_v17 = vadd.f32 %v5308_v37, %v5022_v2  ;;  %v5363_v1 = vmul.f32 %v5022_v2, %v5022_v2  ;;  %v9037_v28 = vld [vmem:[#allocation36_spill] sm:$0xff] }
 0x269   : > { %6101 = vst [vmem:[%s8676_s30 + $0x68] sm:$0xff] %v6037_v16   ;;  %v4689_v20 = vadd.f32 %v4582_v51, %v4285_v3  ;;  %v4288_v41 = vadd.f32 %v6720_v0, %v9032_v5  ;;  %v4181_v42 = vpop.f32.mrf.mxu1  ;;  %v5027_v14 = vmul.f32 %v8750_v62, %v4691_v63 }
 0x26a   : > { %v4585_v59 = vpop.f32.mrf.mxu0  ;;  %6100 = vst [vmem:[%s8676_s30 + $0x60] sm:$0xff] %v6032_v32   ;;  %v5310_v44 = vadd.f32 %v5309_v17, %v5023_v11  ;;  %v5410_v49 = vadd.f32 %v5409_v38, %v5363_v1  ;;  %v4286_v29 = vadd.f32 %v4181_v42, %v9033_v46  ;;  %v4955_v38 = vpop.permute.xlu1 %4954 }
 0x26b   : > { %v5025_v23 = vmul.f32 %v8739_v25, %v4689_v20  ;;  %v4692_v55 = vadd.f32 %v6770_v54, %v4288_v41  ;;  %v6723_v13 = vpop.f32.mrf.mxu1  ;;  %v5368_v37 = vmul.f32 %v5027_v14, %v5027_v14  ;;  %v9038_v41 = vld [vmem:[#allocation37_spill] sm:$0xff] }
 0x26c   : > { %v6773_v31 = vpop.f32.mrf.mxu0  ;;  %v5411_v45 = vadd.f32 %v5410_v49, %v5364_v30  ;;  %v5311_v60 = vadd.f32 %v5310_v44, %v5024_v58  ;;  %v4690_v36 = vadd.f32 %v4585_v59, %v4286_v29  ;;  %v4291_v61 = vadd.f32 %v6723_v13, %v9034_v47  ;;  %v4950_v59 = vpop.permute.xlu0 %4949 }
 0x26d   : > { %v5028_v19 = vmul.f32 %v8752_v35, %v4692_v55  ;;  %v4194_v43 = vpop.f32.mrf.mxu1  ;;  %v5366_v15 = vmul.f32 %v5025_v23, %v5025_v23 }
 0x26e   : > { %v4598_v4 = vpop.f32.mrf.mxu0  ;;  %v5312_v25 = vadd.f32 %v5311_v60, %v5025_v23  ;;  %v5412_v24 = vadd.f32 %v5411_v45, %v5365_v57  ;;  %v5026_v52 = vmul.f32 %v8741_v53, %v4690_v36  ;;  %v4289_v62 = vadd.f32 %v4194_v43, %v9035_v21 }
 0x26f   : > { %v6047_v18 = vpack.c.bf16 %v5028_v19, %v5027_v14  ;;  %v6724_v51 = vpop.f32.mrf.mxu1  ;;  %v4695_v11 = vadd.f32 %v6773_v31, %v4291_v61  ;;  %v5369_v32 = vmul.f32 %v5028_v19, %v5028_v19 }
 0x270   : > { %v6774_v9 = vpop.f32.mrf.mxu0  ;;  %v5413_v10 = vadd.f32 %v5412_v24, %v5366_v15  ;;  %v6042_v56 = vpack.c.bf16 %v5026_v52, %v5025_v23  ;;  %v5313_v8 = vadd.f32 %v5312_v25, %v5026_v52  ;;  %v5367_v40 = vmul.f32 %v5026_v52, %v5026_v52  ;;  %v9039_v23 = vld [vmem:[#allocation39_spill] sm:$0xff]  ;;  %v4960_v43 = vpop.permute.xlu0 %4959  ;;  %v9041_v24 = vld [vmem:[#allocation40_spill] sm:$0xff] }
 0x271   : > { %6103 = vst [vmem:[%s8676_s30 + $0x78] sm:$0xff] %v6047_v18   ;;  %v4693_v58 = vadd.f32 %v4598_v4, %v4289_v62  ;;  %v4292_v26 = vadd.f32 %v6724_v51, %v9036_v6  ;;  %v4197_v48 = vpop.f32.mrf.mxu1  ;;  %v5031_v20 = vmul.f32 %v8773_v50, %v4695_v11 }
 0x272   : > { %v4601_v35 = vpop.f32.mrf.mxu0  ;;  %6102 = vst [vmem:[%s8676_s30 + $0x70] sm:$0xff] %v6042_v56   ;;  %v5314_v53 = vadd.f32 %v5313_v8, %v5027_v14  ;;  %v5414_v7 = vadd.f32 %v5413_v10, %v5367_v40  ;;  %v4290_v2 = vadd.f32 %v4197_v48, %v9037_v28  ;;  %v9040_v14 = vld [vmem:[#allocation38_spill] sm:$0xff] }
 0x273   : > { %v5029_v16 = vmul.f32 %v8761_v12, %v4693_v58  ;;  %v4696_v27 = vadd.f32 %v6774_v9, %v4292_v26  ;;  %v6727_v3 = vpop.f32.mrf.mxu1  ;;  %v4965_v9 = vpop.permute.xlu1 %4964  ;;  %v9042_v58 = vld [vmem:[#allocation41_spill] sm:$0xff]  ;;  %v9043_v28 = vld [vmem:[#allocation42_spill] sm:$0xff] }
 0x274   : > { %v6777_v54 = vpop.f32.mrf.mxu0  ;;  %v5415_v17 = vadd.f32 %v5414_v7, %v5368_v37  ;;  %v5315_v1 = vadd.f32 %v5314_v53, %v5028_v19  ;;  %v4694_v63 = vadd.f32 %v4601_v35, %v4290_v2  ;;  %v4295_v42 = vadd.f32 %v6727_v3, %v9038_v41  ;;  %v4970_v3 = vpop.permute.xlu0 %4969 }
 0x275   : > { %v5032_v5 = vmul.f32 %v8775_v34, %v4696_v27  ;;  %v4210_v31 = vpop.f32.mrf.mxu1  ;;  %v5370_v12 = vmul.f32 %v5029_v16, %v5029_v16 }
 0x276   : > { %v4614_v0 = vpop.f32.mrf.mxu0  ;;  %v5316_v44 = vadd.f32 %v5315_v1, %v5029_v16  ;;  %v5416_v49 = vadd.f32 %v5415_v17, %v5369_v32  ;;  %v5030_v46 = vmul.f32 %v8763_v33, %v4694_v63  ;;  %v4293_v55 = vadd.f32 %v4210_v31, %v9039_v23 }
 0x277   : > { %v6057_v29 = vpack.c.bf16 %v5032_v5, %v5031_v20  ;;  %v6728_v13 = vpop.f32.mrf.mxu1  ;;  %v4699_v60 = vadd.f32 %v6777_v54, %v4295_v42  ;;  %v5372_v33 = vmul.f32 %v5031_v20, %v5031_v20  ;;  %v5373_v35 = vmul.f32 %v5032_v5, %v5032_v5 }
 0x278   : > { %v6778_v30 = vpop.f32.mrf.mxu0  ;;  %v5417_v57 = vadd.f32 %v5416_v49, %v5370_v12  ;;  %v6052_v50 = vpack.c.bf16 %v5030_v46, %v5029_v16  ;;  %v5317_v45 = vadd.f32 %v5316_v44, %v5030_v46  ;;  %v5371_v34 = vmul.f32 %v5030_v46, %v5030_v46  ;;  %v9045_v44 = vld [vmem:[#allocation2_spill] sm:$0xff] }
 0x279   : > { %6105 = vst [vmem:[%s8676_s30 + $0x88] sm:$0xff] %v6057_v29   ;;  %v4697_v36 = vadd.f32 %v4614_v0, %v4293_v55  ;;  %v4296_v19 = vadd.f32 %v6728_v13, %v9040_v14  ;;  %v4213_v47 = vpop.f32.mrf.mxu1  ;;  %v5035_v40 = vmul.f32 %v4950_v59, %v4699_v60  ;;  %v4975_v0 = vpop.permute.xlu1 %4974 }
 0x27a   : > { %v4617_v4 = vpop.f32.mrf.mxu0  ;;  %6104 = vst [vmem:[%s8676_s30 + $0x80] sm:$0xff] %v6052_v50   ;;  %v5318_v25 = vadd.f32 %v5317_v45, %v5031_v20  ;;  %v5418_v15 = vadd.f32 %v5417_v57, %v5371_v34  ;;  %v4294_v52 = vadd.f32 %v4213_v47, %v9041_v24  ;;  %v9044_v20 = vld [vmem:[#allocation43_spill] sm:$0xff]  ;;  %v9046_v34 = vld [vmem:[#allocation5_spill] sm:$0xff]  ;;  %v9047_v24 = vld [vmem:[#allocation44_spill] sm:$0xff] }
 0x27b   : > { %v5033_v18 = vmul.f32 %v8785_v22, %v4697_v36  ;;  %v4700_v21 = vadd.f32 %v6778_v30, %v4296_v19  ;;  %v6731_v62 = vpop.f32.mrf.mxu1  ;;  %v4980_v19 = vpop.permute.xlu0 %4979 }
 0x27c   : > { %v6781_v61 = vpop.f32.mrf.mxu0  ;;  %v5419_v10 = vadd.f32 %v5418_v15, %v5372_v33  ;;  %v5319_v56 = vadd.f32 %v5318_v25, %v5032_v5  ;;  %v4698_v8 = vadd.f32 %v4617_v4, %v4294_v52  ;;  %v4299_v6 = vadd.f32 %v6731_v62, %v9042_v58 }
 0x27d   : > { %v5036_v11 = vmul.f32 %v4955_v38, %v4700_v21  ;;  %v4226_v26 = vpop.f32.mrf.mxu1  ;;  %v5374_v37 = vmul.f32 %v5033_v18, %v5033_v18  ;;  %v4985_v47 = vpop.permute.xlu1 %4984 }
 0x27e   : > { %v4630_v51 = vpop.f32.mrf.mxu0  ;;  %v5320_v54 = vadd.f32 %v5319_v56, %v5033_v18  ;;  %v5420_v53 = vadd.f32 %v5419_v10, %v5373_v35  ;;  %v5034_v7 = vmul.f32 %v8787_v39, %v4698_v8  ;;  %v4297_v2 = vadd.f32 %v4226_v26, %v9043_v28  ;;  %v9048_v8 = vld [vmem:[#allocation45_spill] sm:$0xff] }
 0x27f   : > { %v6067_v22 = vpack.c.bf16 %v5036_v11, %v5035_v40  ;;  %v6732_v16 = vpop.f32.mrf.mxu1  ;;  %v4703_v1 = vadd.f32 %v6781_v61, %v4299_v6  ;;  %v5376_v39 = vmul.f32 %v5035_v40, %v5035_v40  ;;  %v5377_v55 = vmul.f32 %v5036_v11, %v5036_v11 }
 0x280   : > { %v6782_v48 = vpop.f32.mrf.mxu0  ;;  %v5421_v59 = vadd.f32 %v5420_v53, %v5374_v37  ;;  %v6062_v38 = vpack.c.bf16 %v5034_v7, %v5033_v18  ;;  %v5321_v32 = vadd.f32 %v5320_v54, %v5034_v7  ;;  %v5375_v17 = vmul.f32 %v5034_v7, %v5034_v7  ;;  %v4990_v7 = vpop.permute.xlu0 %4989 }
 0x281   : > { %6107 = vst [vmem:[%s8676_s30 + $0x98] sm:$0xff] %v6067_v22   ;;  %v4701_v63 = vadd.f32 %v4630_v51, %v4297_v2  ;;  %v4300_v5 = vadd.f32 %v6732_v16, %v9044_v20  ;;  %v4229_v41 = vpop.f32.mrf.mxu1  ;;  %v5039_v50 = vmul.f32 %v4970_v3, %v4703_v1  ;;  %v4995_v22 = vpop.permute.xlu1 %4994 }
 0x282   : > { %v4633_v27 = vpop.f32.mrf.mxu0  ;;  %6106 = vst [vmem:[%s8676_s30 + $0x90] sm:$0xff] %v6062_v38   ;;  %v5322_v31 = vadd.f32 %v5321_v32, %v5035_v40  ;;  %v5422_v30 = vadd.f32 %v5421_v59, %v5375_v17  ;;  %v4298_v12 = vadd.f32 %v4229_v41, %v9045_v44 }
 0x283   : > { %v5037_v49 = vmul.f32 %v4960_v43, %v4701_v63  ;;  %v4704_v46 = vadd.f32 %v6782_v48, %v4300_v5  ;;  %v6735_v29 = vpop.f32.mrf.mxu1  ;;  %v5380_v6 = vmul.f32 %v5039_v50, %v5039_v50 }
 0x284   : > { %v6785_v42 = vpop.f32.mrf.mxu0  ;;  %v5423_v13 = vadd.f32 %v5422_v30, %v5376_v39  ;;  %v5323_v4 = vadd.f32 %v5322_v31, %v5036_v11  ;;  %v4702_v57 = vadd.f32 %v4633_v27, %v4298_v12  ;;  %v4303_v60 = vadd.f32 %v6735_v29, %v9046_v34 }
 0x285   : > { %v5040_v45 = vmul.f32 %v4975_v0, %v4704_v46  ;;  %v4242_v36 = vpop.f32.mrf.mxu1  ;;  %v5378_v33 = vmul.f32 %v5037_v49, %v5037_v49 }
 0x286   : > { %v4646_v23 = vpop.f32.mrf.mxu0  ;;  %v5324_v61 = vadd.f32 %v5323_v4, %v5037_v49  ;;  %v5424_v25 = vadd.f32 %v5423_v13, %v5377_v55  ;;  %v5038_v43 = vmul.f32 %v4965_v9, %v4702_v57  ;;  %v4301_v52 = vadd.f32 %v4242_v36, %v9047_v24  ;;  %v9049_v9 = vld [vmem:[#allocation7_spill] sm:$0xff] }
 0x287   : > { %v6077_v15 = vpack.c.bf16 %v5040_v45, %v5039_v50  ;;  %v6736_v18 = vpop.f32.mrf.mxu1  ;;  %v4707_v10 = vadd.f32 %v6785_v42, %v4303_v60  ;;  %v5381_v28 = vmul.f32 %v5040_v45, %v5040_v45 }
 0x288   : > { %v6786_v14 = vpop.f32.mrf.mxu0  ;;  %v5425_v21 = vadd.f32 %v5424_v25, %v5378_v33  ;;  %v6072_v62 = vpack.c.bf16 %v5038_v43, %v5037_v49  ;;  %v5325_v51 = vadd.f32 %v5324_v61, %v5038_v43  ;;  %v5379_v35 = vmul.f32 %v5038_v43, %v5038_v43 }
 0x289   : > { %6109 = vst [vmem:[%s8676_s30 + $0xa8] sm:$0xff] %v6077_v15   ;;  %v4705_v56 = vadd.f32 %v4646_v23, %v4301_v52  ;;  %v4304_v40 = vadd.f32 %v6736_v18, %v9048_v8  ;;  %v4245_v11 = vpop.f32.mrf.mxu1  ;;  %v5043_v3 = vmul.f32 %v4990_v7, %v4707_v10 }
 0x28a   : > { %v4649_v58 = vpop.f32.mrf.mxu0  ;;  %6108 = vst [vmem:[%s8676_s30 + $0xa0] sm:$0xff] %v6072_v62   ;;  %v5326_v26 = vadd.f32 %v5325_v51, %v5039_v50  ;;  %v5426_v48 = vadd.f32 %v5425_v21, %v5379_v35  ;;  %v4302_v54 = vadd.f32 %v4245_v11, %v9049_v9 }
 0x28b   : > { %v5041_v37 = vmul.f32 %v4980_v19, %v4705_v56  ;;  %v4708_v53 = vadd.f32 %v6786_v14, %v4304_v40  ;;  %v5384_v42 = vmul.f32 %v5043_v3, %v5043_v3 }
 0x28c   : > { %v5427_v2 = vadd.f32 %v5426_v48, %v5380_v6  ;;  %v5327_v16 = vadd.f32 %v5326_v26, %v5040_v45  ;;  %v4706_v27 = vadd.f32 %v4649_v58, %v4302_v54 }
 0x28d   : > { %v5044_v0 = vmul.f32 %v4995_v22, %v4708_v53  ;;  %v5382_v38 = vmul.f32 %v5041_v37, %v5041_v37 }
 0x28e   : > { %v5328_v59 = vadd.f32 %v5327_v16, %v5041_v37  ;;  %v5428_v32 = vadd.f32 %v5427_v2, %v5381_v28  ;;  %v5042_v17 = vmul.f32 %v4985_v47, %v4706_v27 }
 0x28f   : > { %v6087_v1 = vpack.c.bf16 %v5044_v0, %v5043_v3  ;;  %v5385_v30 = vmul.f32 %v5044_v0, %v5044_v0 }
 0x290   : > { %v5429_v63 = vadd.f32 %v5428_v32, %v5382_v38  ;;  %v6082_v20 = vpack.c.bf16 %v5042_v17, %v5041_v37  ;;  %v5329_v5 = vadd.f32 %v5328_v59, %v5042_v17  ;;  %v5383_v41 = vmul.f32 %v5042_v17, %v5042_v17 }
 0x291   : > { %6111 = vst [vmem:[%s8676_s30 + $0xb8] sm:$0xff] %v6087_v1  }
 0x292   : > { %6110 = vst [vmem:[%s8676_s30 + $0xb0] sm:$0xff] %v6082_v20   ;;  %v5330_v39 = vadd.f32 %v5329_v5, %v5043_v3  ;;  %v5430_v31 = vadd.f32 %v5429_v63, %v5383_v41 }
 0x294   : > { %v5331_v44 = vadd.f32 %v5330_v39, %v5044_v0  ;;  %v5431_v12 = vadd.f32 %v5430_v31, %v5384_v42 }
 0x296   : > { %v5332_v49 = vrot.slane %v5331_v44, 4  ;;  %v5432_v46 = vadd.f32 %v5431_v12, %v5385_v30 }
 0x298   : > { %v5333_v29 = vadd.f32 %v5332_v49, %v5331_v44  ;;  %v5433_v23 = vrot.slane %v5432_v46, 4 }
 0x29a   : > { %v5334_v55 = vrot.slane %v5333_v29, 2  ;;  %v5434_v13 = vadd.f32 %v5433_v23, %v5432_v46 }
 0x29c   : > { %v5335_v4 = vadd.f32 %v5334_v55, %v5333_v29  ;;  %v5435_v57 = vrot.slane %v5434_v13, 2 }
 0x29e   : > { %v5336_v50 = vrot.slane %v5335_v4, 1  ;;  %v5436_v45 = vadd.f32 %v5435_v57, %v5434_v13 }
 0x2a0   : > { %v5337_v34 = vadd.f32 %v5336_v50, %v5335_v4  ;;  %v5437_v60 = vrot.slane %v5436_v45, 1 }
 0x2a2   : > { %v5438_v36 = vadd.f32 %v5437_v60, %v5436_v45  ;;  %5439 = vst [vmem:[%s241_s9] sm:$0xff] %v5337_v34 }
 0x2a4   : > { %5440 = vst [vmem:[%s245_s12] sm:$0xff] %v5438_v36 }
 0x2a5 PF: > { %s16_s18 = sadd.s32 1, %s6898_s18  }
 0x2a6   : > { %p13_p4 = scmp.ge.s32.totalorder %s16_s18, 4  }
 0x2a8   :  { %15 = sbr.rel (!%p13_p4) target bundleno = 1 (0x1), region = 94 }

</bundles_post_ra>
